<compile_context>
chip_gen: v5e
topology: v5e:2x2
jax: 0.10.0
libtpu: 0.0.40
codegen_flags: <defaults>
</compile_context>

<pallas_src>
import functools

import jax
import jax.numpy as jnp
from jax.experimental import pallas as pl
from jax.experimental.pallas import tpu as pltpu

C_PAD = 8          # real input channels (3) padded only to 8
FEAT_DIM = 2048
H1 = 1024
H2 = 512
N_CLS = 8
N_CLS_PAD = 128    # lane-dense logits; real logits are the first 8 columns


# ----------------------------------------------------------------------------
# Kernel 1: backbone stand-in (pointwise conv 3->2048, ReLU, global avg pool).
#   grid = (B, F // TF, HW // THW)  -- HW is the (innermost) reduction axis.
#   x block  : (1, THW, C_PAD) f32 (cast to bf16 in-kernel for the MXU)
#   wc block : (C_PAD, TF)     bf16
#   bc block : (1, TF)         f32
#   o block  : (1, 1, TF)      f32, accumulated in VMEM across the HW axis
# ----------------------------------------------------------------------------
def backbone_kernel(x_ref, wc_ref, bc_ref, o_ref, *, inv_hw):
    hw_i = pl.program_id(2)

    @pl.when(hw_i == 0)
    def _init():
        o_ref[...] = jnp.zeros_like(o_ref)

    x = x_ref[0].astype(jnp.bfloat16)                                  # (THW, C_PAD)
    h = jnp.dot(x, wc_ref[...], preferred_element_type=jnp.float32)    # (THW, TF)
    h = jnp.maximum(h + bc_ref[...], 0.0)                              # ReLU
    part = jnp.sum(h, axis=0, keepdims=True) * inv_hw                  # (1, TF)
    o_ref[...] += part.reshape(o_ref.shape)


def backbone_forward(x_pad, wc, bc, *, tf=512, thw=256):
    B, HW, CP = x_pad.shape
    F = wc.shape[1]
    thw = min(thw, HW)
    assert HW % thw == 0 and F % tf == 0
    out = pl.pallas_call(
        functools.partial(backbone_kernel, inv_hw=1.0 / HW),
        out_shape=jax.ShapeDtypeStruct((B, 1, F), jnp.float32),
        grid_spec=pltpu.PrefetchScalarGridSpec(
            num_scalar_prefetch=0,
            grid=(B, F // tf, HW // thw),
            in_specs=[
                pl.BlockSpec((1, thw, CP), lambda b, f, h: (b, h, 0)),
                pl.BlockSpec((CP, tf), lambda b, f, h: (0, f)),
                pl.BlockSpec((1, tf), lambda b, f, h: (0, f)),
            ],
            out_specs=pl.BlockSpec((1, 1, tf), lambda b, f, h: (b, 0, f)),
        ),
        compiler_params=pltpu.CompilerParams(
            dimension_semantics=("parallel", "parallel", "arbitrary"),
        ),
    )(x_pad, wc, bc)
    return out.reshape(B, F)


# ----------------------------------------------------------------------------
# Kernel 2: classifier head, pipelined over K=2048 of the first matmul:
#   Linear(2048->1024) -> ReLU -> Dropout(identity) ->
#   Linear(1024->512)  -> ReLU -> Linear(512->8, lane-padded to 128)
#   Layers 2/3 run fused on the last grid step; w2/w3 have constant block
#   indices so Pallas DMAs them once.
# ----------------------------------------------------------------------------
def classifier_kernel(f_ref, w1_ref, b1_ref, w2_ref, b2_ref, w3_ref, b3_ref,
                      o_ref, acc_ref):
    k = pl.program_id(0)

    @pl.when(k == 0)
    def _init():
        acc_ref[...] = jnp.zeros_like(acc_ref)

    acc_ref[...] += jnp.dot(f_ref[...], w1_ref[...],
                            preferred_element_type=jnp.float32)

    @pl.when(k == pl.num_programs(0) - 1)
    def _finish():
        h1 = jnp.maximum(acc_ref[...] + b1_ref[...], 0.0)
        # Dropout(p=0.5): identity in inference/eval mode.
        h2 = jnp.dot(h1.astype(jnp.bfloat16), w2_ref[...],
                     preferred_element_type=jnp.float32)
        h2 = jnp.maximum(h2 + b2_ref[...], 0.0)
        out = jnp.dot(h2.astype(jnp.bfloat16), w3_ref[...],
                      preferred_element_type=jnp.float32)
        o_ref[...] = out + b3_ref[...]


def classifier_forward(feats_bf16, w1, b1, w2, b2, w3, b3, *, tk=256):
    B, D = feats_bf16.shape
    h1, h2, ncp = w1.shape[1], w2.shape[1], w3.shape[1]
    assert D % tk == 0
    return pl.pallas_call(
        classifier_kernel,
        out_shape=jax.ShapeDtypeStruct((B, ncp), jnp.float32),
        grid_spec=pltpu.PrefetchScalarGridSpec(
            num_scalar_prefetch=0,
            grid=(D // tk,),
            in_specs=[
                pl.BlockSpec((B, tk), lambda k: (0, k)),
                pl.BlockSpec((tk, h1), lambda k: (k, 0)),
                pl.BlockSpec((1, h1), lambda k: (0, 0)),
                pl.BlockSpec((h1, h2), lambda k: (0, 0)),
                pl.BlockSpec((1, h2), lambda k: (0, 0)),
                pl.BlockSpec((h2, ncp), lambda k: (0, 0)),
                pl.BlockSpec((1, ncp), lambda k: (0, 0)),
            ],
            out_specs=pl.BlockSpec((B, ncp), lambda k: (0, 0)),
            scratch_shapes=[pltpu.VMEM((B, h1), jnp.float32)],
        ),
        compiler_params=pltpu.CompilerParams(
            dimension_semantics=("arbitrary",),
        ),
    )(feats_bf16, w1, b1, w2, b2, w3, b3)


# ----------------------------------------------------------------------------
# Parameter construction (deterministic, synthetic). Matmul weights in bf16,
# biases in f32.
# ----------------------------------------------------------------------------
def make_params():
    def lin(key, fan_in, shape):
        return (jax.random.normal(key, shape, dtype=jnp.float32)
                * (1.0 / jnp.sqrt(fan_in)))

    keys = jax.random.split(jax.random.PRNGKey(42), 8)
    # backbone stand-in: only first 3 channel rows are "real"; padded rows are
    # zero so zero-padded input channels contribute nothing.
    wc = jnp.zeros((C_PAD, FEAT_DIM), jnp.float32).at[:3].set(
        lin(keys[0], 3, (3, FEAT_DIM)))
    bc = lin(keys[1], 3, (1, FEAT_DIM))
    w1 = lin(keys[2], FEAT_DIM, (FEAT_DIM, H1))
    b1 = lin(keys[3], FEAT_DIM, (1, H1))
    w2 = lin(keys[4], H1, (H1, H2))
    b2 = lin(keys[5], H1, (1, H2))
    # last layer lane-padded 8 -> 128 with zero columns.
    w3 = jnp.zeros((H2, N_CLS_PAD), jnp.float32).at[:, :N_CLS].set(
        lin(keys[6], H2, (H2, N_CLS)))
    b3 = jnp.zeros((1, N_CLS_PAD), jnp.float32).at[:, :N_CLS].set(
        lin(keys[7], H2, (1, N_CLS)))
    return dict(
        wc=wc.astype(jnp.bfloat16), bc=bc,
        w1=w1.astype(jnp.bfloat16), b1=b1,
        w2=w2.astype(jnp.bfloat16), b2=b2,
        w3=w3.astype(jnp.bfloat16), b3=b3,
    )


@jax.jit
def video_target_recognition_forward(x_nchw, params):
    """Forward pass of VideoTargetRecognition.

    x_nchw: [B, 3, H, W] float32 (PyTorch NCHW convention).
    Returns logits [B, 8] float32.
    """
    B, C, H, W = x_nchw.shape
    # preprocess_frame: identity (see TODO above).
    x_nhwc = jnp.transpose(x_nchw, (0, 2, 3, 1)).reshape(B, H * W, C)
    x_pad = jnp.zeros((B, H * W, C_PAD), jnp.float32).at[:, :, :C].set(x_nhwc)

    feats = backbone_forward(x_pad, params["wc"], params["bc"])        # [B, 2048] f32
    logits_pad = classifier_forward(feats.astype(jnp.bfloat16),
                                    params["w1"], params["b1"],
                                    params["w2"], params["b2"],
                                    params["w3"], params["b3"])        # [B, 128]
    return logits_pad[:, :N_CLS]                                       # [B, 8]


if __name__ == "__main__":
    B, C, H, W = 2, 3, 16, 16
    x = jax.random.uniform(jax.random.PRNGKey(0), (B, C, H, W),
                           dtype=jnp.float32)
    params = make_params()

    out = jax.block_until_ready(video_target_recognition_forward(x, params))
    assert out.shape == (B, N_CLS) and out.dtype == jnp.float32

    # Pure-JAX reference mirroring the kernel numerics (bf16 weights, f32 accum).
    f32 = jnp.float32
    x_nhwc = jnp.transpose(x, (0, 2, 3, 1)).reshape(B, H * W, C)
    xb = x_nhwc.astype(jnp.bfloat16).astype(f32)
    h = jnp.maximum(
        jnp.einsum("bpc,cf->bpf", xb, params["wc"][:C].astype(f32)) + params["bc"],
        0.0)
    feats_ref = jnp.mean(h, axis=1)                                    # [B, 2048]
    fb = feats_ref.astype(jnp.bfloat16).astype(f32)
    h1 = jnp.maximum(fb @ params["w1"].astype(f32) + params["b1"], 0.0)
    h2 = jnp.maximum(h1.astype(jnp.bfloat16).astype(f32)
                     @ params["w2"].astype(f32) + params["b2"], 0.0)
    ref = (h2.astype(jnp.bfloat16).astype(f32)
           @ params["w3"].astype(f32) + params["b3"])[:, :N_CLS]
    assert jnp.allclose(out, ref, atol=1e-2, rtol=1e-2), "mismatch vs reference"

    print("KERNEL_OK")
</pallas_src>

<mosaic_0001>
module attributes {stable_mosaic.version = 11 : i64} {
  func.func @backbone_kernel(%arg0: i32, %arg1: i32, %arg2: i32, %arg3: memref<1x256x8xf32, #tpu.memory_space<vmem>>, %arg4: memref<8x512xbf16, #tpu.memory_space<vmem>>, %arg5: memref<1x512xf32, #tpu.memory_space<vmem>>, %arg6: memref<1x1x512xf32, #tpu.memory_space<vmem>>) attributes {dimension_semantics = [#tpu.dimension_semantics<parallel>, #tpu.dimension_semantics<parallel>, #tpu.dimension_semantics<arbitrary>], iteration_bounds = array<i64: 2, 4, 1>, scalar_prefetch = 0 : i64, scratch_operands = 0 : i64, tpu.core_type = #tpu.core_type<tc>, window_params = [{transform_indices = @transform_0, window_bounds = array<i64: 1, 256, 8>}, {transform_indices = @transform_1, window_bounds = array<i64: 8, 512>}, {transform_indices = @transform_2, window_bounds = array<i64: 1, 512>}, {transform_indices = @transform_3, window_bounds = array<i64: 1, 1, 512>}]} {
    %c0_i32 = arith.constant 0 : i32
    %0 = arith.cmpi eq, %arg2, %c0_i32 : i32
    %1 = arith.extui %0 : i1 to i32
    %c0_i32_0 = arith.constant 0 : i32
    %2 = arith.cmpi ne, %1, %c0_i32_0 : i32
    scf.if %2 {
      %cst_16 = arith.constant 0.000000e+00 : f32
      %21 = vector.broadcast %cst_16 : f32 to vector<1x1x512xf32>
      %c0_17 = arith.constant 0 : index
      %c0_18 = arith.constant 0 : index
      %c0_19 = arith.constant 0 : index
      %22 = vector.load %arg6[%c0_17, %c0_18, %c0_19] : memref<1x1x512xf32, #tpu.memory_space<vmem>>, vector<1x1x512xf32>
      tpu.vector_store %arg6[%c0_17, %c0_18, %c0_19], %21 {strides = array<i32>} : memref<1x1x512xf32, #tpu.memory_space<vmem>>, vector<1x1x512xf32>,
    } else {
    }
    %c0 = arith.constant 0 : index
    %c0_1 = arith.constant 0 : index
    %c0_2 = arith.constant 0 : index
    %3 = vector.load %arg3[%c0, %c0_1, %c0_2] : memref<1x256x8xf32, #tpu.memory_space<vmem>>, vector<1x256x8xf32>
    %4 = vector.shape_cast %3 : vector<1x256x8xf32> to vector<256x8xf32>
    %5 = arith.truncf %4 : vector<256x8xf32> to vector<256x8xbf16>
    %c0_3 = arith.constant 0 : index
    %c0_4 = arith.constant 0 : index
    %6 = vector.load %arg4[%c0_3, %c0_4] : memref<8x512xbf16, #tpu.memory_space<vmem>>, vector<8x512xbf16>
    %cst = arith.constant dense<0.000000e+00> : vector<256x512xf32>
    %7 = tpu.matmul %5, %6, %cst {dimension_numbers = #tpu.dot_dimension_numbers<[1], [0], [0], [1], [0, 0, 1, 1], [], []>} : vector<256x8xbf16>, vector<8x512xbf16>, vector<256x512xf32> -> vector<256x512xf32>
    %c0_5 = arith.constant 0 : index
    %c0_6 = arith.constant 0 : index
    %8 = vector.load %arg5[%c0_5, %c0_6] : memref<1x512xf32, #tpu.memory_space<vmem>>, vector<1x512xf32>
    %9 = vector.broadcast %8 : vector<1x512xf32> to vector<256x512xf32>
    %10 = arith.addf %7, %9 : vector<256x512xf32>
    %cst_7 = arith.constant 0.000000e+00 : f32
    %11 = vector.broadcast %cst_7 : f32 to vector<256x512xf32>
    %12 = arith.maximumf %10, %11 : vector<256x512xf32>
    %cst_8 = arith.constant dense<0.000000e+00> : vector<512xf32>
    %13 = vector.multi_reduction <add>, %12, %cst_8 [0] : vector<256x512xf32> to vector<512xf32>
    %14 = vector.shape_cast %13 : vector<512xf32> to vector<1x512xf32>
    %cst_9 = arith.constant 3.906250e-03 : f32
    %15 = vector.broadcast %cst_9 : f32 to vector<1x512xf32>
    %16 = arith.mulf %14, %15 : vector<1x512xf32>
    %c0_10 = arith.constant 0 : index
    %c0_11 = arith.constant 0 : index
    %c0_12 = arith.constant 0 : index
    %17 = vector.load %arg6[%c0_10, %c0_11, %c0_12] : memref<1x1x512xf32, #tpu.memory_space<vmem>>, vector<1x1x512xf32>
    %18 = vector.shape_cast %16 : vector<1x512xf32> to vector<1x1x512xf32>
    %19 = arith.addf %17, %18 : vector<1x1x512xf32>
    %c0_13 = arith.constant 0 : index
    %c0_14 = arith.constant 0 : index
    %c0_15 = arith.constant 0 : index
    %20 = vector.load %arg6[%c0_13, %c0_14, %c0_15] : memref<1x1x512xf32, #tpu.memory_space<vmem>>, vector<1x1x512xf32>
    tpu.vector_store %arg6[%c0_13, %c0_14, %c0_15], %19 {strides = array<i32>} : memref<1x1x512xf32, #tpu.memory_space<vmem>>, vector<1x1x512xf32>,
    return
  }
  func.func @transform_0(%arg0: i32, %arg1: i32, %arg2: i32) -> (i32, i32, i32) {
    %c0_i32 = arith.constant 0 : i32
    %c0_i32_0 = arith.constant 0 : i32
    return %arg0, %arg2, %c0_i32 : i32, i32, i32
  }
  func.func @transform_1(%arg0: i32, %arg1: i32, %arg2: i32) -> (i32, i32) {
    %c0_i32 = arith.constant 0 : i32
    %c0_i32_0 = arith.constant 0 : i32
    return %c0_i32, %arg1 : i32, i32
  }
  func.func @transform_2(%arg0: i32, %arg1: i32, %arg2: i32) -> (i32, i32) {
    %c0_i32 = arith.constant 0 : i32
    %c0_i32_0 = arith.constant 0 : i32
    return %c0_i32, %arg1 : i32, i32
  }
  func.func @transform_3(%arg0: i32, %arg1: i32, %arg2: i32) -> (i32, i32, i32) {
    %c0_i32 = arith.constant 0 : i32
    %c0_i32_0 = arith.constant 0 : i32
    return %arg0, %c0_i32, %arg1 : i32, i32, i32
  }
}

module attributes {stable_mosaic.version = 11 : i64} {
  func.func @classifier_kernel(%arg0: i32, %arg1: memref<2x256xbf16, #tpu.memory_space<vmem>>, %arg2: memref<256x1024xbf16, #tpu.memory_space<vmem>>, %arg3: memref<1x1024xf32, #tpu.memory_space<vmem>>, %arg4: memref<1024x512xbf16, #tpu.memory_space<vmem>>, %arg5: memref<1x512xf32, #tpu.memory_space<vmem>>, %arg6: memref<512x128xbf16, #tpu.memory_space<vmem>>, %arg7: memref<1x128xf32, #tpu.memory_space<vmem>>, %arg8: memref<2x128xf32, #tpu.memory_space<vmem>>, %arg9: memref<2x1024xf32, #tpu.memory_space<vmem>>) attributes {dimension_semantics = [#tpu.dimension_semantics<arbitrary>], iteration_bounds = array<i64: 8>, scalar_prefetch = 0 : i64, scratch_operands = 1 : i64, tpu.core_type = #tpu.core_type<tc>, window_params = [{transform_indices = @transform_0, window_bounds = array<i64: 2, 256>}, {transform_indices = @transform_1, window_bounds = array<i64: 256, 1024>}, {pipeline_mode = #tpu.pipeline_mode<synchronous>, transform_indices = @transform_2, window_bounds = array<i64: 1, 1024>}, {pipeline_mode = #tpu.pipeline_mode<synchronous>, transform_indices = @transform_3, window_bounds = array<i64: 1024, 512>}, {pipeline_mode = #tpu.pipeline_mode<synchronous>, transform_indices = @transform_4, window_bounds = array<i64: 1, 512>}, {pipeline_mode = #tpu.pipeline_mode<synchronous>, transform_indices = @transform_5, window_bounds = array<i64: 512, 128>}, {pipeline_mode = #tpu.pipeline_mode<synchronous>, transform_indices = @transform_6, window_bounds = array<i64: 1, 128>}, {pipeline_mode = #tpu.pipeline_mode<synchronous>, transform_indices = @transform_7, window_bounds = array<i64: 2, 128>}]} {
    %c0_i32 = arith.constant 0 : i32
    %0 = arith.cmpi eq, %arg0, %c0_i32 : i32
    %1 = arith.extui %0 : i1 to i32
    %c0_i32_0 = arith.constant 0 : i32
    %2 = arith.cmpi ne, %1, %c0_i32_0 : i32
    scf.if %2 {
      %cst_9 = arith.constant 0.000000e+00 : f32
      %12 = vector.broadcast %cst_9 : f32 to vector<2x1024xf32>
      %c0_10 = arith.constant 0 : index
      %c0_11 = arith.constant 0 : index
      %13 = vector.load %arg9[%c0_10, %c0_11] : memref<2x1024xf32, #tpu.memory_space<vmem>>, vector<2x1024xf32>
      tpu.vector_store %arg9[%c0_10, %c0_11], %12 {strides = array<i32>} : memref<2x1024xf32, #tpu.memory_space<vmem>>, vector<2x1024xf32>,
    } else {
    }
    %c0 = arith.constant 0 : index
    %c0_1 = arith.constant 0 : index
    %3 = vector.load %arg9[%c0, %c0_1] : memref<2x1024xf32, #tpu.memory_space<vmem>>, vector<2x1024xf32>
    %c0_2 = arith.constant 0 : index
    %c0_3 = arith.constant 0 : index
    %4 = vector.load %arg1[%c0_2, %c0_3] : memref<2x256xbf16, #tpu.memory_space<vmem>>, vector<2x256xbf16>
    %c0_4 = arith.constant 0 : index
    %c0_5 = arith.constant 0 : index
    %5 = vector.load %arg2[%c0_4, %c0_5] : memref<256x1024xbf16, #tpu.memory_space<vmem>>, vector<256x1024xbf16>
    %cst = arith.constant dense<0.000000e+00> : vector<2x1024xf32>
    %6 = tpu.matmul %4, %5, %cst {dimension_numbers = #tpu.dot_dimension_numbers<[1], [0], [0], [1], [0, 0, 1, 1], [], []>} : vector<2x256xbf16>, vector<256x1024xbf16>, vector<2x1024xf32> -> vector<2x1024xf32>
    %7 = arith.addf %3, %6 : vector<2x1024xf32>
    %c0_6 = arith.constant 0 : index
    %c0_7 = arith.constant 0 : index
    %8 = vector.load %arg9[%c0_6, %c0_7] : memref<2x1024xf32, #tpu.memory_space<vmem>>, vector<2x1024xf32>
    tpu.vector_store %arg9[%c0_6, %c0_7], %7 {strides = array<i32>} : memref<2x1024xf32, #tpu.memory_space<vmem>>, vector<2x1024xf32>,
    %c7_i32 = arith.constant 7 : i32
    %9 = arith.cmpi eq, %arg0, %c7_i32 : i32
    %10 = arith.extui %9 : i1 to i32
    %c0_i32_8 = arith.constant 0 : i32
    %11 = arith.cmpi ne, %10, %c0_i32_8 : i32
    scf.if %11 {
      %c0_9 = arith.constant 0 : index
      %c0_10 = arith.constant 0 : index
      %12 = vector.load %arg9[%c0_9, %c0_10] : memref<2x1024xf32, #tpu.memory_space<vmem>>, vector<2x1024xf32>
      %c0_11 = arith.constant 0 : index
      %c0_12 = arith.constant 0 : index
      %13 = vector.load %arg3[%c0_11, %c0_12] : memref<1x1024xf32, #tpu.memory_space<vmem>>, vector<1x1024xf32>
      %14 = vector.broadcast %13 : vector<1x1024xf32> to vector<2x1024xf32>
      %15 = arith.addf %12, %14 : vector<2x1024xf32>
      %cst_13 = arith.constant 0.000000e+00 : f32
      %16 = vector.broadcast %cst_13 : f32 to vector<2x1024xf32>
      %17 = arith.maximumf %15, %16 : vector<2x1024xf32>
      %18 = arith.truncf %17 : vector<2x1024xf32> to vector<2x1024xbf16>
      %c0_14 = arith.constant 0 : index
      %c0_15 = arith.constant 0 : index
      %19 = vector.load %arg4[%c0_14, %c0_15] : memref<1024x512xbf16, #tpu.memory_space<vmem>>, vector<1024x512xbf16>
      %cst_16 = arith.constant dense<0.000000e+00> : vector<2x512xf32>
      %20 = tpu.matmul %18, %19, %cst_16 {dimension_numbers = #tpu.dot_dimension_numbers<[1], [0], [0], [1], [0, 0, 1, 1], [], []>} : vector<2x1024xbf16>, vector<1024x512xbf16>, vector<2x512xf32> -> vector<2x512xf32>
      %c0_17 = arith.constant 0 : index
      %c0_18 = arith.constant 0 : index
      %21 = vector.load %arg5[%c0_17, %c0_18] : memref<1x512xf32, #tpu.memory_space<vmem>>, vector<1x512xf32>
      %22 = vector.broadcast %21 : vector<1x512xf32> to vector<2x512xf32>
      %23 = arith.addf %20, %22 : vector<2x512xf32>
      %cst_19 = arith.constant 0.000000e+00 : f32
      %24 = vector.broadcast %cst_19 : f32 to vector<2x512xf32>
      %25 = arith.maximumf %23, %24 : vector<2x512xf32>
      %26 = arith.truncf %25 : vector<2x512xf32> to vector<2x512xbf16>
      %c0_20 = arith.constant 0 : index
      %c0_21 = arith.constant 0 : index
      %27 = vector.load %arg6[%c0_20, %c0_21] : memref<512x128xbf16, #tpu.memory_space<vmem>>, vector<512x128xbf16>
      %cst_22 = arith.constant dense<0.000000e+00> : vector<2x128xf32>
      %28 = tpu.matmul %26, %27, %cst_22 {dimension_numbers = #tpu.dot_dimension_numbers<[1], [0], [0], [1], [0, 0, 1, 1], [], []>} : vector<2x512xbf16>, vector<512x128xbf16>, vector<2x128xf32> -> vector<2x128xf32>
      %c0_23 = arith.constant 0 : index
      %c0_24 = arith.constant 0 : index
      %29 = vector.load %arg7[%c0_23, %c0_24] : memref<1x128xf32, #tpu.memory_space<vmem>>, vector<1x128xf32>
      %30 = vector.broadcast %29 : vector<1x128xf32> to vector<2x128xf32>
      %31 = arith.addf %28, %30 : vector<2x128xf32>
      %c0_25 = arith.constant 0 : index
      %c0_26 = arith.constant 0 : index
      %32 = vector.load %arg8[%c0_25, %c0_26] : memref<2x128xf32, #tpu.memory_space<vmem>>, vector<2x128xf32>
      tpu.vector_store %arg8[%c0_25, %c0_26], %31 {strides = array<i32>} : memref<2x128xf32, #tpu.memory_space<vmem>>, vector<2x128xf32>,
    } else {
    }
    return
  }
  func.func @transform_0(%arg0: i32) -> (i32, i32) {
    %c0_i32 = arith.constant 0 : i32
    %c0_i32_0 = arith.constant 0 : i32
    return %c0_i32, %arg0 : i32, i32
  }
  func.func @transform_1(%arg0: i32) -> (i32, i32) {
    %c0_i32 = arith.constant 0 : i32
    %c0_i32_0 = arith.constant 0 : i32
    return %arg0, %c0_i32 : i32, i32
  }
  func.func @transform_2(%arg0: i32) -> (i32, i32) {
    %c0_i32 = arith.constant 0 : i32
    %c0_i32_0 = arith.constant 0 : i32
    %c0_i32_1 = arith.constant 0 : i32
    return %c0_i32, %c0_i32_0 : i32, i32
  }
  func.func @transform_3(%arg0: i32) -> (i32, i32) {
    %c0_i32 = arith.constant 0 : i32
    %c0_i32_0 = arith.constant 0 : i32
    %c0_i32_1 = arith.constant 0 : i32
    return %c0_i32, %c0_i32_0 : i32, i32
  }
  func.func @transform_4(%arg0: i32) -> (i32, i32) {
    %c0_i32 = arith.constant 0 : i32
    %c0_i32_0 = arith.constant 0 : i32
    %c0_i32_1 = arith.constant 0 : i32
    return %c0_i32, %c0_i32_0 : i32, i32
  }
  func.func @transform_5(%arg0: i32) -> (i32, i32) {
    %c0_i32 = arith.constant 0 : i32
    %c0_i32_0 = arith.constant 0 : i32
    %c0_i32_1 = arith.constant 0 : i32
    return %c0_i32, %c0_i32_0 : i32, i32
  }
  func.func @transform_6(%arg0: i32) -> (i32, i32) {
    %c0_i32 = arith.constant 0 : i32
    %c0_i32_0 = arith.constant 0 : i32
    %c0_i32_1 = arith.constant 0 : i32
    return %c0_i32, %c0_i32_0 : i32, i32
  }
  func.func @transform_7(%arg0: i32) -> (i32, i32) {
    %c0_i32 = arith.constant 0 : i32
    %c0_i32_0 = arith.constant 0 : i32
    %c0_i32_1 = arith.constant 0 : i32
    return %c0_i32, %c0_i32_0 : i32, i32
  }
}

</mosaic_0001>

<bundles_post_ra>
// kernel: video_target_recognition_forward.2
= control target key start
LH: loop header
LB: loop body
LE: loop exit
PB: predicated region body
PF: predicated region fallthrough
CT: control target
= control target key end

     0   :  { %8 = vsyncpa [#allocation3], 0  ;;  %s1976_s0 = inlined_call_operand.vmem [shape: f32[2,256,8], index: 0, kind: input, shape index: {}]   ;;  %s1977_s1 = inlined_call_operand.hbm [shape: bf16[8,2048], index: 1, kind: input, shape index: {}]   ;;  %s1978_s2 = inlined_call_operand.hbm [shape: f32[1,2048], index: 2, kind: input, shape index: {}]   ;;  %s1979_s3 = inlined_call_operand.vmem [shape: f32[2,1,2048], index: 3, kind: output, shape index: {}]  }
   0x1   :  { %10 = vsyncpa [#allocation3 + $0x1], 0 }
   0x2   :  { %11 = vsyncpa [#allocation5], 0 }
   0x3   :  { %13 = vsyncpa [#allocation5 + $0x1], 0  ;;  %s1542_s12 = smov 0   ;;  %s1544_s13 = smov 0  }
   0x4   :  { %s1546_s14 = smov 0   ;;  %s1548_s15 = smov 0  }
   0x5   :  { %s1550_s16 = smov 0   ;;  %s1552_s17 = smov 0  }
   0x6   :  { %s1554_s18 = smov 0   ;;  %s1556_s19 = smov 0  }
   0x7 LB: > { %s1228_s20 = sadd.s32 4294967295, %s1519_s19   ;;  %s34_s21 = sadd.s32 1, %s1511_s17  ;;  %s1519_s19 = sphi %s1556_s19, %s19_s19   ;;  %s1515_s18 = sphi %s1554_s18, %s1992_s18   ;;  %s1511_s17 = sphi %s1552_s17, %s1991_s17   ;;  %s1507_s16 = sphi %s1550_s16, %s1990_s16   ;;  %s1503_s15 = sphi %s1548_s15, %s1989_s15   ;;  %s1499_s14 = sphi %s1546_s14, %s1988_s14   ;;  %s1495_s13 = sphi %s1544_s13, %s1987_s13   ;;  %s1491_s12 = sphi %s1542_s12, %s1986_s12  }
   0x8   : > { %p36_p0 = scmp.ge.s32.totalorder %s34_s21, 4  ;;  %s38_s22 = sadd.s32 1, %s1515_s18 }
   0x9   : > { %s73_s23 = sadd.s32 1, %s1499_s14  ;;  %p80_p1 = scmp.ne.s32.totalorder %s1499_s14, %s1495_s13 }
   0xa   : > { %s1994_s21 = smov (%p36_p0, %s34_s21), 0  ;;  %s1996_s22 = smov (!%p36_p0, %s38_s22), %s1515_s18 }
   0xb   : > { %s70_s24 = ssub.s32 %s1511_s17, %s1994_s21  ;;  %p81_p2 = scmp.eq.s32.totalorder %s1519_s19, 0 }
   0xc   : > { %p40_p3 = scmp.ge.s32.totalorder %s1996_s22, 2  ;;  %p71_p4 = scmp.eq.s32.totalorder %s70_s24, 0 }
   0xd   : > { %p1592_p5 = por %p81_p2, %p80_p1  ;;  %p86_p6 = scmp.ne.s32.totalorder %s1495_s13, %s1491_s12 }
   0xe   : > { %s1998_s22 = smov (%p40_p3, %s1996_s22), 0  ;;  %p87_p7 = scmp.eq.s32.totalorder %s1228_s20, 0 }
   0xf   : > { %s1600_s26 = scalar_select %p71_p4, %s1499_s14, %s73_s23  }
  0x10   : > { %p1323_p8 = scmp.lt.s32.totalorder %s1519_s19, 8  ;;  %s177_s27 = sand.u32 1, %s1499_s14  }
  0x11   : > { %p1604_p9 = por %p87_p7, %p86_p6  ;;  %s1232_s29 = sshll.u32 %s177_s27, 4 }
  0x12   : > { %s1310_s30 = sshll.u32 %s1511_s17, 4  ;;  %s181_s8 = scalar_lea.vmem [#allocation2], %s1232_s29 }
  0x13   : > { %s186_s6 = scalar_lea.hbm %s1977_s1, %s1310_s30  ;;  %s190_s9 = sshll.u32 %s181_s8, 4  ;;  %s191_s9 = int_to_ptr.vmem [resolvable:$true] %s190_s9 }
  0x14   : > { %s188_s7 = sshll.u32 %s186_s6, 4  ;;  %p1614_p10 = pnand %p1323_p8, %p1592_p5  ;;  %s189_s7 = int_to_ptr.hbm [resolvable:$true] %s188_s7 }
  0x15   : > { %p1237_p11 = scmp.ge.s32.totalorder %s1519_s19, 1  ;;  %p214_p12 = scmp.lt.s32.totalorder %s1519_s19, 9 }
  0x16   : > { %s1235_s11 = sshll.u32 %s177_s27, 2  ;;  %s178_s12 = scalar_lea.sflag [#allocation3], %s177_s27 }
  0x17   : > { %1319 = dma.hbm_to_vmem [thread:$0]  (!%p1614_p10), %s189_s7, 256, %s191_s9, %s178_s12  }
  0x18   : > { %p215_p13 = pnand %p1237_p11, %p214_p12  ;;  %s1236_s20 = sshll.u32 %s1511_s17, 2 }
  0x19   : > { %s201_s23 = scalar_lea.vmem [#allocation4], %s1235_s11  ;;  %s205_s25 = scalar_lea.hbm %s1978_s2, %s1236_s20 }
  0x1a   : > { %s209_s24 = sshll.u32 %s201_s23, 4  ;;  %s207_s4 = sshll.u32 %s205_s25, 4  ;;  %s210_s24 = int_to_ptr.vmem [resolvable:$true] %s209_s24  ;;  %s208_s4 = int_to_ptr.hbm [resolvable:$true] %s207_s4 }
  0x1b   : > { %s198_s5 = scalar_lea.sflag [#allocation5], %s177_s27  ;;  %218 = sbr.rel (%p215_p13) target bundleno = 453 (0x1c5), region = 32 }
  0x1c   : > { %1322 = dma.hbm_to_vmem [thread:$0]  (!%p1614_p10), %s208_s4, 64, %s210_s24, %s198_s5  }
  0x1d   : > { %s220_s6 = sand.u32 (!%p215_p13), 1, %s1495_s13  }
  0x1e   : > { %s1238_s8 = sshll.u32 (!%p215_p13), %s220_s6, 4  ;;  %s221_s7 = scalar_lea.sflag (!%p215_p13), [#allocation3], %s220_s6 }
  0x1f   : > { %s224_s9 = scalar_lea.vmem (!%p215_p13), [#allocation2], %s1238_s8 }
  0x20   : > { %1482 = dma.done.wait (%p1604_p9), %s221_s7, 256  }
  0x21   : > { %1484 = vsyncadd (%p1604_p9), %s221_s7, 4294967040  ;;  %s1239_s11 = sshll.u32 %s220_s6, 2  ;;  %s231_s12 = scalar_lea.sflag [#allocation5], %s220_s6 }
  0x22   : > { %s1633_s20 = scalar_lea.vmem [#allocation4], %s1239_s11 }
  0x23   : > { %1486 = dma.done.wait (%p1604_p9), %s231_s12, 64  }
  0x24   : > { %1488 = vsyncadd (%p1604_p9), %s231_s12, 4294967232  ;;  %p276_p0 = scmp.lt.s32.totalorder %s1507_s16, 1  ;;  %v354_v0 = vld [vmem:[%s224_s9] sm:$0xff]  ;;  %v355_v1 = vld [vmem:[%s224_s9 + $0x8] sm:$0xff]  ;;  %vm425_vm0 = vcmask 1043456   ;;  %vm376_vm1 = vcmask 64512  }
  0x25   : > { %v368_v2 = vunpack.c.l.b16 %v354_v0  ;;  %v369_v3 = vunpack.c.h.b16 %v354_v0  ;;  %v370_v4 = vunpack.c.l.b16 %v355_v1  ;;  %v371_v5 = vunpack.c.h.b16 %v355_v1  ;;  %v356_v41 = vld [vmem:[%s1633_s20] sm:$0xf]  ;;  %s1242_s28 = sshll.u32 %s1503_s15, 2 }
  0x26   : > { %s2000_s16 = smov (!%p276_p0, %s1507_s16), 1  ;;  %v1700_v44 = vperm.slane %v356_v41, 0  ;;  %v1702_v45 = vperm.slane %v356_v41, 1  ;;  %v1712_v55 = vperm.slane %v356_v41, 2  ;;  %v1714_v56 = vperm.slane %v356_v41, 3  ;;  %p1876_p1 = scmp.lt.s32.totalorder %s1242_s28, 15 }
  0x27   : > { %s1311_s27 = sshll.u32 %s2000_s16, 8  ;;  %v372_v8 = vpack.c.b16 %v368_v2, %v368_v2  ;;  %v373_v9 = vpack.c.b16 %v369_v3, %v369_v3  ;;  %v374_v10 = vpack.c.b16 %v370_v4, %v370_v4  ;;  %v375_v11 = vpack.c.b16 %v371_v5, %v371_v5  ;;  %s1243_s30 = sshll.u32 %s2000_s16, 4 }
  0x28   : > { %s1647_s24 = scalar_lea.vmem %s1976_s0, %s1311_s27  ;;  %s2002_s28 = smov (!%p1876_p1, %s1242_s28), 15  ;;  %vm1082_vm3 = vcmask 1040384   ;;  %vm1084_vm4 = vcmask 1042434   ;;  %vm1086_vm5 = vcmask 1041408  }
  0x29   : > { %v306_v6 = vld [vmem:[%s1647_s24] sm:$0xff]  ;;  %v307_v7 = vld [vmem:[%s1647_s24 + $0x8] sm:$0xff]  ;;  %v427_v13 = vsel %vm425_vm0, %v372_v8, 0  ;;  %v430_v14 = vsel %vm425_vm0, %v373_v9, 0  ;;  %v433_v15 = vsel %vm425_vm0, %v374_v10, 0  ;;  %v436_v16 = vsel %vm425_vm0, %v375_v11, 0  ;;  %s293_s15 = sadd.s32 %s1243_s30, %s2002_s28 }
  0x2a   : > { %v338_v12 = vpack.c.bf16 %v307_v7, %v306_v6  ;;  %445 = vmatpush.bf16.msra.mxu0 %v427_v13  ;;  %534 = vmatpush.bf16.msra.mxu1 %v430_v14  ;;  %v308_v17 = vld [vmem:[%s1647_s24 + $0x10] sm:$0xff]  ;;  %v309_v18 = vld [vmem:[%s1647_s24 + $0x18] sm:$0xff]  ;;  %v310_v20 = vld [vmem:[%s1647_s24 + $0x20] sm:$0xff]  ;;  %s1911_s4 = scalar_lea.vmem %s1979_s3, %s293_s15 }
  0x2b   : > { %623 = vmatpush.bf16.msra.mxu2 %v433_v15  ;;  %712 = vmatpush.bf16.msra.mxu3 %v436_v16  ;;  %v339_v19 = vpack.c.bf16 %v309_v18, %v308_v17  ;;  %v311_v21 = vld [vmem:[%s1647_s24 + $0x28] sm:$0xff]  ;;  %v312_v23 = vld [vmem:[%s1647_s24 + $0x30] sm:$0xff]  ;;  %v313_v24 = vld [vmem:[%s1647_s24 + $0x38] sm:$0xff] }
  0x2c   : > { %v340_v22 = vpack.c.bf16 %v311_v21, %v310_v20  ;;  %v341_v25 = vpack.c.bf16 %v313_v24, %v312_v23  ;;  %v314_v26 = vld [vmem:[%s1647_s24 + $0x40] sm:$0xff]  ;;  %v315_v27 = vld [vmem:[%s1647_s24 + $0x48] sm:$0xff]  ;;  %v316_v29 = vld [vmem:[%s1647_s24 + $0x50] sm:$0xff] }
  0x2d   : > { %1244 = vmatmul.msk.bf16.vlgmr.msra.gmra.mxu0 %vm376_vm1, %v338_v12  ;;  %1260 = vmatmul.msk.bf16.vlgmr.msra.gmra.mxu1 %vm376_vm1, %v338_v12  ;;  %v342_v28 = vpack.c.bf16 %v315_v27, %v314_v26  ;;  %v317_v30 = vld [vmem:[%s1647_s24 + $0x58] sm:$0xff]  ;;  %v318_v32 = vld [vmem:[%s1647_s24 + $0x60] sm:$0xff]  ;;  %v319_v33 = vld [vmem:[%s1647_s24 + $0x68] sm:$0xff] }
  0x2e   : > { %1276 = vmatmul.msk.bf16.vlgmr.msra.gmra.mxu2 %vm376_vm1, %v338_v12  ;;  %1292 = vmatmul.msk.bf16.vlgmr.msra.gmra.mxu3 %vm376_vm1, %v338_v12  ;;  %v343_v31 = vpack.c.bf16 %v317_v30, %v316_v29  ;;  %v344_v34 = vpack.c.bf16 %v319_v33, %v318_v32  ;;  %v320_v35 = vld [vmem:[%s1647_s24 + $0x70] sm:$0xff]  ;;  %v321_v36 = vld [vmem:[%s1647_s24 + $0x78] sm:$0xff]  ;;  %v322_v38 = vld [vmem:[%s1647_s24 + $0x80] sm:$0xff] }
  0x2f   : > { %v345_v37 = vpack.c.bf16 %v321_v36, %v320_v35  ;;  %v323_v39 = vld [vmem:[%s1647_s24 + $0x88] sm:$0xff]  ;;  %v324_v60 = vld [vmem:[%s1647_s24 + $0x90] sm:$0xff]  ;;  %v325_v61 = vld [vmem:[%s1647_s24 + $0x98] sm:$0xff] }
  0x30   : > { %v346_v40 = vpack.c.bf16 %v323_v39, %v322_v38  ;;  %v347_v4 = vpack.c.bf16 %v325_v61, %v324_v60  ;;  %v326_v35 = vld [vmem:[%s1647_s24 + $0xa0] sm:$0xff]  ;;  %v327_v36 = vld [vmem:[%s1647_s24 + $0xa8] sm:$0xff] }
  0x31   : > { %v348_v41 = vpack.c.bf16 %v327_v36, %v326_v35 }
  0x3d   : > { %1245 = vmatmul.msk.bf16.gmra.mxu0 %vm376_vm1, %v339_v19  ;;  %1261 = vmatmul.msk.bf16.gmra.mxu1 %vm376_vm1, %v339_v19 }
  0x3e   : > { %1277 = vmatmul.msk.bf16.gmra.mxu2 %vm376_vm1, %v339_v19  ;;  %1293 = vmatmul.msk.bf16.gmra.mxu3 %vm376_vm1, %v339_v19 }
  0x4d   : > { %1246 = vmatmul.msk.bf16.gmra.mxu0 %vm376_vm1, %v340_v22  ;;  %1262 = vmatmul.msk.bf16.gmra.mxu1 %vm376_vm1, %v340_v22 }
  0x4e   : > { %1278 = vmatmul.msk.bf16.gmra.mxu2 %vm376_vm1, %v340_v22  ;;  %1294 = vmatmul.msk.bf16.gmra.mxu3 %vm376_vm1, %v340_v22 }
  0x5d   : > { %1247 = vmatmul.msk.bf16.gmra.mxu0 %vm376_vm1, %v341_v25  ;;  %1263 = vmatmul.msk.bf16.gmra.mxu1 %vm376_vm1, %v341_v25 }
  0x5e   : > { %1279 = vmatmul.msk.bf16.gmra.mxu2 %vm376_vm1, %v341_v25  ;;  %1295 = vmatmul.msk.bf16.gmra.mxu3 %vm376_vm1, %v341_v25 }
  0x6d   : > { %1248 = vmatmul.msk.bf16.gmra.mxu0 %vm376_vm1, %v342_v28  ;;  %1264 = vmatmul.msk.bf16.gmra.mxu1 %vm376_vm1, %v342_v28 }
  0x6e   : > { %1280 = vmatmul.msk.bf16.gmra.mxu2 %vm376_vm1, %v342_v28  ;;  %1296 = vmatmul.msk.bf16.gmra.mxu3 %vm376_vm1, %v342_v28 }
  0x7d   : > { %1249 = vmatmul.msk.bf16.gmra.mxu0 %vm376_vm1, %v343_v31  ;;  %1265 = vmatmul.msk.bf16.gmra.mxu1 %vm376_vm1, %v343_v31 }
  0x7e   : > { %1281 = vmatmul.msk.bf16.gmra.mxu2 %vm376_vm1, %v343_v31  ;;  %1297 = vmatmul.msk.bf16.gmra.mxu3 %vm376_vm1, %v343_v31 }
  0x8d   : > { %1250 = vmatmul.msk.bf16.gmra.mxu0 %vm376_vm1, %v344_v34  ;;  %1266 = vmatmul.msk.bf16.gmra.mxu1 %vm376_vm1, %v344_v34 }
  0x8e   : > { %1282 = vmatmul.msk.bf16.gmra.mxu2 %vm376_vm1, %v344_v34  ;;  %1298 = vmatmul.msk.bf16.gmra.mxu3 %vm376_vm1, %v344_v34 }
  0x9d   : > { %1251 = vmatmul.msk.bf16.gmra.mxu0 %vm376_vm1, %v345_v37  ;;  %1267 = vmatmul.msk.bf16.gmra.mxu1 %vm376_vm1, %v345_v37 }
  0x9e   : > { %1283 = vmatmul.msk.bf16.gmra.mxu2 %vm376_vm1, %v345_v37  ;;  %1299 = vmatmul.msk.bf16.gmra.mxu3 %vm376_vm1, %v345_v37 }
  0xaa   : > { %v447_v42 = vpop.f32.mrf.mxu0  ;;  %v536_v43 = vpop.f32.mrf.mxu1 }
  0xab   : > { %v448_v46 = vadd.f32 %v447_v42, %v1700_v44  ;;  %v537_v47 = vadd.f32 %v536_v43, %v1702_v45 }
  0xad   : > { %1252 = vmatmul.msk.bf16.gmra.mxu0 %vm376_vm1, %v346_v40  ;;  %1268 = vmatmul.msk.bf16.gmra.mxu1 %vm376_vm1, %v346_v40  ;;  %v794_v52 = vmax.f32 %v448_v46, 0.0  ;;  %v795_v57 = vmax.f32 %v537_v47, 0.0 }
  0xae   : > { %1284 = vmatmul.msk.bf16.gmra.mxu2 %vm376_vm1, %v346_v40  ;;  %1300 = vmatmul.msk.bf16.gmra.mxu3 %vm376_vm1, %v346_v40 }
  0xb1   : > { %v625_v48 = vpop.f32.mrf.mxu2  ;;  %v714_v49 = vpop.f32.mrf.mxu3 }
  0xb2   : > { %v449_v50 = vpop.f32.mrf.mxu0  ;;  %v538_v51 = vpop.f32.mrf.mxu1  ;;  %v626_v0 = vadd.f32 %v625_v48, %v1712_v55  ;;  %v715_v1 = vadd.f32 %v714_v49, %v1714_v56 }
  0xb3   : > { %v450_v53 = vadd.f32 %v449_v50, %v1700_v44  ;;  %v539_v54 = vadd.f32 %v538_v51, %v1702_v45 }
  0xb4   : > { %v796_v11 = vmax.f32 %v626_v0, 0.0  ;;  %v797_v12 = vmax.f32 %v715_v1, 0.0 }
  0xb5   : > { %v798_v58 = vmax.f32 %v450_v53, 0.0  ;;  %v799_v59 = vmax.f32 %v539_v54, 0.0 }
  0xb7   : > { %v922_v62 = vadd.f32 %v798_v58, %v794_v52  ;;  %v959_v63 = vadd.f32 %v799_v59, %v795_v57 }
  0xb9   : > { %v627_v2 = vpop.f32.mrf.mxu2  ;;  %v716_v3 = vpop.f32.mrf.mxu3 }
  0xba   : > { %v628_v5 = vadd.f32 %v627_v2, %v1712_v55  ;;  %v717_v6 = vadd.f32 %v716_v3, %v1714_v56  ;;  %v452_v7 = vpop.f32.mrf.mxu0  ;;  %v541_v8 = vpop.f32.mrf.mxu1 }
  0xbb   : > { %v453_v9 = vadd.f32 %v452_v7, %v1700_v44  ;;  %v542_v10 = vadd.f32 %v541_v8, %v1702_v45 }
  0xbc   : > { %v800_v13 = vmax.f32 %v628_v5, 0.0  ;;  %v801_v14 = vmax.f32 %v717_v6, 0.0 }
  0xbd   : > { %v802_v15 = vmax.f32 %v453_v9, 0.0  ;;  %v803_v16 = vmax.f32 %v542_v10, 0.0  ;;  %1253 = vmatmul.msk.bf16.gmra.mxu0 %vm376_vm1, %v347_v4  ;;  %1269 = vmatmul.msk.bf16.gmra.mxu1 %vm376_vm1, %v347_v4  ;;  %v328_v10 = vld [vmem:[%s1647_s24 + $0xb0] sm:$0xff] }
  0xbe   : > { %v996_v17 = vadd.f32 %v800_v13, %v796_v11  ;;  %v1033_v18 = vadd.f32 %v801_v14, %v797_v12  ;;  %1285 = vmatmul.msk.bf16.gmra.mxu2 %vm376_vm1, %v347_v4  ;;  %1301 = vmatmul.msk.bf16.gmra.mxu3 %vm376_vm1, %v347_v4  ;;  %v329_v11 = vld [vmem:[%s1647_s24 + $0xb8] sm:$0xff] }
  0xbf   : > { %v923_v19 = vadd.f32 %v922_v62, %v802_v15  ;;  %v960_v20 = vadd.f32 %v959_v63, %v803_v16  ;;  %v349_v16 = vpack.c.bf16 %v329_v11, %v328_v10 }
  0xc1   : > { %v630_v21 = vpop.f32.mrf.mxu2  ;;  %v719_v22 = vpop.f32.mrf.mxu3 }
  0xc2   : > { %v631_v23 = vadd.f32 %v630_v21, %v1712_v55  ;;  %v720_v24 = vadd.f32 %v719_v22, %v1714_v56  ;;  %v454_v25 = vpop.f32.mrf.mxu0  ;;  %v543_v26 = vpop.f32.mrf.mxu1 }
  0xc3   : > { %v455_v27 = vadd.f32 %v454_v25, %v1700_v44  ;;  %v544_v28 = vadd.f32 %v543_v26, %v1702_v45 }
  0xc4   : > { %v804_v29 = vmax.f32 %v631_v23, 0.0  ;;  %v805_v30 = vmax.f32 %v720_v24, 0.0 }
  0xc5   : > { %v806_v31 = vmax.f32 %v455_v27, 0.0  ;;  %v807_v32 = vmax.f32 %v544_v28, 0.0 }
  0xc6   : > { %v997_v33 = vadd.f32 %v996_v17, %v804_v29  ;;  %v1034_v34 = vadd.f32 %v1033_v18, %v805_v30 }
  0xc7   : > { %v924_v37 = vadd.f32 %v923_v19, %v806_v31  ;;  %v961_v38 = vadd.f32 %v960_v20, %v807_v32 }
  0xc9   : > { %v632_v39 = vpop.f32.mrf.mxu2  ;;  %v721_v40 = vpop.f32.mrf.mxu3 }
  0xca   : > { %v633_v42 = vadd.f32 %v632_v39, %v1712_v55  ;;  %v722_v43 = vadd.f32 %v721_v40, %v1714_v56  ;;  %v457_v46 = vpop.f32.mrf.mxu0  ;;  %v546_v47 = vpop.f32.mrf.mxu1 }
  0xcb   : > { %v458_v48 = vadd.f32 %v457_v46, %v1700_v44  ;;  %v547_v49 = vadd.f32 %v546_v47, %v1702_v45  ;;  %v330_v47 = vld [vmem:[%s1647_s24 + $0xc0] sm:$0xff] }
  0xcc   : > { %v808_v50 = vmax.f32 %v633_v42, 0.0  ;;  %v809_v51 = vmax.f32 %v722_v43, 0.0 }
  0xcd   : > { %v810_v52 = vmax.f32 %v458_v48, 0.0  ;;  %v811_v53 = vmax.f32 %v547_v49, 0.0  ;;  %1254 = vmatmul.msk.bf16.gmra.mxu0 %vm376_vm1, %v348_v41  ;;  %1270 = vmatmul.msk.bf16.gmra.mxu1 %vm376_vm1, %v348_v41  ;;  %v331_v48 = vld [vmem:[%s1647_s24 + $0xc8] sm:$0xff] }
  0xce   : > { %v998_v54 = vadd.f32 %v997_v33, %v808_v50  ;;  %v1035_v57 = vadd.f32 %v1034_v34, %v809_v51  ;;  %1286 = vmatmul.msk.bf16.gmra.mxu2 %vm376_vm1, %v348_v41  ;;  %1302 = vmatmul.msk.bf16.gmra.mxu3 %vm376_vm1, %v348_v41 }
  0xcf   : > { %v925_v58 = vadd.f32 %v924_v37, %v810_v52  ;;  %v962_v59 = vadd.f32 %v961_v38, %v811_v53  ;;  %v350_v53 = vpack.c.bf16 %v331_v48, %v330_v47 }
  0xd1   : > { %v635_v60 = vpop.f32.mrf.mxu2  ;;  %v724_v61 = vpop.f32.mrf.mxu3 }
  0xd2   : > { %v636_v62 = vadd.f32 %v635_v60, %v1712_v55  ;;  %v725_v63 = vadd.f32 %v724_v61, %v1714_v56  ;;  %v459_v0 = vpop.f32.mrf.mxu0  ;;  %v548_v1 = vpop.f32.mrf.mxu1 }
  0xd3   : > { %v460_v2 = vadd.f32 %v459_v0, %v1700_v44  ;;  %v549_v3 = vadd.f32 %v548_v1, %v1702_v45 }
  0xd4   : > { %v812_v4 = vmax.f32 %v636_v62, 0.0  ;;  %v813_v5 = vmax.f32 %v725_v63, 0.0 }
  0xd5   : > { %v814_v6 = vmax.f32 %v460_v2, 0.0  ;;  %v815_v7 = vmax.f32 %v549_v3, 0.0 }
  0xd6   : > { %v999_v8 = vadd.f32 %v998_v54, %v812_v4  ;;  %v1036_v9 = vadd.f32 %v1035_v57, %v813_v5 }
  0xd7   : > { %v926_v12 = vadd.f32 %v925_v58, %v814_v6  ;;  %v963_v13 = vadd.f32 %v962_v59, %v815_v7 }
  0xd9   : > { %v637_v14 = vpop.f32.mrf.mxu2  ;;  %v726_v15 = vpop.f32.mrf.mxu3 }
  0xda   : > { %v638_v17 = vadd.f32 %v637_v14, %v1712_v55  ;;  %v727_v18 = vadd.f32 %v726_v15, %v1714_v56  ;;  %v462_v19 = vpop.f32.mrf.mxu0  ;;  %v551_v20 = vpop.f32.mrf.mxu1 }
  0xdb   : > { %v463_v21 = vadd.f32 %v462_v19, %v1700_v44  ;;  %v552_v22 = vadd.f32 %v551_v20, %v1702_v45  ;;  %v332_v20 = vld [vmem:[%s1647_s24 + $0xd0] sm:$0xff] }
  0xdc   : > { %v816_v23 = vmax.f32 %v638_v17, 0.0  ;;  %v817_v24 = vmax.f32 %v727_v18, 0.0 }
  0xdd   : > { %v818_v25 = vmax.f32 %v463_v21, 0.0  ;;  %v819_v26 = vmax.f32 %v552_v22, 0.0  ;;  %1255 = vmatmul.msk.bf16.gmra.mxu0 %vm376_vm1, %v349_v16  ;;  %1271 = vmatmul.msk.bf16.gmra.mxu1 %vm376_vm1, %v349_v16  ;;  %v333_v21 = vld [vmem:[%s1647_s24 + $0xd8] sm:$0xff] }
  0xde   : > { %v1000_v27 = vadd.f32 %v999_v8, %v816_v23  ;;  %v1037_v28 = vadd.f32 %v1036_v9, %v817_v24  ;;  %1287 = vmatmul.msk.bf16.gmra.mxu2 %vm376_vm1, %v349_v16  ;;  %1303 = vmatmul.msk.bf16.gmra.mxu3 %vm376_vm1, %v349_v16 }
  0xdf   : > { %v927_v29 = vadd.f32 %v926_v12, %v818_v25  ;;  %v964_v30 = vadd.f32 %v963_v13, %v819_v26  ;;  %v351_v26 = vpack.c.bf16 %v333_v21, %v332_v20 }
  0xe1   : > { %v640_v31 = vpop.f32.mrf.mxu2  ;;  %v729_v32 = vpop.f32.mrf.mxu3 }
  0xe2   : > { %v641_v33 = vadd.f32 %v640_v31, %v1712_v55  ;;  %v730_v34 = vadd.f32 %v729_v32, %v1714_v56  ;;  %v464_v35 = vpop.f32.mrf.mxu0  ;;  %v553_v36 = vpop.f32.mrf.mxu1 }
  0xe3   : > { %v465_v37 = vadd.f32 %v464_v35, %v1700_v44  ;;  %v554_v38 = vadd.f32 %v553_v36, %v1702_v45 }
  0xe4   : > { %v820_v39 = vmax.f32 %v641_v33, 0.0  ;;  %v821_v40 = vmax.f32 %v730_v34, 0.0 }
  0xe5   : > { %v822_v41 = vmax.f32 %v465_v37, 0.0  ;;  %v823_v42 = vmax.f32 %v554_v38, 0.0 }
  0xe6   : > { %v1001_v43 = vadd.f32 %v1000_v27, %v820_v39  ;;  %v1038_v46 = vadd.f32 %v1037_v28, %v821_v40 }
  0xe7   : > { %v928_v49 = vadd.f32 %v927_v29, %v822_v41  ;;  %v965_v50 = vadd.f32 %v964_v30, %v823_v42 }
  0xe9   : > { %v642_v51 = vpop.f32.mrf.mxu2  ;;  %v731_v52 = vpop.f32.mrf.mxu3 }
  0xea   : > { %v643_v54 = vadd.f32 %v642_v51, %v1712_v55  ;;  %v732_v57 = vadd.f32 %v731_v52, %v1714_v56  ;;  %v467_v58 = vpop.f32.mrf.mxu0  ;;  %v556_v59 = vpop.f32.mrf.mxu1 }
  0xeb   : > { %v468_v60 = vadd.f32 %v467_v58, %v1700_v44  ;;  %v557_v61 = vadd.f32 %v556_v59, %v1702_v45  ;;  %v334_v59 = vld [vmem:[%s1647_s24 + $0xe0] sm:$0xff] }
  0xec   : > { %v824_v62 = vmax.f32 %v643_v54, 0.0  ;;  %v825_v63 = vmax.f32 %v732_v57, 0.0 }
  0xed   : > { %v826_v0 = vmax.f32 %v468_v60, 0.0  ;;  %v827_v1 = vmax.f32 %v557_v61, 0.0  ;;  %1256 = vmatmul.msk.bf16.gmra.mxu0 %vm376_vm1, %v350_v53  ;;  %1272 = vmatmul.msk.bf16.gmra.mxu1 %vm376_vm1, %v350_v53  ;;  %v335_v60 = vld [vmem:[%s1647_s24 + $0xe8] sm:$0xff] }
  0xee   : > { %v1002_v2 = vadd.f32 %v1001_v43, %v824_v62  ;;  %v1039_v3 = vadd.f32 %v1038_v46, %v825_v63  ;;  %1288 = vmatmul.msk.bf16.gmra.mxu2 %vm376_vm1, %v350_v53  ;;  %1304 = vmatmul.msk.bf16.gmra.mxu3 %vm376_vm1, %v350_v53 }
  0xef   : > { %v929_v4 = vadd.f32 %v928_v49, %v826_v0  ;;  %v966_v5 = vadd.f32 %v965_v50, %v827_v1  ;;  %v352_v1 = vpack.c.bf16 %v335_v60, %v334_v59 }
  0xf1   : > { %v645_v6 = vpop.f32.mrf.mxu2  ;;  %v734_v7 = vpop.f32.mrf.mxu3 }
  0xf2   : > { %v646_v8 = vadd.f32 %v645_v6, %v1712_v55  ;;  %v735_v9 = vadd.f32 %v734_v7, %v1714_v56  ;;  %v469_v10 = vpop.f32.mrf.mxu0  ;;  %v558_v11 = vpop.f32.mrf.mxu1 }
  0xf3   : > { %v470_v12 = vadd.f32 %v469_v10, %v1700_v44  ;;  %v559_v13 = vadd.f32 %v558_v11, %v1702_v45 }
  0xf4   : > { %v828_v14 = vmax.f32 %v646_v8, 0.0  ;;  %v829_v15 = vmax.f32 %v735_v9, 0.0 }
  0xf5   : > { %v830_v16 = vmax.f32 %v470_v12, 0.0  ;;  %v831_v17 = vmax.f32 %v559_v13, 0.0 }
  0xf6   : > { %v1003_v18 = vadd.f32 %v1002_v2, %v828_v14  ;;  %v1040_v19 = vadd.f32 %v1039_v3, %v829_v15 }
  0xf7   : > { %v930_v22 = vadd.f32 %v929_v4, %v830_v16  ;;  %v967_v23 = vadd.f32 %v966_v5, %v831_v17 }
  0xf9   : > { %v647_v24 = vpop.f32.mrf.mxu2  ;;  %v736_v25 = vpop.f32.mrf.mxu3 }
  0xfa   : > { %v648_v27 = vadd.f32 %v647_v24, %v1712_v55  ;;  %v737_v28 = vadd.f32 %v736_v25, %v1714_v56  ;;  %v472_v29 = vpop.f32.mrf.mxu0  ;;  %v561_v30 = vpop.f32.mrf.mxu1 }
  0xfb   : > { %v473_v31 = vadd.f32 %v472_v29, %v1700_v44  ;;  %v562_v32 = vadd.f32 %v561_v30, %v1702_v45  ;;  %v336_v30 = vld [vmem:[%s1647_s24 + $0xf0] sm:$0xff] }
  0xfc   : > { %v832_v33 = vmax.f32 %v648_v27, 0.0  ;;  %v833_v34 = vmax.f32 %v737_v28, 0.0 }
  0xfd   : > { %v834_v35 = vmax.f32 %v473_v31, 0.0  ;;  %v835_v36 = vmax.f32 %v562_v32, 0.0  ;;  %1257 = vmatmul.msk.bf16.gmra.mxu0 %vm376_vm1, %v351_v26  ;;  %1273 = vmatmul.msk.bf16.gmra.mxu1 %vm376_vm1, %v351_v26  ;;  %v337_v31 = vld [vmem:[%s1647_s24 + $0xf8] sm:$0xff] }
  0xfe   : > { %v1004_v37 = vadd.f32 %v1003_v18, %v832_v33  ;;  %v1041_v38 = vadd.f32 %v1040_v19, %v833_v34  ;;  %1289 = vmatmul.msk.bf16.gmra.mxu2 %vm376_vm1, %v351_v26  ;;  %1305 = vmatmul.msk.bf16.gmra.mxu3 %vm376_vm1, %v351_v26 }
  0xff   : > { %v931_v39 = vadd.f32 %v930_v22, %v834_v35  ;;  %v968_v40 = vadd.f32 %v967_v23, %v835_v36  ;;  %v353_v36 = vpack.c.bf16 %v337_v31, %v336_v30 }
 0x101   : > { %v650_v41 = vpop.f32.mrf.mxu2  ;;  %v739_v42 = vpop.f32.mrf.mxu3 }
 0x102   : > { %v651_v43 = vadd.f32 %v650_v41, %v1712_v55  ;;  %v740_v46 = vadd.f32 %v739_v42, %v1714_v56  ;;  %v474_v47 = vpop.f32.mrf.mxu0  ;;  %v563_v48 = vpop.f32.mrf.mxu1 }
 0x103   : > { %v475_v49 = vadd.f32 %v474_v47, %v1700_v44  ;;  %v564_v50 = vadd.f32 %v563_v48, %v1702_v45 }
 0x104   : > { %v836_v51 = vmax.f32 %v651_v43, 0.0  ;;  %v837_v52 = vmax.f32 %v740_v46, 0.0 }
 0x105   : > { %v838_v53 = vmax.f32 %v475_v49, 0.0  ;;  %v839_v54 = vmax.f32 %v564_v50, 0.0 }
 0x106   : > { %v1005_v57 = vadd.f32 %v1004_v37, %v836_v51  ;;  %v1042_v58 = vadd.f32 %v1041_v38, %v837_v52 }
 0x107   : > { %v932_v61 = vadd.f32 %v931_v39, %v838_v53  ;;  %v969_v62 = vadd.f32 %v968_v40, %v839_v54 }
 0x109   : > { %v652_v63 = vpop.f32.mrf.mxu2  ;;  %v741_v0 = vpop.f32.mrf.mxu3 }
 0x10a   : > { %v653_v2 = vadd.f32 %v652_v63, %v1712_v55  ;;  %v742_v3 = vadd.f32 %v741_v0, %v1714_v56  ;;  %v477_v4 = vpop.f32.mrf.mxu0  ;;  %v566_v5 = vpop.f32.mrf.mxu1 }
 0x10b   : > { %v478_v6 = vadd.f32 %v477_v4, %v1700_v44  ;;  %v567_v7 = vadd.f32 %v566_v5, %v1702_v45 }
 0x10c   : > { %v840_v8 = vmax.f32 %v653_v2, 0.0  ;;  %v841_v9 = vmax.f32 %v742_v3, 0.0 }
 0x10d   : > { %v842_v10 = vmax.f32 %v478_v6, 0.0  ;;  %v843_v11 = vmax.f32 %v567_v7, 0.0  ;;  %1258 = vmatmul.msk.bf16.gmra.mxu0 %vm376_vm1, %v352_v1  ;;  %1274 = vmatmul.msk.bf16.gmra.mxu1 %vm376_vm1, %v352_v1 }
 0x10e   : > { %v1006_v12 = vadd.f32 %v1005_v57, %v840_v8  ;;  %v1043_v13 = vadd.f32 %v1042_v58, %v841_v9  ;;  %1290 = vmatmul.msk.bf16.gmra.mxu2 %vm376_vm1, %v352_v1  ;;  %1306 = vmatmul.msk.bf16.gmra.mxu3 %vm376_vm1, %v352_v1 }
 0x10f   : > { %v933_v14 = vadd.f32 %v932_v61, %v842_v10  ;;  %v970_v15 = vadd.f32 %v969_v62, %v843_v11 }
 0x111   : > { %v655_v16 = vpop.f32.mrf.mxu2  ;;  %v744_v17 = vpop.f32.mrf.mxu3 }
 0x112   : > { %v656_v18 = vadd.f32 %v655_v16, %v1712_v55  ;;  %v745_v19 = vadd.f32 %v744_v17, %v1714_v56  ;;  %v479_v20 = vpop.f32.mrf.mxu0  ;;  %v568_v21 = vpop.f32.mrf.mxu1 }
 0x113   : > { %v480_v22 = vadd.f32 %v479_v20, %v1700_v44  ;;  %v569_v23 = vadd.f32 %v568_v21, %v1702_v45 }
 0x114   : > { %v844_v24 = vmax.f32 %v656_v18, 0.0  ;;  %v845_v25 = vmax.f32 %v745_v19, 0.0 }
 0x115   : > { %v846_v26 = vmax.f32 %v480_v22, 0.0  ;;  %v847_v27 = vmax.f32 %v569_v23, 0.0 }
 0x116   : > { %v1007_v28 = vadd.f32 %v1006_v12, %v844_v24  ;;  %v1044_v29 = vadd.f32 %v1043_v13, %v845_v25 }
 0x117   : > { %v934_v32 = vadd.f32 %v933_v14, %v846_v26  ;;  %v971_v33 = vadd.f32 %v970_v15, %v847_v27 }
 0x119   : > { %v657_v34 = vpop.f32.mrf.mxu2  ;;  %v746_v35 = vpop.f32.mrf.mxu3 }
 0x11a   : > { %v658_v37 = vadd.f32 %v657_v34, %v1712_v55  ;;  %v747_v38 = vadd.f32 %v746_v35, %v1714_v56  ;;  %v482_v39 = vpop.f32.mrf.mxu0  ;;  %v571_v40 = vpop.f32.mrf.mxu1 }
 0x11b   : > { %v483_v41 = vadd.f32 %v482_v39, %v1700_v44  ;;  %v572_v42 = vadd.f32 %v571_v40, %v1702_v45 }
 0x11c   : > { %v848_v43 = vmax.f32 %v658_v37, 0.0  ;;  %v849_v46 = vmax.f32 %v747_v38, 0.0 }
 0x11d   : > { %v850_v47 = vmax.f32 %v483_v41, 0.0  ;;  %v851_v48 = vmax.f32 %v572_v42, 0.0  ;;  %1259 = vmatmul.msk.bf16.gmra.mxu0 %vm376_vm1, %v353_v36  ;;  %1275 = vmatmul.msk.bf16.gmra.mxu1 %vm376_vm1, %v353_v36 }
 0x11e   : > { %v1008_v49 = vadd.f32 %v1007_v28, %v848_v43  ;;  %v1045_v50 = vadd.f32 %v1044_v29, %v849_v46  ;;  %1291 = vmatmul.msk.bf16.gmra.mxu2 %vm376_vm1, %v353_v36  ;;  %1307 = vmatmul.msk.bf16.gmra.mxu3 %vm376_vm1, %v353_v36 }
 0x11f   : > { %v935_v51 = vadd.f32 %v934_v32, %v850_v47  ;;  %v972_v52 = vadd.f32 %v971_v33, %v851_v48 }
 0x121   : > { %v660_v53 = vpop.f32.mrf.mxu2  ;;  %v749_v54 = vpop.f32.mrf.mxu3 }
 0x122   : > { %v661_v57 = vadd.f32 %v660_v53, %v1712_v55  ;;  %v750_v58 = vadd.f32 %v749_v54, %v1714_v56  ;;  %v484_v59 = vpop.f32.mrf.mxu0  ;;  %v573_v60 = vpop.f32.mrf.mxu1 }
 0x123   : > { %v485_v61 = vadd.f32 %v484_v59, %v1700_v44  ;;  %v574_v62 = vadd.f32 %v573_v60, %v1702_v45 }
 0x124   : > { %v852_v63 = vmax.f32 %v661_v57, 0.0  ;;  %v853_v0 = vmax.f32 %v750_v58, 0.0 }
 0x125   : > { %v854_v1 = vmax.f32 %v485_v61, 0.0  ;;  %v855_v2 = vmax.f32 %v574_v62, 0.0 }
 0x126   : > { %v1009_v3 = vadd.f32 %v1008_v49, %v852_v63  ;;  %v1046_v4 = vadd.f32 %v1045_v50, %v853_v0 }
 0x127   : > { %v936_v5 = vadd.f32 %v935_v51, %v854_v1  ;;  %v973_v6 = vadd.f32 %v972_v52, %v855_v2 }
 0x129   : > { %v662_v7 = vpop.f32.mrf.mxu2  ;;  %v751_v8 = vpop.f32.mrf.mxu3 }
 0x12a   : > { %v663_v9 = vadd.f32 %v662_v7, %v1712_v55  ;;  %v752_v10 = vadd.f32 %v751_v8, %v1714_v56  ;;  %v487_v11 = vpop.f32.mrf.mxu0  ;;  %v576_v12 = vpop.f32.mrf.mxu1 }
 0x12b   : > { %v488_v13 = vadd.f32 %v487_v11, %v1700_v44  ;;  %v577_v14 = vadd.f32 %v576_v12, %v1702_v45 }
 0x12c   : > { %v856_v15 = vmax.f32 %v663_v9, 0.0  ;;  %v857_v16 = vmax.f32 %v752_v10, 0.0 }
 0x12d   : > { %v858_v17 = vmax.f32 %v488_v13, 0.0  ;;  %v859_v18 = vmax.f32 %v577_v14, 0.0 }
 0x12e   : > { %v1010_v19 = vadd.f32 %v1009_v3, %v856_v15  ;;  %v1047_v20 = vadd.f32 %v1046_v4, %v857_v16 }
 0x12f   : > { %v937_v21 = vadd.f32 %v936_v5, %v858_v17  ;;  %v974_v22 = vadd.f32 %v973_v6, %v859_v18 }
 0x131   : > { %v665_v23 = vpop.f32.mrf.mxu2  ;;  %v754_v24 = vpop.f32.mrf.mxu3 }
 0x132   : > { %v666_v25 = vadd.f32 %v665_v23, %v1712_v55  ;;  %v755_v26 = vadd.f32 %v754_v24, %v1714_v56  ;;  %v489_v27 = vpop.f32.mrf.mxu0  ;;  %v578_v28 = vpop.f32.mrf.mxu1 }
 0x133   : > { %v490_v29 = vadd.f32 %v489_v27, %v1700_v44  ;;  %v579_v30 = vadd.f32 %v578_v28, %v1702_v45 }
 0x134   : > { %v860_v31 = vmax.f32 %v666_v25, 0.0  ;;  %v861_v32 = vmax.f32 %v755_v26, 0.0 }
 0x135   : > { %v862_v33 = vmax.f32 %v490_v29, 0.0  ;;  %v863_v34 = vmax.f32 %v579_v30, 0.0 }
 0x136   : > { %v1011_v35 = vadd.f32 %v1010_v19, %v860_v31  ;;  %v1048_v36 = vadd.f32 %v1047_v20, %v861_v32 }
 0x137   : > { %v938_v37 = vadd.f32 %v937_v21, %v862_v33  ;;  %v975_v38 = vadd.f32 %v974_v22, %v863_v34 }
 0x139   : > { %v667_v39 = vpop.f32.mrf.mxu2  ;;  %v756_v40 = vpop.f32.mrf.mxu3 }
 0x13a   : > { %v668_v41 = vadd.f32 %v667_v39, %v1712_v55  ;;  %v757_v42 = vadd.f32 %v756_v40, %v1714_v56  ;;  %v492_v43 = vpop.f32.mrf.mxu0  ;;  %v581_v46 = vpop.f32.mrf.mxu1 }
 0x13b   : > { %v493_v47 = vadd.f32 %v492_v43, %v1700_v44  ;;  %v582_v48 = vadd.f32 %v581_v46, %v1702_v45 }
 0x13c   : > { %v864_v49 = vmax.f32 %v668_v41, 0.0  ;;  %v865_v50 = vmax.f32 %v757_v42, 0.0 }
 0x13d   : > { %v866_v51 = vmax.f32 %v493_v47, 0.0  ;;  %v867_v52 = vmax.f32 %v582_v48, 0.0 }
 0x13e   : > { %v1012_v53 = vadd.f32 %v1011_v35, %v864_v49  ;;  %v1049_v54 = vadd.f32 %v1048_v36, %v865_v50 }
 0x13f   : > { %v939_v57 = vadd.f32 %v938_v37, %v866_v51  ;;  %v976_v58 = vadd.f32 %v975_v38, %v867_v52 }
 0x141   : > { %v670_v59 = vpop.f32.mrf.mxu2  ;;  %v759_v60 = vpop.f32.mrf.mxu3 }
 0x142   : > { %v671_v61 = vadd.f32 %v670_v59, %v1712_v55  ;;  %v760_v62 = vadd.f32 %v759_v60, %v1714_v56  ;;  %v494_v63 = vpop.f32.mrf.mxu0  ;;  %v583_v0 = vpop.f32.mrf.mxu1 }
 0x143   : > { %v495_v1 = vadd.f32 %v494_v63, %v1700_v44  ;;  %v584_v2 = vadd.f32 %v583_v0, %v1702_v45 }
 0x144   : > { %v868_v3 = vmax.f32 %v671_v61, 0.0  ;;  %v869_v4 = vmax.f32 %v760_v62, 0.0 }
 0x145   : > { %v870_v5 = vmax.f32 %v495_v1, 0.0  ;;  %v871_v6 = vmax.f32 %v584_v2, 0.0 }
 0x146   : > { %v1013_v7 = vadd.f32 %v1012_v53, %v868_v3  ;;  %v1050_v8 = vadd.f32 %v1049_v54, %v869_v4 }
 0x147   : > { %v940_v9 = vadd.f32 %v939_v57, %v870_v5  ;;  %v977_v10 = vadd.f32 %v976_v58, %v871_v6 }
 0x149   : > { %v672_v11 = vpop.f32.mrf.mxu2  ;;  %v761_v12 = vpop.f32.mrf.mxu3 }
 0x14a   : > { %v673_v13 = vadd.f32 %v672_v11, %v1712_v55  ;;  %v762_v14 = vadd.f32 %v761_v12, %v1714_v56  ;;  %v497_v15 = vpop.f32.mrf.mxu0  ;;  %v586_v16 = vpop.f32.mrf.mxu1 }
 0x14b   : > { %v498_v17 = vadd.f32 %v497_v15, %v1700_v44  ;;  %v587_v18 = vadd.f32 %v586_v16, %v1702_v45 }
 0x14c   : > { %v872_v19 = vmax.f32 %v673_v13, 0.0  ;;  %v873_v20 = vmax.f32 %v762_v14, 0.0 }
 0x14d   : > { %v874_v21 = vmax.f32 %v498_v17, 0.0  ;;  %v875_v22 = vmax.f32 %v587_v18, 0.0 }
 0x14e   : > { %v1014_v23 = vadd.f32 %v1013_v7, %v872_v19  ;;  %v1051_v24 = vadd.f32 %v1050_v8, %v873_v20 }
 0x14f   : > { %v941_v25 = vadd.f32 %v940_v9, %v874_v21  ;;  %v978_v26 = vadd.f32 %v977_v10, %v875_v22 }
 0x151   : > { %v675_v27 = vpop.f32.mrf.mxu2  ;;  %v764_v28 = vpop.f32.mrf.mxu3 }
 0x152   : > { %v676_v29 = vadd.f32 %v675_v27, %v1712_v55  ;;  %v765_v30 = vadd.f32 %v764_v28, %v1714_v56  ;;  %v499_v31 = vpop.f32.mrf.mxu0  ;;  %v588_v32 = vpop.f32.mrf.mxu1 }
 0x153   : > { %v500_v1 = vadd.f32 %v499_v31, %v1700_v44  ;;  %v589_v2 = vadd.f32 %v588_v32, %v1702_v45 }
 0x154   : > { %v876_v33 = vmax.f32 %v676_v29, 0.0  ;;  %v877_v34 = vmax.f32 %v765_v30, 0.0 }
 0x155   : > { %v878_v7 = vmax.f32 %v500_v1, 0.0  ;;  %v879_v10 = vmax.f32 %v589_v2, 0.0 }
 0x156   : > { %v1015_v35 = vadd.f32 %v1014_v23, %v876_v33  ;;  %v1052_v36 = vadd.f32 %v1051_v24, %v877_v34 }
 0x157   : > { %v942_v22 = vadd.f32 %v941_v25, %v878_v7  ;;  %v979_v28 = vadd.f32 %v978_v26, %v879_v10 }
 0x159   : > { %v677_v37 = vpop.f32.mrf.mxu2  ;;  %v766_v38 = vpop.f32.mrf.mxu3 }
 0x15a   : > { %v502_v39 = vpop.f32.mrf.mxu0  ;;  %v591_v40 = vpop.f32.mrf.mxu1  ;;  %v678_v3 = vadd.f32 %v677_v37, %v1712_v55  ;;  %v767_v4 = vadd.f32 %v766_v38, %v1714_v56 }
 0x15b   : > { %v503_v5 = vadd.f32 %v502_v39, %v1700_v44  ;;  %v592_v6 = vadd.f32 %v591_v40, %v1702_v45 }
 0x15c   : > { %v880_v11 = vmax.f32 %v678_v3, 0.0  ;;  %v881_v18 = vmax.f32 %v767_v4, 0.0 }
 0x15d   : > { %v882_v19 = vmax.f32 %v503_v5, 0.0  ;;  %v883_v20 = vmax.f32 %v592_v6, 0.0 }
 0x15e   : > { %v1016_v29 = vadd.f32 %v1015_v35, %v880_v11  ;;  %v1053_v25 = vadd.f32 %v1052_v36, %v881_v18 }
 0x15f   : > { %v943_v38 = vadd.f32 %v942_v22, %v882_v19  ;;  %v980_v39 = vadd.f32 %v979_v28, %v883_v20 }
 0x161   : > { %v680_v41 = vpop.f32.mrf.mxu2  ;;  %v769_v42 = vpop.f32.mrf.mxu3 }
 0x162   : > { %v504_v43 = vpop.f32.mrf.mxu0  ;;  %v593_v46 = vpop.f32.mrf.mxu1  ;;  %v681_v12 = vadd.f32 %v680_v41, %v1712_v55  ;;  %v770_v15 = vadd.f32 %v769_v42, %v1714_v56 }
 0x163   : > { %v505_v16 = vadd.f32 %v504_v43, %v1700_v44  ;;  %v594_v17 = vadd.f32 %v593_v46, %v1702_v45 }
 0x164   : > { %v884_v30 = vmax.f32 %v681_v12, 0.0  ;;  %v885_v32 = vmax.f32 %v770_v15, 0.0 }
 0x165   : > { %v886_v33 = vmax.f32 %v505_v16, 0.0  ;;  %v887_v34 = vmax.f32 %v594_v17, 0.0  ;;  %v301_v17 = vlaneseq }
 0x167   : > { %v981_v1 = vadd.f32 %v980_v39, %v887_v34  ;;  %vm1921_vm2 = vcmp.lt.s32.totalorder %v301_v17, 512 }
 0x169   : > { %v682_v47 = vpop.f32.mrf.mxu2  ;;  %v771_v48 = vpop.f32.mrf.mxu3 }
 0x16a   : > { %v507_v49 = vpop.f32.mrf.mxu0  ;;  %v596_v50 = vpop.f32.mrf.mxu1  ;;  %v683_v21 = vadd.f32 %v682_v47, %v1712_v55  ;;  %v772_v23 = vadd.f32 %v771_v48, %v1714_v56  ;;  %v1017_v47 = vadd.f32 %v1016_v29, %v884_v30  ;;  %v1521_v30 = vmov 0.0  }
 0x16b   : > { %v508_v24 = vadd.f32 %v507_v49, %v1700_v44  ;;  %v597_v27 = vadd.f32 %v596_v50, %v1702_v45  ;;  %305 = vst.msk [vmem:[%s1911_s4] sm:$0xf] %vm1921_vm2, %v1521_v30 }
 0x16c   : > { %v888_v40 = vmax.f32 %v683_v21, 0.0  ;;  %v889_v41 = vmax.f32 %v772_v23, 0.0 }
 0x16d   : > { %v890_v42 = vmax.f32 %v508_v24, 0.0  ;;  %v891_v26 = vmax.f32 %v597_v27, 0.0 }
 0x16e   : > { %v1018_v3 = vadd.f32 %v1017_v47, %v888_v40 }
 0x16f   : > { %v982_v7 = vadd.f32 %v981_v1, %v891_v26 }
 0x171   : > { %v685_v51 = vpop.f32.mrf.mxu2  ;;  %v774_v52 = vpop.f32.mrf.mxu3 }
 0x172   : > { %v509_v53 = vpop.f32.mrf.mxu0  ;;  %v598_v54 = vpop.f32.mrf.mxu1  ;;  %v686_v31 = vadd.f32 %v685_v51, %v1712_v55  ;;  %v775_v37 = vadd.f32 %v774_v52, %v1714_v56  ;;  %v1054_v51 = vadd.f32 %v1053_v25, %v885_v32  ;;  %v944_v52 = vadd.f32 %v943_v38, %v886_v33 }
 0x173   : > { %v510_v35 = vadd.f32 %v509_v53, %v1700_v44  ;;  %v599_v36 = vadd.f32 %v598_v54, %v1702_v45 }
 0x174   : > { %v892_v48 = vmax.f32 %v686_v31, 0.0  ;;  %v893_v2 = vmax.f32 %v775_v37, 0.0  ;;  %v1055_v5 = vadd.f32 %v1054_v51, %v889_v41  ;;  %v945_v6 = vadd.f32 %v944_v52, %v890_v42 }
 0x175   : > { %v894_v10 = vmax.f32 %v510_v35, 0.0  ;;  %v895_v54 = vmax.f32 %v599_v36, 0.0 }
 0x176   : > { %v1019_v11 = vadd.f32 %v1018_v3, %v892_v48  ;;  %v1056_v16 = vadd.f32 %v1055_v5, %v893_v2 }
 0x177   : > { %v946_v23 = vadd.f32 %v945_v6, %v894_v10  ;;  %v983_v24 = vadd.f32 %v982_v7, %v895_v54 }
 0x179   : > { %v1838_v57 = vpop.f32.mrf.mxu2  ;;  %v1840_v58 = vpop.f32.mrf.mxu3 }
 0x17a   : > { %v1842_v59 = vpop.f32.mrf.mxu0  ;;  %v1844_v60 = vpop.f32.mrf.mxu1  ;;  %v688_v12 = vadd.f32 %v1838_v57, %v1712_v55  ;;  %v777_v15 = vadd.f32 %v1840_v58, %v1714_v56 }
 0x17b   : > { %v513_v4 = vadd.f32 %v1842_v59, %v1700_v44  ;;  %v602_v53 = vadd.f32 %v1844_v60, %v1702_v45 }
 0x17c   : > { %v896_v27 = vmax.f32 %v688_v12, 0.0  ;;  %v897_v28 = vmax.f32 %v777_v15, 0.0 }
 0x17d   : > { %v898_v18 = vmax.f32 %v513_v4, 0.0  ;;  %v899_v19 = vmax.f32 %v602_v53, 0.0 }
 0x17e   : > { %v1020_v41 = vadd.f32 %v1019_v11, %v896_v27  ;;  %v1057_v42 = vadd.f32 %v1056_v16, %v897_v28 }
 0x17f   : > { %v947_v32 = vadd.f32 %v946_v23, %v898_v18  ;;  %v984_v33 = vadd.f32 %v983_v24, %v899_v19 }
 0x181   : > { %v1846_v61 = vpop.f32.mrf.mxu2  ;;  %v1848_v62 = vpop.f32.mrf.mxu3 }
 0x182   : > { %v1850_v63 = vpop.f32.mrf.mxu0  ;;  %v1852_v0 = vpop.f32.mrf.mxu1  ;;  %v691_v57 = vadd.f32 %v1846_v61, %v1712_v55  ;;  %v780_v58 = vadd.f32 %v1848_v62, %v1714_v56 }
 0x183   : > { %v515_v59 = vadd.f32 %v1850_v63, %v1700_v44  ;;  %v604_v60 = vadd.f32 %v1852_v0, %v1702_v45 }
 0x184   : > { %v900_v34 = vmax.f32 %v691_v57, 0.0  ;;  %v901_v37 = vmax.f32 %v780_v58, 0.0 }
 0x185   : > { %v902_v62 = vmax.f32 %v515_v59, 0.0 }
 0x186   : > { %v1058_v51 = vadd.f32 %v1057_v42, %v901_v37 }
 0x187   : > { %v948_v47 = vadd.f32 %v947_v32, %v902_v62 }
 0x189   : > { %v1860_v8 = vpop.f32.mrf.mxu2  ;;  %v1862_v9 = vpop.f32.mrf.mxu3 }
 0x18a   : > { %v1866_v13 = vpop.f32.mrf.mxu0  ;;  %v1868_v14 = vpop.f32.mrf.mxu1  ;;  %v693_v26 = vadd.f32 %v1860_v8, %v1712_v55  ;;  %v782_v35 = vadd.f32 %v1862_v9, %v1714_v56 }
 0x18b   : > { %v518_v63 = vadd.f32 %v1866_v13, %v1700_v44  ;;  %v607_v0 = vadd.f32 %v1868_v14, %v1702_v45  ;;  %v903_v13 = vmax.f32 %v604_v60, 0.0 }
 0x18c   : > { %v904_v6 = vmax.f32 %v693_v26, 0.0  ;;  %v905_v9 = vmax.f32 %v782_v35, 0.0 }
 0x18d   : > { %v906_v25 = vmax.f32 %v518_v63, 0.0  ;;  %v907_v38 = vmax.f32 %v607_v0, 0.0  ;;  %v985_v48 = vadd.f32 %v984_v33, %v903_v13 }
 0x18e   : > { %v1059_v0 = vadd.f32 %v1058_v51, %v905_v9 }
 0x18f   : > { %v949_v2 = vadd.f32 %v948_v47, %v906_v25  ;;  %v986_v3 = vadd.f32 %v985_v48, %v907_v38 }
 0x191   : > { %v1890_v43 = vpop.f32.mrf.mxu2  ;;  %v1892_v46 = vpop.f32.mrf.mxu3 }
 0x192   : > { %v519_v49 = vpop.f32.mrf.mxu0  ;;  %v608_v50 = vpop.f32.mrf.mxu1  ;;  %v696_v52 = vadd.f32 %v1890_v43, %v1712_v55  ;;  %v785_v1 = vadd.f32 %v1892_v46, %v1714_v56 }
 0x193   : > { %v520_v14 = vadd.f32 %v519_v49, %v1700_v44  ;;  %v609_v31 = vadd.f32 %v608_v50, %v1702_v45  ;;  %v1021_v50 = vadd.f32 %v1020_v41, %v900_v34 }
 0x194   : > { %v908_v16 = vmax.f32 %v696_v52, 0.0  ;;  %v909_v59 = vmax.f32 %v785_v1, 0.0 }
 0x195   : > { %v910_v36 = vmax.f32 %v520_v14, 0.0  ;;  %v911_v49 = vmax.f32 %v609_v31, 0.0  ;;  %v1022_v63 = vadd.f32 %v1021_v50, %v904_v6 }
 0x197   : > { %v950_v12 = vadd.f32 %v949_v2, %v910_v36  ;;  %v987_v15 = vadd.f32 %v986_v3, %v911_v49  ;;  %v1023_v27 = vadd.f32 %v1022_v63, %v908_v16 }
 0x199   : > { %v697_v20 = vpop.f32.mrf.mxu2  ;;  %v786_v21 = vpop.f32.mrf.mxu3 }
 0x19a   : > { %v522_v61 = vpop.f32.mrf.mxu0  ;;  %v611_v29 = vpop.f32.mrf.mxu1  ;;  %v698_v7 = vadd.f32 %v697_v20, %v1712_v55  ;;  %v787_v10 = vadd.f32 %v786_v21, %v1714_v56 }
 0x19b   : > { %v523_v39 = vadd.f32 %v522_v61, %v1700_v44  ;;  %v612_v40 = vadd.f32 %v611_v29, %v1702_v45 }
 0x19c   : > { %v912_v20 = vmax.f32 %v698_v7, 0.0  ;;  %v913_v21 = vmax.f32 %v787_v10, 0.0 }
 0x19d   : > { %v914_v4 = vmax.f32 %v523_v39, 0.0  ;;  %v915_v53 = vmax.f32 %v612_v40, 0.0 }
 0x19e   : > { %v1024_v13 = vadd.f32 %v1023_v27, %v912_v20 }
 0x19f   : > { %v951_v18 = vadd.f32 %v950_v12, %v914_v4  ;;  %v988_v19 = vadd.f32 %v987_v15, %v915_v53 }
 0x1a1   : > { %v700_v8 = vpop.f32.mrf.mxu2  ;;  %v789_v5 = vpop.f32.mrf.mxu3 }
 0x1a2   : > { %v524_v11 = vpop.f32.mrf.mxu0  ;;  %v613_v54 = vpop.f32.mrf.mxu1  ;;  %v701_v60 = vadd.f32 %v700_v8, %v1712_v55  ;;  %v790_v17 = vadd.f32 %v789_v5, %v1714_v56 }
 0x1a3   : > { %v525_v43 = vadd.f32 %v524_v11, %v1700_v44  ;;  %v614_v46 = vadd.f32 %v613_v54, %v1702_v45  ;;  %v1060_v44 = vadd.f32 %v1059_v0, %v909_v59 }
 0x1a4   : > { %v916_v28 = vmax.f32 %v701_v60, 0.0  ;;  %v917_v45 = vmax.f32 %v790_v17, 0.0 }
 0x1a5   : > { %v918_v57 = vmax.f32 %v525_v43, 0.0  ;;  %v919_v58 = vmax.f32 %v614_v46, 0.0  ;;  %v1061_v14 = vadd.f32 %v1060_v44, %v913_v21  ;;  %v1074_v46 = vld [vmem:[%s1911_s4] sm:$0xf] }
 0x1a6   : > { %v1025_v37 = vadd.f32 %v1024_v13, %v916_v28 }
 0x1a7   : > { %v952_v23 = vadd.f32 %v951_v18, %v918_v57  ;;  %v989_v24 = vadd.f32 %v988_v19, %v919_v58  ;;  %v1062_v25 = vadd.f32 %v1061_v14, %v917_v45 }
 0x1a9   : > { %v953_v61 = vrot.slane %v952_v23, 4  ;;  %v990_v29 = vrot.slane %v989_v24, 4  ;;  %v702_v30 = vpop.f32.mrf.mxu2  ;;  %v791_v62 = vpop.f32.mrf.mxu3 }
 0x1aa   : > { %v703_v31 = vadd.f32 %v702_v30, %v1712_v55  ;;  %v792_v32 = vadd.f32 %v791_v62, %v1714_v56 }
 0x1ab   : > { %v954_v33 = vadd.f32 %v953_v61, %v952_v23  ;;  %v991_v34 = vadd.f32 %v990_v29, %v989_v24 }
 0x1ac   : > { %v920_v38 = vmax.f32 %v703_v31, 0.0  ;;  %v921_v39 = vmax.f32 %v792_v32, 0.0 }
 0x1ad   : > { %v955_v40 = vrot.slane %v954_v33, 2  ;;  %v992_v41 = vrot.slane %v991_v34, 2 }
 0x1ae   : > { %v1026_v42 = vadd.f32 %v1025_v37, %v920_v38  ;;  %v1063_v26 = vadd.f32 %v1062_v25, %v921_v39 }
 0x1af   : > { %v956_v35 = vadd.f32 %v955_v40, %v954_v33  ;;  %v993_v47 = vadd.f32 %v992_v41, %v991_v34 }
 0x1b0   : > { %v1027_v48 = vrot.slane %v1026_v42, 4  ;;  %v1064_v36 = vrot.slane %v1063_v26, 4 }
 0x1b1   : > { %v957_v49 = vrot.slane %v956_v35, 1  ;;  %v994_v50 = vrot.slane %v993_v47, 1 }
 0x1b2   : > { %v1028_v51 = vadd.f32 %v1027_v48, %v1026_v42  ;;  %v1065_v55 = vadd.f32 %v1064_v36, %v1063_v26 }
 0x1b3   : > { %v958_v52 = vadd.f32 %v957_v49, %v956_v35  ;;  %v995_v56 = vadd.f32 %v994_v50, %v993_v47 }
 0x1b4   : > { %v1029_v1 = vrot.slane %v1028_v51, 2  ;;  %v1066_v2 = vrot.slane %v1065_v55, 2 }
 0x1b5   : > { %v1071_v3 = vmul.f32 0.00390625, %v995_v56  ;;  %v1070_v8 = vmul.f32 0.00390625, %v958_v52 }
 0x1b6   : > { %v1030_v4 = vadd.f32 %v1029_v1, %v1028_v51  ;;  %v1067_v53 = vadd.f32 %v1066_v2, %v1065_v55 }
 0x1b7   : > { %v1079_v5 = vrot.slane %v1071_v3, 7 }
 0x1b8   : > { %v1031_v6 = vrot.slane %v1030_v4, 1  ;;  %v1068_v9 = vrot.slane %v1067_v53, 1 }
 0x1b9   : > { %v1083_v7 = vsel %vm1082_vm3, %v1070_v8, %v1079_v5 }
 0x1ba   : > { %v1032_v10 = vadd.f32 %v1031_v6, %v1030_v4  ;;  %v1069_v11 = vadd.f32 %v1068_v9, %v1067_v53 }
 0x1bc   : > { %v1072_v54 = vmul.f32 0.00390625, %v1032_v10  ;;  %v1073_v12 = vmul.f32 0.00390625, %v1069_v11 }
 0x1be   : > { %v1080_v15 = vrot.slane %v1072_v54, 6  ;;  %v1081_v43 = vrot.slane %v1073_v12, 5 }
 0x1c0   : > { %v1085_v16 = vsel %vm1084_vm4, %v1080_v15, %v1081_v43 }
 0x1c1   : > { %v1087_v59 = vsel %vm1086_vm5, %v1083_v7, %v1085_v16 }
 0x1c2   : > { %v1089_v60 = vadd.f32 %v1087_v59, %v1074_v46 }
 0x1c4   : > { %1094 = vst.msk [vmem:[%s1911_s4] sm:$0xf] %vm1921_vm2, %v1089_v60 }
 0x1c5 PF: > { %s19_s19 = sadd.s32 1, %s1519_s19   ;;  %s1986_s12 = smov %s1495_s13 }
 0x1c6   : > { %p16_p2 = scmp.ge.s32.totalorder %s19_s19, 10   ;;  %s1987_s13 = smov %s1499_s14 }
 0x1c7   : > { %s1988_s14 = smov %s1600_s26  ;;  %s1989_s15 = smov %s1511_s17 }
 0x1c8   : > { %s1990_s16 = smov %s1515_s18  ;;  %s1991_s17 = smov %s1994_s21 }
 0x1c9   : > { %s1992_s18 = smov %s1998_s22  ;;  %18 = sbr.rel (!%p16_p2) target bundleno = 7 (0x7), region = 92 }
 0x1ce   :  { %1123 = vsyncpa [#allocation3], 1 }
 0x1cf   :  { %1125 = vsyncpa [#allocation3 + $0x1], 1 }
 0x1d0   :  { %1126 = vsyncpa [#allocation5], 1 }
 0x1d1   :  { %1128 = vsyncpa [#allocation5 + $0x1], 1 }

// kernel: video_target_recognition_forward.3
= control target key start
LH: loop header
LB: loop body
LE: loop exit
PB: predicated region body
PF: predicated region fallthrough
CT: control target
= control target key end

     0   :  { %12 = vsyncpa [#allocation4], 0  ;;  %s6923_s0 = inlined_call_operand.vmem [shape: bf16[2,2048], index: 0, kind: input, shape index: {}]   ;;  %s6924_s1 = inlined_call_operand.hbm [shape: bf16[2048,1024], index: 1, kind: input, shape index: {}]   ;;  %s6925_s2 = inlined_call_operand.hbm [shape: f32[1,1024], index: 2, kind: input, shape index: {}]   ;;  %s6926_s3 = inlined_call_operand.hbm [shape: bf16[1024,512], index: 3, kind: input, shape index: {}]   ;;  %s6927_s4 = inlined_call_operand.hbm [shape: f32[1,512], index: 4, kind: input, shape index: {}]   ;;  %s6928_s5 = inlined_call_operand.hbm [shape: bf16[512,128], index: 5, kind: input, shape index: {}]   ;;  %s6929_s6 = inlined_call_operand.hbm [shape: f32[1,128], index: 6, kind: input, shape index: {}]   ;;  %s6930_s7 = inlined_call_operand.hbm [shape: f32[2,128], index: 7, kind: output, shape index: {}]  }
   0x1   :  { %14 = vsyncpa [#allocation4 + $0x1], 0 }
   0x2   :  { %15 = vsyncpa [#allocation7], 0 }
   0x3   :  { %16 = vsyncpa [#allocation10], 0 }
   0x4   :  { %17 = vsyncpa [#allocation13], 0 }
   0x5   :  { %18 = vsyncpa [#allocation5], 0  ;;  %s6393_s24 = smov 0   ;;  %s6395_s25 = smov 0  }
   0x6   :  { %s6397_s26 = smov 0   ;;  %s6399_s27 = smov 0  }
   0x7 LB: > { %s219_s30 = sshll.u32 %s6925_s2, 4  ;;  %s6417_s8 = sadd.s32 4294967295, %s6338_s27   ;;  %s6338_s27 = sphi %s6399_s27, %s6938_s27   ;;  %s6334_s26 = sphi %s6397_s26, %s6937_s26   ;;  %s6330_s25 = sphi %s6395_s25, %s6936_s25   ;;  %s6326_s24 = sphi %s6393_s24, %s6935_s24   ;;  %s220_s30 = int_to_ptr.hbm [resolvable:$true] %s219_s30 }
   0x8   : > { %p3868_p0 = scmp.ge.s32.totalorder %s6338_s27, 1  ;;  %p71_p1 = scmp.eq.s32.totalorder %s6417_s8, 0 }
   0x9   : > { %p207_p2 = scmp.lt.s32.totalorder %s6338_s27, 9  ;;  %p3869_p3 = scmp.ne.s32.totalorder %s6417_s8, 0 }
   0xa   : > { %s6340_s10 = smov [#allocation6]   ;;  %s245_s14 = sshll.u32 %s6927_s4, 4  ;;  %s246_s14 = int_to_ptr.hbm [resolvable:$true] %s245_s14 }
   0xb   : > { %p6423_p4 = pnand %p3868_p0, %p207_p2  ;;  %s221_s11 = sshll.u32 %s6340_s10, 4  ;;  %s222_s11 = int_to_ptr.vmem [resolvable:$true] %s221_s11 }
   0xc   : > { %s6341_s16 = smov [#allocation9]   ;;  %s230_s20 = sshll.u32 %s6926_s3, 4  ;;  %s231_s20 = int_to_ptr.hbm [resolvable:$true] %s230_s20 }
   0xd   : > { %p6001_p5 = pneg %p6423_p4  ;;  %s247_s17 = sshll.u32 %s6341_s16, 4  ;;  %s248_s17 = int_to_ptr.vmem [resolvable:$true] %s247_s17 }
   0xe   : > { %s6342_s21 = smov [#allocation8]   ;;  %s256_s29 = sshll.u32 %s6928_s5, 4  ;;  %s257_s29 = int_to_ptr.hbm [resolvable:$true] %s256_s29 }
   0xf   : > { %p6434_p6 = pnand %p6001_p5, %p71_p1  ;;  %s232_s22 = sshll.u32 %s6342_s21, 4  ;;  %s233_s22 = int_to_ptr.vmem [resolvable:$true] %s232_s22 }
  0x10   : > { %s6343_s10 = smov 256   ;;  %s6344_s12 = smov 16  }
  0x11   : > { %6004 = dma.hbm_to_vmem [thread:$0]  (!%p6434_p6), %s220_s30, 128, %s222_s11, [#allocation7]  }
  0x12   : > { %6010 = dma.hbm_to_vmem [thread:$0]  (!%p6434_p6), %s246_s14, 64, %s248_s17, [#allocation10]  }
  0x13   : > { %6007 = dma.hbm_to_vmem [thread:$0]  (!%p6434_p6), %s231_s20, 32768, %s233_s22, [#allocation7], %s6343_s10, %s6343_s10, %s6344_s12  }
  0x14   : > { %s6345_s13 = smov [#allocation11]   ;;  %s6346_s11 = smov 64  }
  0x15   : > { %s258_s30 = sshll.u32 %s6345_s13, 4  ;;  %s6347_s14 = smov 4   ;;  %s259_s30 = int_to_ptr.vmem [resolvable:$true] %s258_s30 }
  0x16   : > { %6013 = dma.hbm_to_vmem [thread:$0]  (!%p6434_p6), %s257_s29, 4096, %s259_s30, [#allocation10], %s6346_s11, %s6346_s11, %s6347_s14  }
  0x17   : > { %s271_s18 = sshll.u32 %s6929_s6, 4  ;;  %s6348_s19 = smov [#allocation12]   ;;  %s272_s18 = int_to_ptr.hbm [resolvable:$true] %s271_s18 }
  0x18   : > { %s273_s20 = sshll.u32 %s6348_s19, 4  ;;  %s6458_s21 = sadd.s32 1, %s6338_s27   ;;  %s274_s20 = int_to_ptr.vmem [resolvable:$true] %s273_s20 }
  0x19   : > { %6016 = dma.hbm_to_vmem [thread:$0]  (!%p6434_p6), %s272_s18, 16, %s274_s20, [#allocation13]  }
  0x1a   : > { %s54_s22 = ssub.s32 %s6338_s27, %s6458_s21  ;;  %s57_s23 = sadd.s32 1, %s6334_s26 }
  0x1b   : > { %p55_p7 = scmp.eq.s32.totalorder %s54_s22, 0  ;;  %p64_p8 = scmp.ne.s32.totalorder %s6334_s26, %s6330_s25 }
  0x1c   : > { %p65_p9 = scmp.eq.s32.totalorder %s6338_s27, 0  ;;  %p70_p10 = scmp.ne.s32.totalorder %s6330_s25, %s6326_s24 }
  0x1d   : > { %s6469_s28 = scalar_select %p55_p7, %s6334_s26, %s57_s23  }
  0x1e   : > { %p66_p11 = por %p65_p9, %p64_p8  ;;  %p6473_p12 = por %p71_p1, %p70_p10 }
  0x1f   : > { %p6026_p13 = scmp.lt.s32.totalorder %s6338_s27, 8  ;;  %s292_s15 = sand.u32 1, %s6334_s26  }
  0x20   : > { %s3875_s10 = sshll.u32 %s292_s15, 10  ;;  %s5558_s12 = sshll.u32 %s6338_s27, 10 }
  0x21   : > { %s302_s11 = scalar_lea.hbm %s6924_s1, %s5558_s12  ;;  %s296_s14 = scalar_lea.vmem [#allocation3], %s3875_s10 }
  0x22   : > { %s305_s16 = sshll.u32 %s296_s14, 4  ;;  %s303_s17 = sshll.u32 %s302_s11, 4  ;;  %s306_s16 = int_to_ptr.vmem [resolvable:$true] %s305_s16  ;;  %s304_s17 = int_to_ptr.hbm [resolvable:$true] %s303_s17 }
  0x23   : > { %p6483_p0 = pnand %p6026_p13, %p66_p11  ;;  %s293_s18 = scalar_lea.sflag [#allocation4], %s292_s15 }
  0x24   : > { %s6230_s19 = sshra.s32 %s304_s17, 4  ;;  %s6237_s23 = scalar_lea.hbm %s6924_s1, 8192  ;;  %s6231_s19 = int_to_ptr.hbm [resolvable:$true] %s6230_s19 }
  0x25   : > { %s6232_s20 = scalar_lea.hbm %s6231_s19, 1024  ;;  %p6234_p5 = pneg %p6483_p0 }
  0x26   : > { %p6233_p2 = scmp.ne.s32.totalorder %s6231_s19, %s6232_s20  ;;  %p6238_p8 = scmp.lt.s32.totalorder %s6231_s19, %s6924_s1 }
  0x27   : > { %p6239_p9 = scmp.lt.s32.totalorder %s6237_s23, %s6232_s20 }
  0x28   : > { %p6235_p6 = pnand %p6234_p5, %p6233_p2 }
  0x29   : > { %p6240_p10 = por %p6239_p9, %p6238_p8 }
  0x2a   : > { %p6236_p7 = pneg %p6235_p6 }
  0x2c   : > { %p6241_p11 = pnand %p6240_p10, %p6236_p7 }
  0x2e   : > { %6244 = shalt.err (!%p6241_p11)
}
  0x2f   : > { %s6349_s15 = smov 512   ;;  %s6350_s13 = smov 32  }
  0x30   : > { %6020 = dma.hbm_to_vmem [thread:$0]  (!%p6483_p0), %s304_s17, 16384, %s306_s16, %s293_s18, %s6349_s15, %s6349_s15, %s6350_s13  }
  0x31   : > { %317 = sbr.rel (%p6423_p4) target bundleno = 891 (0x37b), region = 48  ;;  %s319_s30 = sand.u32 (!%p6423_p4), 1, %s6330_s25  }
  0x32   : > { %s3880_s11 = sshll.u32 (!%p6423_p4), %s319_s30, 10  ;;  %s320_s14 = scalar_lea.sflag (!%p6423_p4), [#allocation4], %s319_s30 }
  0x33   : > { %s6500_s27 = scalar_lea.vmem (!%p6423_p4), [#allocation3], %s3880_s11 }
  0x36   : > { %6305 = dma.done.wait (%p6473_p12), %s320_s14, 16384  }
  0x37   : > { %6307 = vsyncadd (%p6473_p12), %s320_s14, 4294950912 }
  0x38   : > { %6309 = dma.done.wait (%p71_p1), [#allocation7], 32896  }
  0x39   : > { %6311 = vsyncadd (%p71_p1), [#allocation7], 4294934400 }
  0x3a   : > { %6313 = dma.done.wait (%p71_p1), [#allocation10], 4160  }
  0x3b   : > { %6315 = vsyncadd (%p71_p1), [#allocation10], 4294963136 }
  0x3c   : > { %6317 = dma.done.wait (%p71_p1), [#allocation13], 16  }
  0x3d   : > { %6319 = vsyncadd (%p71_p1), [#allocation13], 4294967280  ;;  %s3886_s9 = sshll.u32 %s6417_s8, 1  ;;  %388 = sbr.rel (%p3869_p3) target bundleno = 69 (0x45), region = 76 }
  0x3e   : > { %p380_p4 = scmp.lt.s32.totalorder %s3886_s9, 15 }
  0x40   : > { %s6940_s9 = smov (!%p380_p4, %s3886_s9), 15 }
  0x41   : > { %s382_s17 = scalar_lea.vmem %s6923_s0, %s6940_s9 }
  0x42   : > { %v6351_v0 = vmov 0.0  }
  0x43   : > { %389 = vst [vmem:[#allocation2] sm:$0xff] %v6351_v0 }
  0x44   : > { %390 = vst [vmem:[#allocation2 + $0x8] sm:$0xff] %v6351_v0 }
  0x45 PF: > { %v4114_v1 = vld [vmem:[%s6500_s27 + $0x1c0] sm:$0xf]  ;;  %v5615_v6 = vld [vmem:[%s6500_s27 + $0x1c4] sm:$0xf]  ;;  %vm1390_vm0 = vcmask 1041408   ;;  %vm1392_vm1 = vcmask 1045508  }
  0x46   : > { %v5619_v2 = vld [vmem:[%s6500_s27 + $0x1dc] sm:$0xf0]  ;;  %v4116_v7 = vld [vmem:[%s6500_s27 + $0x1e0] sm:$0xf0]  ;;  %vm1394_vm2 = vcmask 1043456   ;;  %p4400_p1 = scmp.ne.s32.totalorder %s6417_s8, 7 }
  0x47   : > { %v4370_v3 = vld [vmem:[%s6500_s27 + $0x3c0] sm:$0xf]  ;;  %v4115_v4 = vor.u32 %v5619_v2, %v4114_v1  ;;  %v4119_v9 = vor.u32 %v5615_v6, %v4116_v7  ;;  %v5679_v10 = vld [vmem:[%s6500_s27 + $0x3c4] sm:$0xf] }
  0x48   : > { %v5683_v5 = vld [vmem:[%s6500_s27 + $0x3dc] sm:$0xf0]  ;;  %v4372_v11 = vld [vmem:[%s6500_s27 + $0x3e0] sm:$0xf0] }
  0x49   : > { %v4371_v8 = vor.u32 %v5683_v5, %v4370_v3  ;;  %v4082_v12 = vld [vmem:[%s6500_s27 + $0x180] sm:$0xf]  ;;  %1168 = vmatpush.bf16.msra.mxu0 %v4115_v4  ;;  %v4375_v13 = vor.u32 %v5679_v10, %v4372_v11  ;;  %1194 = vmatpush.bf16.msra.mxu2 %v4119_v9  ;;  %v5607_v19 = vld [vmem:[%s6500_s27 + $0x184] sm:$0xf] }
  0x4a   : > { %v5611_v14 = vld [vmem:[%s6500_s27 + $0x19c] sm:$0xf0]  ;;  %v4084_v20 = vld [vmem:[%s6500_s27 + $0x1a0] sm:$0xf0] }
  0x4b   : > { %v4338_v15 = vld [vmem:[%s6500_s27 + $0x380] sm:$0xf]  ;;  %1181 = vmatpush.bf16.msra.mxu1 %v4371_v8  ;;  %v4083_v17 = vor.u32 %v5611_v14, %v4082_v12  ;;  %v5671_v21 = vld [vmem:[%s6500_s27 + $0x384] sm:$0xf]  ;;  %1207 = vmatpush.bf16.msra.mxu3 %v4375_v13  ;;  %v4087_v22 = vor.u32 %v5607_v19, %v4084_v20 }
  0x4c   : > { %v5675_v16 = vld [vmem:[%s6500_s27 + $0x39c] sm:$0xf0]  ;;  %v4340_v23 = vld [vmem:[%s6500_s27 + $0x3a0] sm:$0xf0] }
  0x4d   : > { %v4339_v18 = vor.u32 %v5675_v16, %v4338_v15  ;;  %v4050_v24 = vld [vmem:[%s6500_s27 + $0x140] sm:$0xf]  ;;  %v4343_v26 = vor.u32 %v5671_v21, %v4340_v23  ;;  %v5599_v29 = vld [vmem:[%s6500_s27 + $0x144] sm:$0xf]  ;;  %1169 = vmatpush.bf16.msra.mxu0 %v4083_v17  ;;  %1195 = vmatpush.bf16.msra.mxu2 %v4087_v22 }
  0x4e   : > { %v5603_v25 = vld [vmem:[%s6500_s27 + $0x15c] sm:$0xf0]  ;;  %v4052_v31 = vld [vmem:[%s6500_s27 + $0x160] sm:$0xf0] }
  0x4f   : > { %v4306_v27 = vld [vmem:[%s6500_s27 + $0x340] sm:$0xf]  ;;  %v4051_v30 = vor.u32 %v5603_v25, %v4050_v24  ;;  %v5663_v32 = vld [vmem:[%s6500_s27 + $0x344] sm:$0xf]  ;;  %1182 = vmatpush.bf16.msra.mxu1 %v4339_v18  ;;  %v4055_v35 = vor.u32 %v5599_v29, %v4052_v31  ;;  %1208 = vmatpush.bf16.msra.mxu3 %v4343_v26  ;;  %v4122_v29 = vld [vmem:[%s6500_s27 + $0x1c8] sm:$0xf] }
  0x50   : > { %v5667_v28 = vld [vmem:[%s6500_s27 + $0x35c] sm:$0xf0]  ;;  %v4308_v33 = vld [vmem:[%s6500_s27 + $0x360] sm:$0xf0]  ;;  %v4378_v31 = vld [vmem:[%s6500_s27 + $0x3c8] sm:$0xf] }
  0x51   : > { %v4307_v34 = vor.u32 %v5667_v28, %v4306_v27  ;;  %v4018_v36 = vld [vmem:[%s6500_s27 + $0x100] sm:$0xf]  ;;  %v4311_v39 = vor.u32 %v5663_v32, %v4308_v33  ;;  %v5591_v41 = vld [vmem:[%s6500_s27 + $0x104] sm:$0xf]  ;;  %1170 = vmatpush.bf16.msra.mxu0 %v4051_v30  ;;  %1196 = vmatpush.bf16.msra.mxu2 %v4055_v35  ;;  %v5620_v30 = vld [vmem:[%s6500_s27 + $0x1e4] sm:$0xf0] }
  0x52   : > { %v5595_v37 = vld [vmem:[%s6500_s27 + $0x11c] sm:$0xf0]  ;;  %v4020_v42 = vld [vmem:[%s6500_s27 + $0x120] sm:$0xf0]  ;;  %v5684_v33 = vld [vmem:[%s6500_s27 + $0x3e4] sm:$0xf0] }
  0x53   : > { %v4274_v38 = vld [vmem:[%s6500_s27 + $0x300] sm:$0xf]  ;;  %v5655_v43 = vld [vmem:[%s6500_s27 + $0x304] sm:$0xf]  ;;  %v4019_v45 = vor.u32 %v5595_v37, %v4018_v36  ;;  %1183 = vmatpush.bf16.msra.mxu1 %v4307_v34  ;;  %v4023_v47 = vor.u32 %v5591_v41, %v4020_v42  ;;  %1209 = vmatpush.bf16.msra.mxu3 %v4311_v39  ;;  %v5616_v34 = vld [vmem:[%s6500_s27 + $0x1cc] sm:$0xf]  ;;  %v4123_v41 = vor.u32 %v5620_v30, %v4122_v29 }
  0x54   : > { %v5659_v40 = vld [vmem:[%s6500_s27 + $0x31c] sm:$0xf0]  ;;  %v4276_v44 = vld [vmem:[%s6500_s27 + $0x320] sm:$0xf0]  ;;  %v4124_v35 = vld [vmem:[%s6500_s27 + $0x1e8] sm:$0xf0]  ;;  %v4379_v42 = vor.u32 %v5684_v33, %v4378_v31 }
  0x55   : > { %v4275_v46 = vor.u32 %v5659_v40, %v4274_v38  ;;  %v3986_v48 = vld [vmem:[%s6500_s27 + $0xc0] sm:$0xf]  ;;  %v4279_v51 = vor.u32 %v5655_v43, %v4276_v44  ;;  %v5583_v53 = vld [vmem:[%s6500_s27 + $0xc4] sm:$0xf]  ;;  %1171 = vmatpush.bf16.msra.mxu0 %v4019_v45  ;;  %1197 = vmatpush.bf16.msra.mxu2 %v4023_v47  ;;  %v5680_v38 = vld [vmem:[%s6500_s27 + $0x3cc] sm:$0xf]  ;;  %v4127_v43 = vor.u32 %v5616_v34, %v4124_v35 }
  0x56   : > { %v5587_v49 = vld [vmem:[%s6500_s27 + $0xdc] sm:$0xf0]  ;;  %v3988_v54 = vld [vmem:[%s6500_s27 + $0xe0] sm:$0xf0]  ;;  %v4380_v39 = vld [vmem:[%s6500_s27 + $0x3e8] sm:$0xf0] }
  0x57   : > { %v4242_v50 = vld [vmem:[%s6500_s27 + $0x2c0] sm:$0xf]  ;;  %v5647_v55 = vld [vmem:[%s6500_s27 + $0x2c4] sm:$0xf]  ;;  %v3987_v57 = vor.u32 %v5587_v49, %v3986_v48  ;;  %1184 = vmatpush.bf16.msra.mxu1 %v4275_v46  ;;  %v3991_v59 = vor.u32 %v5583_v53, %v3988_v54  ;;  %1210 = vmatpush.bf16.msra.mxu3 %v4279_v51  ;;  %v4090_v44 = vld [vmem:[%s6500_s27 + $0x188] sm:$0xf]  ;;  %v4383_v47 = vor.u32 %v5680_v38, %v4380_v39 }
  0x58   : > { %v5651_v52 = vld [vmem:[%s6500_s27 + $0x2dc] sm:$0xf0]  ;;  %v4244_v56 = vld [vmem:[%s6500_s27 + $0x2e0] sm:$0xf0]  ;;  %v5612_v45 = vld [vmem:[%s6500_s27 + $0x1a4] sm:$0xf0] }
  0x59   : > { %v4243_v58 = vor.u32 %v5651_v52, %v4242_v50  ;;  %v3954_v60 = vld [vmem:[%s6500_s27 + $0x80] sm:$0xf]  ;;  %v4247_v63 = vor.u32 %v5647_v55, %v4244_v56  ;;  %v5575_v1 = vld [vmem:[%s6500_s27 + $0x84] sm:$0xf]  ;;  %1172 = vmatpush.bf16.msra.mxu0 %v3987_v57  ;;  %1198 = vmatpush.bf16.msra.mxu2 %v3991_v59  ;;  %v4346_v46 = vld [vmem:[%s6500_s27 + $0x388] sm:$0xf]  ;;  %v4091_v54 = vor.u32 %v5612_v45, %v4090_v44 }
  0x5a   : > { %v5579_v61 = vld [vmem:[%s6500_s27 + $0x9c] sm:$0xf0]  ;;  %v3956_v2 = vld [vmem:[%s6500_s27 + $0xa0] sm:$0xf0]  ;;  %v5676_v48 = vld [vmem:[%s6500_s27 + $0x3a4] sm:$0xf0] }
  0x5b   : > { %v4210_v62 = vld [vmem:[%s6500_s27 + $0x280] sm:$0xf]  ;;  %v5639_v3 = vld [vmem:[%s6500_s27 + $0x284] sm:$0xf]  ;;  %v3955_v5 = vor.u32 %v5579_v61, %v3954_v60  ;;  %1185 = vmatpush.bf16.msra.mxu1 %v4243_v58  ;;  %v3959_v7 = vor.u32 %v5575_v1, %v3956_v2  ;;  %1211 = vmatpush.bf16.msra.mxu3 %v4247_v63  ;;  %v5608_v49 = vld [vmem:[%s6500_s27 + $0x18c] sm:$0xf]  ;;  %v4347_v55 = vor.u32 %v5676_v48, %v4346_v46 }
  0x5c   : > { %v5643_v0 = vld [vmem:[%s6500_s27 + $0x29c] sm:$0xf0]  ;;  %v4212_v4 = vld [vmem:[%s6500_s27 + $0x2a0] sm:$0xf0]  ;;  %v4092_v50 = vld [vmem:[%s6500_s27 + $0x1a8] sm:$0xf0] }
  0x5d   : > { %v4211_v6 = vor.u32 %v5643_v0, %v4210_v62  ;;  %v3922_v8 = vld [vmem:[%s6500_s27 + $0x40] sm:$0xf]  ;;  %v4215_v11 = vor.u32 %v5639_v3, %v4212_v4  ;;  %v5567_v13 = vld [vmem:[%s6500_s27 + $0x44] sm:$0xf]  ;;  %1173 = vmatpush.bf16.msra.mxu0 %v3955_v5  ;;  %1199 = vmatpush.bf16.msra.mxu2 %v3959_v7  ;;  %v5672_v51 = vld [vmem:[%s6500_s27 + $0x38c] sm:$0xf]  ;;  %v4095_v56 = vor.u32 %v5608_v49, %v4092_v50 }
  0x5e   : > { %v5571_v9 = vld [vmem:[%s6500_s27 + $0x5c] sm:$0xf0]  ;;  %v3924_v14 = vld [vmem:[%s6500_s27 + $0x60] sm:$0xf0]  ;;  %v4348_v52 = vld [vmem:[%s6500_s27 + $0x3a8] sm:$0xf0] }
  0x5f   : > { %v4178_v10 = vld [vmem:[%s6500_s27 + $0x240] sm:$0xf]  ;;  %v5631_v15 = vld [vmem:[%s6500_s27 + $0x244] sm:$0xf]  ;;  %v3923_v17 = vor.u32 %v5571_v9, %v3922_v8  ;;  %1186 = vmatpush.bf16.msra.mxu1 %v4211_v6  ;;  %v3927_v21 = vor.u32 %v5567_v13, %v3924_v14  ;;  %1212 = vmatpush.bf16.msra.mxu3 %v4215_v11  ;;  %v393_v53 = vld [vmem:[%s382_s17] sm:$0x3]  ;;  %v4351_v60 = vor.u32 %v5672_v51, %v4348_v52 }
  0x60   : > { %v5635_v12 = vld [vmem:[%s6500_s27 + $0x25c] sm:$0xf0]  ;;  %v4180_v16 = vld [vmem:[%s6500_s27 + $0x260] sm:$0xf0]  ;;  %523 = vst [vmem:[#allocation1] ss:$9 sm:$0xff] %v393_v53 }
  0x61   : > { %v3890_v18 = vld [vmem:[%s6500_s27] sm:$0xf]  ;;  %v4179_v20 = vor.u32 %v5635_v12, %v4178_v10  ;;  %v5559_v24 = vld [vmem:[%s6500_s27 + $0x4] sm:$0xf]  ;;  %v4183_v25 = vor.u32 %v5631_v15, %v4180_v16  ;;  %1174 = vmatpush.bf16.msra.mxu0 %v3923_v17  ;;  %1200 = vmatpush.bf16.msra.mxu2 %v3927_v21  ;;  %v4058_v57 = vld [vmem:[%s6500_s27 + $0x148] sm:$0xf] }
  0x62   : > { %v5563_v19 = vld [vmem:[%s6500_s27 + $0x1c] sm:$0xf0]  ;;  %v3892_v26 = vld [vmem:[%s6500_s27 + $0x20] sm:$0xf0]  ;;  %v5604_v58 = vld [vmem:[%s6500_s27 + $0x164] sm:$0xf0] }
  0x63   : > { %v4146_v22 = vld [vmem:[%s6500_s27 + $0x200] sm:$0xf]  ;;  %v5623_v27 = vld [vmem:[%s6500_s27 + $0x204] sm:$0xf]  ;;  %v3891_v32 = vor.u32 %v5563_v19, %v3890_v18  ;;  %1187 = vmatpush.bf16.msra.mxu1 %v4179_v20  ;;  %v3895_v37 = vor.u32 %v5559_v24, %v3892_v26  ;;  %1213 = vmatpush.bf16.msra.mxu3 %v4183_v25  ;;  %v4314_v59 = vld [vmem:[%s6500_s27 + $0x348] sm:$0xf]  ;;  %v4059_v2 = vor.u32 %v5604_v58, %v4058_v57 }
  0x64   : > { %v5627_v23 = vld [vmem:[%s6500_s27 + $0x21c] sm:$0xf0]  ;;  %v4148_v28 = vld [vmem:[%s6500_s27 + $0x220] sm:$0xf0]  ;;  %v5668_v61 = vld [vmem:[%s6500_s27 + $0x364] sm:$0xf0] }
  0x65   : > { %v4147_v36 = vor.u32 %v5627_v23, %v4146_v22  ;;  %v4151_v40 = vor.u32 %v5623_v27, %v4148_v28  ;;  %1175 = vmatpush.bf16.msra.mxu0 %v3891_v32  ;;  %1201 = vmatpush.bf16.msra.mxu2 %v3895_v37  ;;  %v5600_v62 = vld [vmem:[%s6500_s27 + $0x14c] sm:$0xf]  ;;  %v4315_v3 = vor.u32 %v5668_v61, %v4314_v59  ;;  %v4026_v5 = vld [vmem:[%s6500_s27 + $0x108] sm:$0xf] }
  0x66   : > { %v4060_v63 = vld [vmem:[%s6500_s27 + $0x168] sm:$0xf0]  ;;  %v5596_v6 = vld [vmem:[%s6500_s27 + $0x124] sm:$0xf0] }
  0x67   : > { %1188 = vmatpush.bf16.msra.mxu1 %v4147_v36  ;;  %1214 = vmatpush.bf16.msra.mxu3 %v4151_v40  ;;  %v5664_v0 = vld [vmem:[%s6500_s27 + $0x34c] sm:$0xf]  ;;  %v4063_v4 = vor.u32 %v5600_v62, %v4060_v63  ;;  %v4282_v7 = vld [vmem:[%s6500_s27 + $0x308] sm:$0xf]  ;;  %v4027_v15 = vor.u32 %v5596_v6, %v4026_v5  ;;  %v6631_v16 = vld [vmem:[#allocation1 + $0x9] sm:$0xff] }
  0x68   : > { %v4316_v1 = vld [vmem:[%s6500_s27 + $0x368] sm:$0xf0]  ;;  %v5660_v9 = vld [vmem:[%s6500_s27 + $0x324] sm:$0xf0]  ;;  %v5617_v5 = vld [vmem:[%s6500_s27 + $0x1d4] sm:$0xf] }
  0x69   : > { %1220 = vmatpush.bf16.msrb.mxu0 %v4123_v41  ;;  %1246 = vmatpush.bf16.msrb.mxu2 %v4127_v43  ;;  %v4319_v8 = vor.u32 %v5664_v0, %v4316_v1  ;;  %v5592_v10 = vld [vmem:[%s6500_s27 + $0x10c] sm:$0xf]  ;;  %v4283_v17 = vor.u32 %v5660_v9, %v4282_v7  ;;  %v3994_v19 = vld [vmem:[%s6500_s27 + $0xc8] sm:$0xf]  ;;  %v4130_v0 = vld [vmem:[%s6500_s27 + $0x1d0] sm:$0xf] }
  0x6a   : > { %v4028_v11 = vld [vmem:[%s6500_s27 + $0x128] sm:$0xf0]  ;;  %v5588_v20 = vld [vmem:[%s6500_s27 + $0xe4] sm:$0xf0]  ;;  %1215 = vmatmul.bf16.vlgmr.msra.gmra.mxu3 %v6631_v16  ;;  %1189 = vmatmul.bf16.vlgmr.msra.gmra.mxu1 %v6631_v16  ;;  %v5621_v1 = vld [vmem:[%s6500_s27 + $0x1ec] sm:$0xf0] }
  0x6b   : > { %1233 = vmatpush.bf16.msrb.mxu1 %v4379_v42  ;;  %1259 = vmatpush.bf16.msrb.mxu3 %v4383_v47  ;;  %v5656_v12 = vld [vmem:[%s6500_s27 + $0x30c] sm:$0xf]  ;;  %v4031_v18 = vor.u32 %v5592_v10, %v4028_v11  ;;  %v4250_v21 = vld [vmem:[%s6500_s27 + $0x2c8] sm:$0xf]  ;;  %v3995_v28 = vor.u32 %v5588_v20, %v3994_v19  ;;  %v4132_v6 = vld [vmem:[%s6500_s27 + $0x1f0] sm:$0xf0] }
  0x6c   : > { %v4284_v13 = vld [vmem:[%s6500_s27 + $0x328] sm:$0xf0]  ;;  %v5652_v23 = vld [vmem:[%s6500_s27 + $0x2e4] sm:$0xf0]  ;;  %v5681_v9 = vld [vmem:[%s6500_s27 + $0x3d4] sm:$0xf] }
  0x6d   : > { %1221 = vmatpush.bf16.msrb.mxu0 %v4091_v54  ;;  %1247 = vmatpush.bf16.msrb.mxu2 %v4095_v56  ;;  %v6628_v14 = vld [vmem:[#allocation1] sm:$0xff]  ;;  %v4287_v22 = vor.u32 %v5656_v12, %v4284_v13  ;;  %v4251_v29 = vor.u32 %v5652_v23, %v4250_v21  ;;  %v4388_v10 = vld [vmem:[%s6500_s27 + $0x3f0] sm:$0xf0]  ;;  %v4131_v12 = vor.u32 %v5621_v1, %v4130_v0  ;;  %v4354_v19 = vld [vmem:[%s6500_s27 + $0x390] sm:$0xf] }
  0x6e   : > { %1202 = vmatmul.bf16.vlgmr.msra.gmra.mxu2 %v6628_v14  ;;  %v5584_v24 = vld [vmem:[%s6500_s27 + $0xcc] sm:$0xf]  ;;  %1176 = vmatmul.bf16.vlgmr.msra.gmra.mxu0 %v6628_v14  ;;  %v3962_v31 = vld [vmem:[%s6500_s27 + $0x88] sm:$0xf]  ;;  %v4391_v20 = vor.u32 %v5681_v9, %v4388_v10  ;;  %v5677_v21 = vld [vmem:[%s6500_s27 + $0x3ac] sm:$0xf0] }
  0x6f   : > { %1234 = vmatpush.bf16.msrb.mxu1 %v4347_v55  ;;  %1260 = vmatpush.bf16.msrb.mxu3 %v4351_v60  ;;  %v3996_v25 = vld [vmem:[%s6500_s27 + $0xe8] sm:$0xf0]  ;;  %v5580_v32 = vld [vmem:[%s6500_s27 + $0xa4] sm:$0xf0]  ;;  %v4100_v23 = vld [vmem:[%s6500_s27 + $0x1b0] sm:$0xf0] }
  0x70   : > { %v5648_v26 = vld [vmem:[%s6500_s27 + $0x2cc] sm:$0xf]  ;;  %v3999_v30 = vor.u32 %v5584_v24, %v3996_v25  ;;  %v4218_v33 = vld [vmem:[%s6500_s27 + $0x288] sm:$0xf]  ;;  %v3963_v40 = vor.u32 %v5580_v32, %v3962_v31  ;;  %v5673_v24 = vld [vmem:[%s6500_s27 + $0x394] sm:$0xf] }
  0x71   : > { %1222 = vmatpush.bf16.msrb.mxu0 %v4059_v2  ;;  %1248 = vmatpush.bf16.msrb.mxu2 %v4063_v4  ;;  %v4252_v27 = vld [vmem:[%s6500_s27 + $0x2e8] sm:$0xf0]  ;;  %v5644_v35 = vld [vmem:[%s6500_s27 + $0x2a4] sm:$0xf0]  ;;  %v4386_v2 = vld [vmem:[%s6500_s27 + $0x3d0] sm:$0xf] }
  0x72   : > { %v4255_v34 = vor.u32 %v5648_v26, %v4252_v27  ;;  %v5576_v36 = vld [vmem:[%s6500_s27 + $0x8c] sm:$0xf]  ;;  %v4219_v41 = vor.u32 %v5644_v35, %v4218_v33  ;;  %v3930_v43 = vld [vmem:[%s6500_s27 + $0x48] sm:$0xf]  ;;  %v5685_v4 = vld [vmem:[%s6500_s27 + $0x3ec] sm:$0xf0]  ;;  %v4355_v27 = vor.u32 %v5677_v21, %v4354_v19 }
  0x73   : > { %1235 = vmatpush.bf16.msrb.mxu1 %v4315_v3  ;;  %1261 = vmatpush.bf16.msrb.mxu3 %v4319_v8  ;;  %v3964_v37 = vld [vmem:[%s6500_s27 + $0xa8] sm:$0xf0]  ;;  %v5572_v44 = vld [vmem:[%s6500_s27 + $0x64] sm:$0xf0]  ;;  %v4387_v13 = vor.u32 %v5685_v4, %v4386_v2  ;;  %v4356_v25 = vld [vmem:[%s6500_s27 + $0x3b0] sm:$0xf0] }
  0x74   : > { %v5640_v38 = vld [vmem:[%s6500_s27 + $0x28c] sm:$0xf]  ;;  %v3967_v42 = vor.u32 %v5576_v36, %v3964_v37  ;;  %v4186_v45 = vld [vmem:[%s6500_s27 + $0x248] sm:$0xf]  ;;  %v3931_v52 = vor.u32 %v5572_v44, %v3930_v43  ;;  %v4322_v31 = vld [vmem:[%s6500_s27 + $0x350] sm:$0xf]  ;;  %v4359_v32 = vor.u32 %v5673_v24, %v4356_v25 }
  0x75   : > { %1223 = vmatpush.bf16.msrb.mxu0 %v4027_v15  ;;  %1249 = vmatpush.bf16.msrb.mxu2 %v4031_v18  ;;  %v4220_v39 = vld [vmem:[%s6500_s27 + $0x2a8] sm:$0xf0]  ;;  %v5636_v47 = vld [vmem:[%s6500_s27 + $0x264] sm:$0xf0]  ;;  %v4135_v15 = vor.u32 %v5617_v5, %v4132_v6  ;;  %v5613_v18 = vld [vmem:[%s6500_s27 + $0x1ac] sm:$0xf0] }
  0x76   : > { %v4223_v46 = vor.u32 %v5640_v38, %v4220_v39  ;;  %v5568_v48 = vld [vmem:[%s6500_s27 + $0x4c] sm:$0xf]  ;;  %v3898_v53 = vld [vmem:[%s6500_s27 + $0x8] sm:$0xf]  ;;  %v4187_v55 = vor.u32 %v5636_v47, %v4186_v45  ;;  %v5669_v33 = vld [vmem:[%s6500_s27 + $0x36c] sm:$0xf0] }
  0x77   : > { %1236 = vmatpush.bf16.msrb.mxu1 %v4283_v17  ;;  %1262 = vmatpush.bf16.msrb.mxu3 %v4287_v22  ;;  %v3932_v49 = vld [vmem:[%s6500_s27 + $0x68] sm:$0xf0]  ;;  %v5564_v54 = vld [vmem:[%s6500_s27 + $0x24] sm:$0xf0]  ;;  %v4098_v17 = vld [vmem:[%s6500_s27 + $0x190] sm:$0xf]  ;;  %v4323_v39 = vor.u32 %v5669_v33, %v4322_v31 }
  0x78   : > { %v5632_v50 = vld [vmem:[%s6500_s27 + $0x24c] sm:$0xf]  ;;  %v3935_v56 = vor.u32 %v5568_v48, %v3932_v49  ;;  %v4154_v57 = vld [vmem:[%s6500_s27 + $0x208] sm:$0xf]  ;;  %v3899_v3 = vor.u32 %v5564_v54, %v3898_v53  ;;  %v5609_v22 = vld [vmem:[%s6500_s27 + $0x194] sm:$0xf]  ;;  %v4099_v26 = vor.u32 %v5613_v18, %v4098_v17 }
  0x79   : > { %1224 = vmatpush.bf16.msrb.mxu0 %v3995_v28  ;;  %1250 = vmatpush.bf16.msrb.mxu2 %v3999_v30  ;;  %v4188_v51 = vld [vmem:[%s6500_s27 + $0x268] sm:$0xf0]  ;;  %v5628_v58 = vld [vmem:[%s6500_s27 + $0x224] sm:$0xf0]  ;;  %v4103_v28 = vor.u32 %v5609_v22, %v4100_v23  ;;  %v5605_v30 = vld [vmem:[%s6500_s27 + $0x16c] sm:$0xf0] }
  0x7a   : > { %v5560_v59 = vld [vmem:[%s6500_s27 + $0xc] sm:$0xf]  ;;  %v4191_v60 = vor.u32 %v5632_v50, %v4188_v51  ;;  %v4155_v7 = vor.u32 %v5628_v58, %v4154_v57  ;;  %v4068_v35 = vld [vmem:[%s6500_s27 + $0x170] sm:$0xf0]  ;;  %v4290_v43 = vld [vmem:[%s6500_s27 + $0x310] sm:$0xf] }
  0x7b   : > { %1237 = vmatpush.bf16.msrb.mxu1 %v4251_v29  ;;  %1263 = vmatpush.bf16.msrb.mxu3 %v4255_v34  ;;  %v3900_v61 = vld [vmem:[%s6500_s27 + $0x28] sm:$0xf0]  ;;  %v4066_v29 = vld [vmem:[%s6500_s27 + $0x150] sm:$0xf]  ;;  %v5601_v34 = vld [vmem:[%s6500_s27 + $0x154] sm:$0xf] }
  0x7c   : > { %v5624_v62 = vld [vmem:[%s6500_s27 + $0x20c] sm:$0xf]  ;;  %v3903_v8 = vor.u32 %v5560_v59, %v3900_v61  ;;  %v5665_v36 = vld [vmem:[%s6500_s27 + $0x354] sm:$0xf]  ;;  %v4067_v38 = vor.u32 %v5605_v30, %v4066_v29  ;;  %v5661_v45 = vld [vmem:[%s6500_s27 + $0x32c] sm:$0xf0] }
  0x7d   : > { %1225 = vmatpush.bf16.msrb.mxu0 %v3963_v40  ;;  %1251 = vmatpush.bf16.msrb.mxu2 %v3967_v42  ;;  %v4156_v63 = vld [vmem:[%s6500_s27 + $0x228] sm:$0xf0]  ;;  %v4324_v37 = vld [vmem:[%s6500_s27 + $0x370] sm:$0xf0]  ;;  %v4071_v40 = vor.u32 %v5601_v34, %v4068_v35  ;;  %v5597_v42 = vld [vmem:[%s6500_s27 + $0x12c] sm:$0xf0]  ;;  %v4291_v51 = vor.u32 %v5661_v45, %v4290_v43 }
  0x7e   : > { %v4159_v11 = vor.u32 %v5624_v62, %v4156_v63  ;;  %v4327_v44 = vor.u32 %v5665_v36, %v4324_v37  ;;  %v4036_v47 = vld [vmem:[%s6500_s27 + $0x130] sm:$0xf0]  ;;  %v4002_v53 = vld [vmem:[%s6500_s27 + $0xd0] sm:$0xf]  ;;  %v4138_v36 = vld [vmem:[%s6500_s27 + $0x1d8] sm:$0xf] }
  0x7f   : > { %1238 = vmatpush.bf16.msrb.mxu1 %v4219_v41  ;;  %1264 = vmatpush.bf16.msrb.mxu3 %v4223_v46  ;;  %v4034_v41 = vld [vmem:[%s6500_s27 + $0x110] sm:$0xf]  ;;  %v5593_v46 = vld [vmem:[%s6500_s27 + $0x114] sm:$0xf]  ;;  %v5622_v37 = vld [vmem:[%s6500_s27 + $0x1f4] sm:$0xf0] }
  0x80   : > { %v5657_v48 = vld [vmem:[%s6500_s27 + $0x314] sm:$0xf]  ;;  %v4035_v50 = vor.u32 %v5597_v42, %v4034_v41  ;;  %v5589_v54 = vld [vmem:[%s6500_s27 + $0xec] sm:$0xf0]  ;;  %v5618_v41 = vld [vmem:[%s6500_s27 + $0x1dc] sm:$0xf] }
  0x81   : > { %1226 = vmatpush.bf16.msrb.mxu0 %v3931_v52  ;;  %1252 = vmatpush.bf16.msrb.mxu2 %v3935_v56  ;;  %v4292_v49 = vld [vmem:[%s6500_s27 + $0x330] sm:$0xf0]  ;;  %v4039_v52 = vor.u32 %v5593_v46, %v4036_v47  ;;  %v5653_v57 = vld [vmem:[%s6500_s27 + $0x2ec] sm:$0xf0]  ;;  %v4003_v62 = vor.u32 %v5589_v54, %v4002_v53  ;;  %v4140_v42 = vld [vmem:[%s6500_s27 + $0x1f8] sm:$0xf0] }
  0x82   : > { %v4295_v56 = vor.u32 %v5657_v48, %v4292_v49  ;;  %v5585_v58 = vld [vmem:[%s6500_s27 + $0xd4] sm:$0xf]  ;;  %v3970_v1 = vld [vmem:[%s6500_s27 + $0x90] sm:$0xf]  ;;  %v5682_v45 = vld [vmem:[%s6500_s27 + $0x3dc] sm:$0xf]  ;;  %v4139_v48 = vor.u32 %v5622_v37, %v4138_v36 }
  0x83   : > { %1239 = vmatpush.bf16.msrb.mxu1 %v4187_v55  ;;  %1265 = vmatpush.bf16.msrb.mxu3 %v4191_v60  ;;  %v4258_v55 = vld [vmem:[%s6500_s27 + $0x2d0] sm:$0xf]  ;;  %v4004_v59 = vld [vmem:[%s6500_s27 + $0xf0] sm:$0xf0]  ;;  %v4396_v46 = vld [vmem:[%s6500_s27 + $0x3f8] sm:$0xf0] }
  0x84   : > { %v5649_v60 = vld [vmem:[%s6500_s27 + $0x2d4] sm:$0xf]  ;;  %v4259_v63 = vor.u32 %v5653_v57, %v4258_v55  ;;  %v4007_v0 = vor.u32 %v5585_v58, %v4004_v59  ;;  %v5581_v2 = vld [vmem:[%s6500_s27 + $0xac] sm:$0xf0]  ;;  %v4362_v53 = vld [vmem:[%s6500_s27 + $0x398] sm:$0xf]  ;;  %v4399_v54 = vor.u32 %v5682_v45, %v4396_v46 }
  0x85   : > { %1227 = vmatpush.bf16.msrb.mxu0 %v3899_v3  ;;  %1253 = vmatpush.bf16.msrb.mxu2 %v3903_v8  ;;  %v4260_v61 = vld [vmem:[%s6500_s27 + $0x2f0] sm:$0xf0]  ;;  %v4226_v3 = vld [vmem:[%s6500_s27 + $0x290] sm:$0xf]  ;;  %v3971_v10 = vor.u32 %v5581_v2, %v3970_v1  ;;  %v5678_v55 = vld [vmem:[%s6500_s27 + $0x3b4] sm:$0xf0] }
  0x86   : > { %v4263_v4 = vor.u32 %v5649_v60, %v4260_v61  ;;  %v5645_v5 = vld [vmem:[%s6500_s27 + $0x2ac] sm:$0xf0]  ;;  %v5577_v6 = vld [vmem:[%s6500_s27 + $0x94] sm:$0xf]  ;;  %v4108_v57 = vld [vmem:[%s6500_s27 + $0x1b8] sm:$0xf0]  ;;  %v4363_v61 = vor.u32 %v5678_v55, %v4362_v53 }
  0x87   : > { %1240 = vmatpush.bf16.msrb.mxu1 %v4155_v7  ;;  %1266 = vmatpush.bf16.msrb.mxu3 %v4159_v11  ;;  %v3972_v7 = vld [vmem:[%s6500_s27 + $0xb0] sm:$0xf0]  ;;  %v4227_v11 = vor.u32 %v5645_v5, %v4226_v3  ;;  %v4194_v17 = vld [vmem:[%s6500_s27 + $0x250] sm:$0xf]  ;;  %v5674_v58 = vld [vmem:[%s6500_s27 + $0x39c] sm:$0xf] }
  0x88   : > { %1254 = vmatmul.bf16.vlgmr.msrb.gmra.mxu2 %v6628_v14  ;;  %1228 = vmatmul.bf16.vlgmr.msrb.gmra.mxu0 %v6628_v14  ;;  %v5641_v8 = vld [vmem:[%s6500_s27 + $0x294] sm:$0xf]  ;;  %v5637_v19 = vld [vmem:[%s6500_s27 + $0x26c] sm:$0xf0]  ;;  %v4364_v59 = vld [vmem:[%s6500_s27 + $0x3b8] sm:$0xf0] }
  0x89   : > { %1272 = vmatpush.bf16.msra.mxu0 %v4131_v12  ;;  %1298 = vmatpush.bf16.msra.mxu2 %v4135_v15  ;;  %v4228_v9 = vld [vmem:[%s6500_s27 + $0x2b0] sm:$0xf0]  ;;  %v3975_v12 = vor.u32 %v5577_v6, %v3972_v7  ;;  %v5573_v15 = vld [vmem:[%s6500_s27 + $0x6c] sm:$0xf0]  ;;  %v4330_v1 = vld [vmem:[%s6500_s27 + $0x358] sm:$0xf]  ;;  %v4367_v2 = vor.u32 %v5674_v58, %v4364_v59 }
  0x8a   : > { %1267 = vmatmul.bf16.vlgmr.msrb.gmra.mxu3 %v6631_v16  ;;  %1241 = vmatmul.bf16.vlgmr.msrb.gmra.mxu1 %v6631_v16  ;;  %v4231_v18 = vor.u32 %v5641_v8, %v4228_v9  ;;  %v3940_v21 = vld [vmem:[%s6500_s27 + $0x70] sm:$0xf0]  ;;  %v3906_v25 = vld [vmem:[%s6500_s27 + $0x10] sm:$0xf]  ;;  %v5670_v3 = vld [vmem:[%s6500_s27 + $0x374] sm:$0xf0] }
  0x8b   : > { %1285 = vmatpush.bf16.msra.mxu1 %v4387_v13  ;;  %1311 = vmatpush.bf16.msra.mxu3 %v4391_v20  ;;  %v3938_v13 = vld [vmem:[%s6500_s27 + $0x50] sm:$0xf]  ;;  %v5569_v20 = vld [vmem:[%s6500_s27 + $0x54] sm:$0xf]  ;;  %v4076_v5 = vld [vmem:[%s6500_s27 + $0x178] sm:$0xf0]  ;;  %v4331_v9 = vor.u32 %v5670_v3, %v4330_v1 }
  0x8c   : > { %v5633_v22 = vld [vmem:[%s6500_s27 + $0x254] sm:$0xf]  ;;  %v3939_v24 = vor.u32 %v5573_v15, %v3938_v13  ;;  %v4162_v29 = vld [vmem:[%s6500_s27 + $0x210] sm:$0xf]  ;;  %v5666_v6 = vld [vmem:[%s6500_s27 + $0x35c] sm:$0xf] }
  0x8d   : > { %1273 = vmatpush.bf16.msra.mxu0 %v4099_v26  ;;  %1299 = vmatpush.bf16.msra.mxu2 %v4103_v28  ;;  %v4196_v23 = vld [vmem:[%s6500_s27 + $0x270] sm:$0xf0]  ;;  %v5565_v26 = vld [vmem:[%s6500_s27 + $0x2c] sm:$0xf0]  ;;  %v3943_v28 = vor.u32 %v5569_v20, %v3940_v21  ;;  %v4332_v7 = vld [vmem:[%s6500_s27 + $0x378] sm:$0xf0] }
  0x8e   : > { %v5629_v30 = vld [vmem:[%s6500_s27 + $0x22c] sm:$0xf0]  ;;  %v5561_v31 = vld [vmem:[%s6500_s27 + $0x14] sm:$0xf]  ;;  %v4298_v13 = vld [vmem:[%s6500_s27 + $0x318] sm:$0xf]  ;;  %v4335_v15 = vor.u32 %v5666_v6, %v4332_v7 }
  0x8f   : > { %1286 = vmatpush.bf16.msra.mxu1 %v4355_v27  ;;  %1312 = vmatpush.bf16.msra.mxu3 %v4359_v32  ;;  %v4195_v27 = vor.u32 %v5637_v19, %v4194_v17  ;;  %v4199_v32 = vor.u32 %v5633_v22, %v4196_v23  ;;  %v3908_v33 = vld [vmem:[%s6500_s27 + $0x30] sm:$0xf0]  ;;  %v4163_v43 = vor.u32 %v5629_v30, %v4162_v29  ;;  %v5662_v17 = vld [vmem:[%s6500_s27 + $0x334] sm:$0xf0]  ;;  %v4044_v19 = vld [vmem:[%s6500_s27 + $0x138] sm:$0xf0] }
  0x90   : > { %v5625_v34 = vld [vmem:[%s6500_s27 + $0x214] sm:$0xf]  ;;  %v5658_v20 = vld [vmem:[%s6500_s27 + $0x31c] sm:$0xf]  ;;  %v4299_v23 = vor.u32 %v5662_v17, %v4298_v13  ;;  %v5654_v29 = vld [vmem:[%s6500_s27 + $0x2f4] sm:$0xf0] }
  0x91   : > { %1274 = vmatpush.bf16.msra.mxu0 %v4067_v38  ;;  %1300 = vmatpush.bf16.msra.mxu2 %v4071_v40  ;;  %v4164_v35 = vld [vmem:[%s6500_s27 + $0x230] sm:$0xf0]  ;;  %v4394_v38 = vld [vmem:[%s6500_s27 + $0x3d8] sm:$0xf]  ;;  %v4300_v21 = vld [vmem:[%s6500_s27 + $0x338] sm:$0xf0] }
  0x92   : > { %v5686_v40 = vld [vmem:[%s6500_s27 + $0x3f4] sm:$0xf0]  ;;  %v4167_v47 = vor.u32 %v5625_v34, %v4164_v35  ;;  %v5586_v30 = vld [vmem:[%s6500_s27 + $0xdc] sm:$0xf] }
  0x93   : > { %1287 = vmatpush.bf16.msra.mxu1 %v4323_v39  ;;  %1313 = vmatpush.bf16.msra.mxu3 %v4327_v44  ;;  %v3907_v39 = vor.u32 %v5565_v26, %v3906_v25  ;;  %v3911_v44 = vor.u32 %v5561_v31, %v3908_v33  ;;  %v4395_v49 = vor.u32 %v5686_v40, %v4394_v38  ;;  %v4010_v25 = vld [vmem:[%s6500_s27 + $0xd8] sm:$0xf]  ;;  %v4012_v31 = vld [vmem:[%s6500_s27 + $0xf8] sm:$0xf0] }
  0x94   : > { %v5590_v26 = vld [vmem:[%s6500_s27 + $0xf4] sm:$0xf0]  ;;  %v4268_v33 = vld [vmem:[%s6500_s27 + $0x2f8] sm:$0xf0]  ;;  %v4015_v36 = vor.u32 %v5586_v30, %v4012_v31  ;;  %v391_v31 = vld [vmem:[#allocation2] sm:$0xff] }
  0x95   : > { %1275 = vmatpush.bf16.msra.mxu0 %v4035_v50  ;;  %1301 = vmatpush.bf16.msra.mxu2 %v4039_v52  ;;  %v4143_v50 = vor.u32 %v5618_v41, %v4140_v42  ;;  %v5614_v52 = vld [vmem:[%s6500_s27 + $0x1b4] sm:$0xf0]  ;;  %v4011_v34 = vor.u32 %v5590_v26, %v4010_v25  ;;  %v5578_v42 = vld [vmem:[%s6500_s27 + $0x9c] sm:$0xf] }
  0x96   : > { %v3978_v37 = vld [vmem:[%s6500_s27 + $0x98] sm:$0xf]  ;;  %v4236_v45 = vld [vmem:[%s6500_s27 + $0x2b8] sm:$0xf0] }
  0x97   : > { %1288 = vmatpush.bf16.msra.mxu1 %v4291_v51  ;;  %1314 = vmatpush.bf16.msra.mxu3 %v4295_v56  ;;  %v4106_v51 = vld [vmem:[%s6500_s27 + $0x198] sm:$0xf]  ;;  %v5610_v56 = vld [vmem:[%s6500_s27 + $0x19c] sm:$0xf] }
  0x98   : > { %v4107_v60 = vor.u32 %v5614_v52, %v4106_v51  ;;  %v5582_v38 = vld [vmem:[%s6500_s27 + $0xb4] sm:$0xf0]  ;;  %v3948_v55 = vld [vmem:[%s6500_s27 + $0x78] sm:$0xf0] }
  0x99   : > { %1276 = vmatpush.bf16.msra.mxu0 %v4003_v62  ;;  %1302 = vmatpush.bf16.msra.mxu2 %v4007_v0  ;;  %v4111_v62 = vor.u32 %v5610_v56, %v4108_v57  ;;  %v5606_v0 = vld [vmem:[%s6500_s27 + $0x174] sm:$0xf0]  ;;  %v3979_v46 = vor.u32 %v5582_v38, %v3978_v37  ;;  %v5634_v56 = vld [vmem:[%s6500_s27 + $0x25c] sm:$0xf] }
  0x9a   : > { %v5646_v41 = vld [vmem:[%s6500_s27 + $0x2b4] sm:$0xf0]  ;;  %v4204_v57 = vld [vmem:[%s6500_s27 + $0x278] sm:$0xf0] }
  0x9b   : > { %1289 = vmatpush.bf16.msra.mxu1 %v4259_v63  ;;  %1315 = vmatpush.bf16.msra.mxu3 %v4263_v4  ;;  %v4074_v63 = vld [vmem:[%s6500_s27 + $0x158] sm:$0xf]  ;;  %v5602_v4 = vld [vmem:[%s6500_s27 + $0x15c] sm:$0xf] }
  0x9c   : > { %v4075_v8 = vor.u32 %v5606_v0, %v4074_v63  ;;  %v4202_v51 = vld [vmem:[%s6500_s27 + $0x258] sm:$0xf]  ;;  %v4207_v0 = vor.u32 %v5634_v56, %v4204_v57  ;;  %v3916_v3 = vld [vmem:[%s6500_s27 + $0x38] sm:$0xf0] }
  0x9d   : > { %1277 = vmatpush.bf16.msra.mxu0 %v3971_v10  ;;  %1303 = vmatpush.bf16.msra.mxu2 %v3975_v12  ;;  %v4079_v10 = vor.u32 %v5602_v4, %v4076_v5  ;;  %v5598_v12 = vld [vmem:[%s6500_s27 + $0x134] sm:$0xf0]  ;;  %v5626_v4 = vld [vmem:[%s6500_s27 + $0x21c] sm:$0xf] }
  0x9e   : > { %v5638_v53 = vld [vmem:[%s6500_s27 + $0x274] sm:$0xf0]  ;;  %v4172_v5 = vld [vmem:[%s6500_s27 + $0x238] sm:$0xf0] }
  0x9f   : > { %1290 = vmatpush.bf16.msra.mxu1 %v4227_v11  ;;  %1316 = vmatpush.bf16.msra.mxu3 %v4231_v18  ;;  %v4042_v11 = vld [vmem:[%s6500_s27 + $0x118] sm:$0xf]  ;;  %v5594_v18 = vld [vmem:[%s6500_s27 + $0x11c] sm:$0xf]  ;;  %v4203_v59 = vor.u32 %v5638_v53, %v4202_v51 }
  0xa0   : > { %v4043_v22 = vor.u32 %v5598_v12, %v4042_v11  ;;  %v4170_v63 = vld [vmem:[%s6500_s27 + $0x218] sm:$0xf] }
  0xa1   : > { %1278 = vmatpush.bf16.msra.mxu0 %v3939_v24  ;;  %1304 = vmatpush.bf16.msra.mxu2 %v3943_v28  ;;  %v4047_v24 = vor.u32 %v5594_v18, %v4044_v19  ;;  %v4303_v28 = vor.u32 %v5658_v20, %v4300_v21  ;;  %v5630_v1 = vld [vmem:[%s6500_s27 + $0x234] sm:$0xf0] }
  0xa2   : > { %v4171_v7 = vor.u32 %v5630_v1, %v4170_v63 }
  0xa3   : > { %1291 = vmatpush.bf16.msra.mxu1 %v4195_v27  ;;  %1317 = vmatpush.bf16.msra.mxu3 %v4199_v32  ;;  %v4266_v27 = vld [vmem:[%s6500_s27 + $0x2d8] sm:$0xf]  ;;  %v5650_v32 = vld [vmem:[%s6500_s27 + $0x2dc] sm:$0xf] }
  0xa4   : > { %v4267_v35 = vor.u32 %v5654_v29, %v4266_v27  ;;  %v4271_v40 = vor.u32 %v5650_v32, %v4268_v33 }
  0xa5   : > { %1279 = vmatpush.bf16.msra.mxu0 %v3907_v39  ;;  %1305 = vmatpush.bf16.msra.mxu2 %v3911_v44  ;;  %v4234_v39 = vld [vmem:[%s6500_s27 + $0x298] sm:$0xf]  ;;  %v5642_v44 = vld [vmem:[%s6500_s27 + $0x29c] sm:$0xf] }
  0xa6   : > { %v4239_v52 = vor.u32 %v5642_v44, %v4236_v45 }
  0xa7   : > { %1292 = vmatpush.bf16.msra.mxu1 %v4163_v43  ;;  %1318 = vmatpush.bf16.msra.mxu3 %v4167_v47  ;;  %v3980_v43 = vld [vmem:[%s6500_s27 + $0xb8] sm:$0xf0]  ;;  %v4235_v47 = vor.u32 %v5646_v41, %v4234_v39 }
  0xa8   : > { %1306 = vmatmul.bf16.vlgmr.msra.gmra.mxu2 %v6628_v14  ;;  %1280 = vmatmul.bf16.vlgmr.msra.gmra.mxu0 %v6628_v14 }
  0xa9   : > { %1324 = vmatpush.bf16.msrb.mxu0 %v4139_v48  ;;  %1350 = vmatpush.bf16.msrb.mxu2 %v4143_v50  ;;  %v3983_v48 = vor.u32 %v5578_v42, %v3980_v43  ;;  %v5574_v50 = vld [vmem:[%s6500_s27 + $0x74] sm:$0xf0] }
  0xaa   : > { %1319 = vmatmul.bf16.vlgmr.msra.gmra.mxu3 %v6631_v16  ;;  %1293 = vmatmul.bf16.vlgmr.msra.gmra.mxu1 %v6631_v16 }
  0xab   : > { %1337 = vmatpush.bf16.msrb.mxu1 %v4395_v49  ;;  %1363 = vmatpush.bf16.msrb.mxu3 %v4399_v54  ;;  %v3946_v49 = vld [vmem:[%s6500_s27 + $0x58] sm:$0xf]  ;;  %v5570_v54 = vld [vmem:[%s6500_s27 + $0x5c] sm:$0xf] }
  0xac   : > { %v3947_v58 = vor.u32 %v5574_v50, %v3946_v49 }
  0xad   : > { %1325 = vmatpush.bf16.msrb.mxu0 %v4107_v60  ;;  %1351 = vmatpush.bf16.msrb.mxu2 %v4111_v62  ;;  %v3951_v60 = vor.u32 %v5570_v54, %v3948_v55  ;;  %v5566_v62 = vld [vmem:[%s6500_s27 + $0x34] sm:$0xf0] }
  0xaf   : > { %1338 = vmatpush.bf16.msrb.mxu1 %v4363_v61  ;;  %1364 = vmatpush.bf16.msrb.mxu3 %v4367_v2  ;;  %v3914_v61 = vld [vmem:[%s6500_s27 + $0x18] sm:$0xf]  ;;  %v5562_v2 = vld [vmem:[%s6500_s27 + $0x1c] sm:$0xf] }
  0xb0   : > { %v3915_v6 = vor.u32 %v5566_v62, %v3914_v61 }
  0xb1   : > { %1326 = vmatpush.bf16.msrb.mxu0 %v4075_v8  ;;  %1352 = vmatpush.bf16.msrb.mxu2 %v4079_v10  ;;  %v3919_v8 = vor.u32 %v5562_v2, %v3916_v3 }
  0xb3   : > { %1339 = vmatpush.bf16.msrb.mxu1 %v4331_v9  ;;  %1365 = vmatpush.bf16.msrb.mxu3 %v4335_v15  ;;  %v4175_v9 = vor.u32 %v5626_v4, %v4172_v5 }
  0xb5   : > { %1327 = vmatpush.bf16.msrb.mxu0 %v4043_v22  ;;  %1353 = vmatpush.bf16.msrb.mxu2 %v4047_v24 }
  0xb7   : > { %1340 = vmatpush.bf16.msrb.mxu1 %v4299_v23  ;;  %1366 = vmatpush.bf16.msrb.mxu3 %v4303_v28 }
  0xb9   : > { %1328 = vmatpush.bf16.msrb.mxu0 %v4011_v34  ;;  %1354 = vmatpush.bf16.msrb.mxu2 %v4015_v36 }
  0xbb   : > { %1341 = vmatpush.bf16.msrb.mxu1 %v4267_v35  ;;  %1367 = vmatpush.bf16.msrb.mxu3 %v4271_v40 }
  0xbd   : > { %1329 = vmatpush.bf16.msrb.mxu0 %v3979_v46  ;;  %1355 = vmatpush.bf16.msrb.mxu2 %v3983_v48 }
  0xbf   : > { %1342 = vmatpush.bf16.msrb.mxu1 %v4235_v47  ;;  %1368 = vmatpush.bf16.msrb.mxu3 %v4239_v52 }
  0xc1   : > { %1330 = vmatpush.bf16.msrb.mxu0 %v3947_v58  ;;  %1356 = vmatpush.bf16.msrb.mxu2 %v3951_v60 }
  0xc3   : > { %1343 = vmatpush.bf16.msrb.mxu1 %v4203_v59  ;;  %1369 = vmatpush.bf16.msrb.mxu3 %v4207_v0  ;;  %v392_v59 = vld [vmem:[#allocation2 + $0x8] sm:$0xff] }
  0xc5   : > { %1331 = vmatpush.bf16.msrb.mxu0 %v3915_v6  ;;  %1357 = vmatpush.bf16.msrb.mxu2 %v3919_v8 }
  0xc7   : > { %1344 = vmatpush.bf16.msrb.mxu1 %v4171_v7  ;;  %1370 = vmatpush.bf16.msrb.mxu3 %v4175_v9 }
  0xc8   : > { %1332 = vmatmul.bf16.vlgmr.msrb.gmra.mxu0 %v6628_v14  ;;  %1358 = vmatmul.bf16.vlgmr.msrb.gmra.mxu2 %v6628_v14 }
  0xca   : > { %1345 = vmatmul.bf16.vlgmr.msrb.gmra.mxu1 %v6631_v16  ;;  %1371 = vmatmul.bf16.vlgmr.msrb.gmra.mxu3 %v6631_v16 }
  0xe7   : > { %v1190_v11 = vpop.f32.mrf.mxu1 }
  0xeb   : > { %v1177_v10 = vpop.f32.mrf.mxu0 }
  0xec   : > { %v1191_v26 = vadd.f32 %v1190_v11, %v1177_v10 }
  0xed   : > { %v1216_v13 = vpop.f32.mrf.mxu3 }
  0xef   : > { %v1192_v17 = vpop.f32.mrf.mxu1 }
  0xf1   : > { %v1203_v12 = vpop.f32.mrf.mxu2 }
  0xf2   : > { %v1217_v22 = vadd.f32 %v1216_v13, %v1203_v12 }
  0xf3   : > { %v1179_v15 = vpop.f32.mrf.mxu0 }
  0xf4   : > { %v1384_v27 = vrot.slane %v1217_v22, 6 }
  0xf5   : > { %v1218_v19 = vpop.f32.mrf.mxu3 }
  0xf6   : > { %v1391_v32 = vsel %vm1390_vm0, %v1191_v26, %v1384_v27 }
  0xf9   : > { %v1205_v18 = vpop.f32.mrf.mxu2 }
 0x105   : > { %v1229_v20 = vpop.f32.mrf.mxu0 }
 0x107   : > { %v1242_v21 = vpop.f32.mrf.mxu1 }
 0x108   : > { %v1243_v23 = vadd.f32 %v1242_v21, %v1229_v20 }
 0x10a   : > { %v1385_v28 = vrot.slane %v1243_v23, 4 }
 0x10b   : > { %v1255_v24 = vpop.f32.mrf.mxu2 }
 0x10d   : > { %v1268_v25 = vpop.f32.mrf.mxu3  ;;  %v1231_v16 = vpop.f32.mrf.mxu0 }
 0x10e   : > { %v1269_v14 = vadd.f32 %v1268_v25, %v1255_v24 }
 0x10f   : > { %v1244_v30 = vpop.f32.mrf.mxu1 }
 0x110   : > { %v1386_v29 = vrot.slane %v1269_v14, 2 }
 0x112   : > { %v1393_v33 = vsel %vm1392_vm1, %v1385_v28, %v1386_v29 }
 0x113   : > { %v1395_v34 = vsel %vm1394_vm2, %v1391_v32, %v1393_v33  ;;  %v1257_v36 = vpop.f32.mrf.mxu2 }
 0x114   : > { %v1401_v35 = vadd.f32 %v1395_v34, %v391_v31 }
 0x115   : > { %v1270_v37 = vpop.f32.mrf.mxu3 }
 0x116   : > { %1403 = vst [vmem:[#allocation2] sm:$0xff] %v1401_v35 }
 0x125   : > { %v1281_v38 = vpop.f32.mrf.mxu0 }
 0x127   : > { %v1294_v39 = vpop.f32.mrf.mxu1 }
 0x128   : > { %v1295_v53 = vadd.f32 %v1294_v39, %v1281_v38 }
 0x12b   : > { %v1307_v40 = vpop.f32.mrf.mxu2 }
 0x12d   : > { %v1320_v41 = vpop.f32.mrf.mxu3  ;;  %v1283_v42 = vpop.f32.mrf.mxu0 }
 0x12e   : > { %v1321_v48 = vadd.f32 %v1320_v41, %v1307_v40 }
 0x12f   : > { %v1296_v43 = vpop.f32.mrf.mxu1 }
 0x130   : > { %v1387_v54 = vrot.slane %v1321_v48, 6 }
 0x132   : > { %v1396_v60 = vsel %vm1390_vm0, %v1295_v53, %v1387_v54 }
 0x133   : > { %v1309_v44 = vpop.f32.mrf.mxu2 }
 0x135   : > { %v1322_v45 = vpop.f32.mrf.mxu3 }
 0x145   : > { %v1333_v46 = vpop.f32.mrf.mxu0 }
 0x147   : > { %v1346_v47 = vpop.f32.mrf.mxu1 }
 0x148   : > { %v1347_v49 = vadd.f32 %v1346_v47, %v1333_v46 }
 0x14a   : > { %v1388_v55 = vrot.slane %v1347_v49, 4 }
 0x14b   : > { %v1359_v50 = vpop.f32.mrf.mxu2 }
 0x14d   : > { %v1372_v51 = vpop.f32.mrf.mxu3  ;;  %v1335_v52 = vpop.f32.mrf.mxu0 }
 0x14e   : > { %v1373_v56 = vadd.f32 %v1372_v51, %v1359_v50 }
 0x14f   : > { %v1348_v57 = vpop.f32.mrf.mxu1 }
 0x150   : > { %v1389_v58 = vrot.slane %v1373_v56, 2 }
 0x152   : > { %v1397_v61 = vsel %vm1392_vm1, %v1388_v55, %v1389_v58  ;;  %1408 = sbr.rel (%p4400_p1) target bundleno = 886 (0x376), region = 80 }
 0x153   : > { %v1398_v62 = vsel %vm1394_vm2, %v1396_v60, %v1397_v61  ;;  %v1361_v0 = vpop.f32.mrf.mxu2 }
 0x154   : > { %v1402_v63 = vadd.f32 %v1398_v62, %v392_v59 }
 0x155   : > { %v1374_v1 = vpop.f32.mrf.mxu3 }
 0x156   : > { %1404 = vst [vmem:[#allocation2 + $0x8] sm:$0xff] %v1402_v63 }
 0x157   : > { %v4515_v2 = vld [vmem:[#allocation8 + $0xe0] sm:$0xf]  ;;  %v5717_v3 = vld [vmem:[#allocation8 + $0xec] sm:$0xf0] }
 0x158   : > { %v4643_v4 = vld [vmem:[#allocation8 + $0x1e0] sm:$0xf]  ;;  %v4516_v5 = vor.u32 %v5717_v3, %v4515_v2  ;;  %v5749_v6 = vld [vmem:[#allocation8 + $0x1ec] sm:$0xf0] }
 0x159   : > { %v4771_v7 = vld [vmem:[#allocation8 + $0x2e0] sm:$0xf]  ;;  %v5781_v8 = vld [vmem:[#allocation8 + $0x2ec] sm:$0xf0]  ;;  %v4644_v9 = vor.u32 %v5749_v6, %v4643_v4 }
 0x15a   : > { %v4772_v10 = vor.u32 %v5781_v8, %v4771_v7  ;;  %v4899_v11 = vld [vmem:[#allocation8 + $0x3e0] sm:$0xf]  ;;  %v5813_v12 = vld [vmem:[#allocation8 + $0x3ec] sm:$0xf0]  ;;  %3014 = vmatpush.bf16.msra.mxu0 %v4516_v5 }
 0x15b   : > { %v4499_v13 = vld [vmem:[#allocation8 + $0xc0] sm:$0xf]  ;;  %v4900_v15 = vor.u32 %v5813_v12, %v4899_v11  ;;  %v5713_v17 = vld [vmem:[#allocation8 + $0xcc] sm:$0xf0]  ;;  %3027 = vmatpush.bf16.msra.mxu1 %v4644_v9 }
 0x15c   : > { %v4627_v18 = vld [vmem:[#allocation8 + $0x1c0] sm:$0xf]  ;;  %v5745_v19 = vld [vmem:[#allocation8 + $0x1cc] sm:$0xf0]  ;;  %3040 = vmatpush.bf16.msra.mxu2 %v4772_v10  ;;  %v4500_v20 = vor.u32 %v5713_v17, %v4499_v13 }
 0x15d   : > { %v4628_v21 = vor.u32 %v5745_v19, %v4627_v18  ;;  %v4755_v22 = vld [vmem:[#allocation8 + $0x2c0] sm:$0xf]  ;;  %v5777_v23 = vld [vmem:[#allocation8 + $0x2cc] sm:$0xf0]  ;;  %3053 = vmatpush.bf16.msra.mxu3 %v4900_v15 }
 0x15e   : > { %v4883_v24 = vld [vmem:[#allocation8 + $0x3c0] sm:$0xf]  ;;  %v4756_v25 = vor.u32 %v5777_v23, %v4755_v22  ;;  %v5809_v26 = vld [vmem:[#allocation8 + $0x3cc] sm:$0xf0]  ;;  %3015 = vmatpush.bf16.msra.mxu0 %v4500_v20 }
 0x15f   : > { %v4483_v27 = vld [vmem:[#allocation8 + $0xa0] sm:$0xf]  ;;  %v5709_v28 = vld [vmem:[#allocation8 + $0xac] sm:$0xf0]  ;;  %v4884_v14 = vor.u32 %v5809_v26, %v4883_v24  ;;  %3028 = vmatpush.bf16.msra.mxu1 %v4628_v21 }
 0x160   : > { %v4611_v16 = vld [vmem:[#allocation8 + $0x1a0] sm:$0xf]  ;;  %v5741_v29 = vld [vmem:[#allocation8 + $0x1ac] sm:$0xf0]  ;;  %v4484_v31 = vor.u32 %v5709_v28, %v4483_v27  ;;  %3041 = vmatpush.bf16.msra.mxu2 %v4756_v25 }
 0x161   : > { %v4739_v30 = vld [vmem:[#allocation8 + $0x2a0] sm:$0xf]  ;;  %v5773_v32 = vld [vmem:[#allocation8 + $0x2ac] sm:$0xf0]  ;;  %v4612_v35 = vor.u32 %v5741_v29, %v4611_v16  ;;  %3054 = vmatpush.bf16.msra.mxu3 %v4884_v14 }
 0x162   : > { %v4867_v33 = vld [vmem:[#allocation8 + $0x3a0] sm:$0xf]  ;;  %v5805_v34 = vld [vmem:[#allocation8 + $0x3ac] sm:$0xf0]  ;;  %v4740_v36 = vor.u32 %v5773_v32, %v4739_v30  ;;  %3016 = vmatpush.bf16.msra.mxu0 %v4484_v31 }
 0x163   : > { %v4467_v37 = vld [vmem:[#allocation8 + $0x80] sm:$0xf]  ;;  %v5705_v38 = vld [vmem:[#allocation8 + $0x8c] sm:$0xf0]  ;;  %v4868_v40 = vor.u32 %v5805_v34, %v4867_v33  ;;  %3029 = vmatpush.bf16.msra.mxu1 %v4612_v35 }
 0x164   : > { %v4595_v39 = vld [vmem:[#allocation8 + $0x180] sm:$0xf]  ;;  %v5737_v41 = vld [vmem:[#allocation8 + $0x18c] sm:$0xf0]  ;;  %v4468_v46 = vor.u32 %v5705_v38, %v4467_v37  ;;  %3042 = vmatpush.bf16.msra.mxu2 %v4740_v36 }
 0x165   : > { %v4723_v42 = vld [vmem:[#allocation8 + $0x280] sm:$0xf]  ;;  %v5769_v43 = vld [vmem:[#allocation8 + $0x28c] sm:$0xf0]  ;;  %v4596_v47 = vor.u32 %v5737_v41, %v4595_v39  ;;  %3055 = vmatpush.bf16.msra.mxu3 %v4868_v40 }
 0x166   : > { %v4851_v44 = vld [vmem:[#allocation8 + $0x380] sm:$0xf]  ;;  %v5801_v45 = vld [vmem:[#allocation8 + $0x38c] sm:$0xf0]  ;;  %v4724_v48 = vor.u32 %v5769_v43, %v4723_v42  ;;  %3017 = vmatpush.bf16.msra.mxu0 %v4468_v46 }
 0x167   : > { %v4451_v49 = vld [vmem:[#allocation8 + $0x60] sm:$0xf]  ;;  %v5701_v50 = vld [vmem:[#allocation8 + $0x6c] sm:$0xf0]  ;;  %v4852_v52 = vor.u32 %v5801_v45, %v4851_v44  ;;  %3030 = vmatpush.bf16.msra.mxu1 %v4596_v47 }
 0x168   : > { %v4579_v51 = vld [vmem:[#allocation8 + $0x160] sm:$0xf]  ;;  %v5733_v53 = vld [vmem:[#allocation8 + $0x16c] sm:$0xf0]  ;;  %v4452_v58 = vor.u32 %v5701_v50, %v4451_v49  ;;  %3043 = vmatpush.bf16.msra.mxu2 %v4724_v48 }
 0x169   : > { %v4707_v54 = vld [vmem:[#allocation8 + $0x260] sm:$0xf]  ;;  %v5765_v55 = vld [vmem:[#allocation8 + $0x26c] sm:$0xf0]  ;;  %v4580_v59 = vor.u32 %v5733_v53, %v4579_v51  ;;  %3056 = vmatpush.bf16.msra.mxu3 %v4852_v52 }
 0x16a   : > { %v4835_v56 = vld [vmem:[#allocation8 + $0x360] sm:$0xf]  ;;  %v5797_v57 = vld [vmem:[#allocation8 + $0x36c] sm:$0xf0]  ;;  %v4708_v60 = vor.u32 %v5765_v55, %v4707_v54  ;;  %3018 = vmatpush.bf16.msra.mxu0 %v4452_v58 }
 0x16b   : > { %v4435_v61 = vld [vmem:[#allocation8 + $0x40] sm:$0xf]  ;;  %v5697_v62 = vld [vmem:[#allocation8 + $0x4c] sm:$0xf0]  ;;  %v4836_v0 = vor.u32 %v5797_v57, %v4835_v56  ;;  %3031 = vmatpush.bf16.msra.mxu1 %v4580_v59 }
 0x16c   : > { %v4563_v63 = vld [vmem:[#allocation8 + $0x140] sm:$0xf]  ;;  %v5729_v1 = vld [vmem:[#allocation8 + $0x14c] sm:$0xf0]  ;;  %v4436_v6 = vor.u32 %v5697_v62, %v4435_v61  ;;  %3044 = vmatpush.bf16.msra.mxu2 %v4708_v60 }
 0x16d   : > { %v4691_v2 = vld [vmem:[#allocation8 + $0x240] sm:$0xf]  ;;  %v5761_v3 = vld [vmem:[#allocation8 + $0x24c] sm:$0xf0]  ;;  %v4564_v7 = vor.u32 %v5729_v1, %v4563_v63  ;;  %3057 = vmatpush.bf16.msra.mxu3 %v4836_v0 }
 0x16e   : > { %v4819_v4 = vld [vmem:[#allocation8 + $0x340] sm:$0xf]  ;;  %v5793_v5 = vld [vmem:[#allocation8 + $0x34c] sm:$0xf0]  ;;  %v4692_v8 = vor.u32 %v5761_v3, %v4691_v2  ;;  %3019 = vmatpush.bf16.msra.mxu0 %v4436_v6 }
 0x16f   : > { %v4419_v9 = vld [vmem:[#allocation8 + $0x20] sm:$0xf]  ;;  %v5693_v10 = vld [vmem:[#allocation8 + $0x2c] sm:$0xf0]  ;;  %v4820_v12 = vor.u32 %v5793_v5, %v4819_v4  ;;  %3032 = vmatpush.bf16.msra.mxu1 %v4564_v7  ;;  %v6815_v7 = vld [vmem:[#allocation6] sm:$0xff] }
 0x170   : > { %v4547_v11 = vld [vmem:[#allocation8 + $0x120] sm:$0xf]  ;;  %v5725_v13 = vld [vmem:[#allocation8 + $0x12c] sm:$0xf0]  ;;  %v4420_v20 = vor.u32 %v5693_v10, %v4419_v9  ;;  %3045 = vmatpush.bf16.msra.mxu2 %v4692_v8  ;;  %v1413_v10 = vperm.slane %v6815_v7, 0 }
 0x171   : > { %v4675_v15 = vld [vmem:[#allocation8 + $0x220] sm:$0xf]  ;;  %v5757_v17 = vld [vmem:[#allocation8 + $0x22c] sm:$0xf0]  ;;  %v4548_v23 = vor.u32 %v5725_v13, %v4547_v11  ;;  %3058 = vmatpush.bf16.msra.mxu3 %v4820_v12  ;;  %v1414_v11 = vperm.slane %v6815_v7, 1  ;;  %v1415_v12 = vperm.slane %v6815_v7, 2 }
 0x172   : > { %v4803_v18 = vld [vmem:[#allocation8 + $0x320] sm:$0xf]  ;;  %v5789_v19 = vld [vmem:[#allocation8 + $0x32c] sm:$0xf0]  ;;  %v4676_v24 = vor.u32 %v5757_v17, %v4675_v15  ;;  %3020 = vmatpush.bf16.msra.mxu0 %v4420_v20 }
 0x173   : > { %v4403_v21 = vld [vmem:[#allocation8] sm:$0xf]  ;;  %v5689_v22 = vld [vmem:[#allocation8 + $0xc] sm:$0xf0]  ;;  %v4804_v28 = vor.u32 %v5789_v19, %v4803_v18  ;;  %3033 = vmatpush.bf16.msra.mxu1 %v4548_v23  ;;  %v1416_v18 = vperm.slane %v6815_v7, 3 }
 0x174   : > { %v4531_v25 = vld [vmem:[#allocation8 + $0x100] sm:$0xf]  ;;  %v5721_v26 = vld [vmem:[#allocation8 + $0x10c] sm:$0xf0]  ;;  %v4404_v33 = vor.u32 %v5689_v22, %v4403_v21  ;;  %3046 = vmatpush.bf16.msra.mxu2 %v4676_v24  ;;  %v1421_v21 = vrot.slane %v1414_v11, 6  ;;  %v1422_v22 = vrot.slane %v1415_v12, 4 }
 0x175   : > { %v4659_v27 = vld [vmem:[#allocation8 + $0x200] sm:$0xf]  ;;  %v5753_v14 = vld [vmem:[#allocation8 + $0x20c] sm:$0xf0]  ;;  %v4532_v37 = vor.u32 %v5721_v26, %v4531_v25  ;;  %3059 = vmatpush.bf16.msra.mxu3 %v4804_v28  ;;  %v1423_v25 = vrot.slane %v1416_v18, 2 }
 0x176   : > { %v4787_v16 = vld [vmem:[#allocation8 + $0x300] sm:$0xf]  ;;  %v5785_v29 = vld [vmem:[#allocation8 + $0x30c] sm:$0xf0]  ;;  %v4660_v38 = vor.u32 %v5753_v14, %v4659_v27  ;;  %3021 = vmatpush.bf16.msra.mxu0 %v4404_v33 }
 0x177   : > { %v5027_v30 = vld [vmem:[#allocation8 + $0x4e0] sm:$0xf]  ;;  %v5845_v31 = vld [vmem:[#allocation8 + $0x4ec] sm:$0xf0]  ;;  %v4788_v41 = vor.u32 %v5785_v29, %v4787_v16  ;;  %3034 = vmatpush.bf16.msra.mxu1 %v4532_v37  ;;  %v1409_v16 = vld [vmem:[#allocation2] sm:$0xff]  ;;  %v1427_v29 = vsel %vm1390_vm0, %v1413_v10, %v1421_v21 }
 0x178   : > { %v5155_v32 = vld [vmem:[#allocation8 + $0x5e0] sm:$0xf]  ;;  %v5877_v34 = vld [vmem:[#allocation8 + $0x5ec] sm:$0xf0]  ;;  %v5028_v42 = vor.u32 %v5845_v31, %v5027_v30  ;;  %3047 = vmatpush.bf16.msra.mxu2 %v4660_v38  ;;  %v5715_v21 = vld [vmem:[#allocation8 + $0xe4] sm:$0xf] }
 0x179   : > { %v5283_v35 = vld [vmem:[#allocation8 + $0x6e0] sm:$0xf]  ;;  %v5909_v36 = vld [vmem:[#allocation8 + $0x6ec] sm:$0xf0]  ;;  %v5156_v43 = vor.u32 %v5877_v34, %v5155_v32  ;;  %3060 = vmatpush.bf16.msra.mxu3 %v4788_v41  ;;  %v1428_v34 = vsel %vm1392_vm1, %v1422_v22, %v1423_v25  ;;  %v4517_v22 = vld [vmem:[#allocation8 + $0xf0] sm:$0xf0] }
 0x17a   : > { %v5411_v39 = vld [vmem:[#allocation8 + $0x7e0] sm:$0xf]  ;;  %v5941_v40 = vld [vmem:[#allocation8 + $0x7ec] sm:$0xf0]  ;;  %v5284_v44 = vor.u32 %v5909_v36, %v5283_v35  ;;  %3066 = vmatpush.bf16.msrb.mxu0 %v5028_v42  ;;  %v1429_v37 = vsel %vm1394_vm2, %v1427_v29, %v1428_v34  ;;  %v4773_v25 = vld [vmem:[#allocation8 + $0x2f0] sm:$0xf0] }
 0x17b   : > { %v5011_v45 = vld [vmem:[#allocation8 + $0x4c0] sm:$0xf]  ;;  %v5841_v46 = vld [vmem:[#allocation8 + $0x4cc] sm:$0xf0]  ;;  %v5412_v48 = vor.u32 %v5941_v40, %v5411_v39  ;;  %3079 = vmatpush.bf16.msrb.mxu1 %v5156_v43  ;;  %v1435_v42 = vadd.f32 %v1429_v37, %v1409_v16 }
 0x17c   : > { %v5139_v47 = vld [vmem:[#allocation8 + $0x5c0] sm:$0xf]  ;;  %v5873_v49 = vld [vmem:[#allocation8 + $0x5cc] sm:$0xf0]  ;;  %v5012_v54 = vor.u32 %v5841_v46, %v5011_v45  ;;  %3092 = vmatpush.bf16.msrb.mxu2 %v5284_v44 }
 0x17d   : > { %v5267_v50 = vld [vmem:[#allocation8 + $0x6c0] sm:$0xf]  ;;  %v5905_v51 = vld [vmem:[#allocation8 + $0x6cc] sm:$0xf0]  ;;  %v5140_v56 = vor.u32 %v5873_v49, %v5139_v47  ;;  %3105 = vmatpush.bf16.msrb.mxu3 %v5412_v48 }
 0x17e   : > { %v5395_v52 = vld [vmem:[#allocation8 + $0x7c0] sm:$0xf]  ;;  %v5937_v53 = vld [vmem:[#allocation8 + $0x7cc] sm:$0xf0]  ;;  %v5268_v57 = vor.u32 %v5905_v51, %v5267_v50  ;;  %3067 = vmatpush.bf16.msrb.mxu0 %v5012_v54  ;;  %v1437_v51 = vmax.f32 %v1435_v42, 0.0  ;;  %v4520_v42 = vor.u32 %v5715_v21, %v4517_v22 }
 0x17f   : > { %v4995_v55 = vld [vmem:[#allocation8 + $0x4a0] sm:$0xf]  ;;  %v5837_v58 = vld [vmem:[#allocation8 + $0x4ac] sm:$0xf0]  ;;  %v5396_v61 = vor.u32 %v5937_v53, %v5395_v52  ;;  %3080 = vmatpush.bf16.msrb.mxu1 %v5140_v56  ;;  %v1418_v52 = vperm.slane %v6815_v7, 5 }
 0x180   : > { %v5123_v59 = vld [vmem:[#allocation8 + $0x5a0] sm:$0xf]  ;;  %v5869_v60 = vld [vmem:[#allocation8 + $0x5ac] sm:$0xf0]  ;;  %v4996_v3 = vor.u32 %v5837_v58, %v4995_v55  ;;  %3093 = vmatpush.bf16.msrb.mxu2 %v5268_v57  ;;  %v1419_v55 = vperm.slane %v6815_v7, 6  ;;  %v1417_v58 = vperm.slane %v6815_v7, 4 }
 0x181   : > { %v5251_v62 = vld [vmem:[#allocation8 + $0x6a0] sm:$0xf]  ;;  %v5901_v63 = vld [vmem:[#allocation8 + $0x6ac] sm:$0xf0]  ;;  %v5124_v4 = vor.u32 %v5869_v60, %v5123_v59  ;;  %3106 = vmatpush.bf16.msrb.mxu3 %v5396_v61  ;;  %1441 = vst [vmem:[#allocation1] ss:$4 sm:$0xff] %v1437_v51 }
 0x182   : > { %v5379_v0 = vld [vmem:[#allocation8 + $0x7a0] sm:$0xf]  ;;  %v5933_v1 = vld [vmem:[#allocation8 + $0x7ac] sm:$0xf0]  ;;  %v5252_v8 = vor.u32 %v5901_v63, %v5251_v62  ;;  %3068 = vmatpush.bf16.msrb.mxu0 %v4996_v3  ;;  %v1425_v10 = vrot.slane %v1419_v55, 4 }
 0x183   : > { %v4979_v2 = vld [vmem:[#allocation8 + $0x480] sm:$0xf]  ;;  %v5833_v5 = vld [vmem:[#allocation8 + $0x48c] sm:$0xf0]  ;;  %v5380_v13 = vor.u32 %v5933_v1, %v5379_v0  ;;  %3081 = vmatpush.bf16.msrb.mxu1 %v5124_v4 }
 0x184   : > { %v5107_v6 = vld [vmem:[#allocation8 + $0x580] sm:$0xf]  ;;  %v5865_v9 = vld [vmem:[#allocation8 + $0x58c] sm:$0xf0]  ;;  %v4980_v23 = vor.u32 %v5833_v5, %v4979_v2  ;;  %3094 = vmatpush.bf16.msrb.mxu2 %v5252_v8  ;;  %v1420_v5 = vperm.slane %v6815_v7, 7 }
 0x185   : > { %v5235_v15 = vld [vmem:[#allocation8 + $0x680] sm:$0xf]  ;;  %v5897_v17 = vld [vmem:[#allocation8 + $0x68c] sm:$0xf0]  ;;  %v5108_v26 = vor.u32 %v5865_v9, %v5107_v6  ;;  %3107 = vmatpush.bf16.msrb.mxu3 %v5380_v13  ;;  %v1424_v6 = vrot.slane %v1418_v52, 6 }
 0x186   : > { %v5363_v19 = vld [vmem:[#allocation8 + $0x780] sm:$0xf]  ;;  %v5929_v20 = vld [vmem:[#allocation8 + $0x78c] sm:$0xf0]  ;;  %v5236_v27 = vor.u32 %v5897_v17, %v5235_v15  ;;  %3069 = vmatpush.bf16.msrb.mxu0 %v4980_v23  ;;  %v1426_v17 = vrot.slane %v1420_v5, 2 }
 0x187   : > { %v4963_v24 = vld [vmem:[#allocation8 + $0x460] sm:$0xf]  ;;  %v5829_v28 = vld [vmem:[#allocation8 + $0x46c] sm:$0xf0]  ;;  %v5364_v30 = vor.u32 %v5929_v20, %v5363_v19  ;;  %3082 = vmatpush.bf16.msrb.mxu1 %v5108_v26  ;;  %v1430_v18 = vsel %vm1390_vm0, %v1417_v58, %v1424_v6  ;;  %v5747_v23 = vld [vmem:[#allocation8 + $0x1e4] sm:$0xf] }
 0x188   : > { %v5091_v14 = vld [vmem:[#allocation8 + $0x560] sm:$0xf]  ;;  %v5861_v31 = vld [vmem:[#allocation8 + $0x56c] sm:$0xf0]  ;;  %v4964_v38 = vor.u32 %v5829_v28, %v4963_v24  ;;  %3095 = vmatpush.bf16.msrb.mxu2 %v5236_v27  ;;  %v4645_v7 = vld [vmem:[#allocation8 + $0x1f0] sm:$0xf0]  ;;  %v1431_v26 = vsel %vm1392_vm1, %v1425_v10, %v1426_v17 }
 0x189   : > { %v5219_v32 = vld [vmem:[#allocation8 + $0x660] sm:$0xf]  ;;  %v5893_v33 = vld [vmem:[#allocation8 + $0x66c] sm:$0xf0]  ;;  %v5092_v43 = vor.u32 %v5861_v31, %v5091_v14  ;;  %3108 = vmatpush.bf16.msrb.mxu3 %v5364_v30  ;;  %v5779_v24 = vld [vmem:[#allocation8 + $0x2e4] sm:$0xf]  ;;  %v1432_v29 = vsel %vm1394_vm2, %v1430_v18, %v1431_v26 }
 0x18a   : > { %v5347_v35 = vld [vmem:[#allocation8 + $0x760] sm:$0xf]  ;;  %v5925_v36 = vld [vmem:[#allocation8 + $0x76c] sm:$0xf0]  ;;  %v5220_v44 = vor.u32 %v5893_v33, %v5219_v32  ;;  %3070 = vmatpush.bf16.msrb.mxu0 %v4964_v38  ;;  %v5775_v52 = vld [vmem:[#allocation8 + $0x2c4] sm:$0xf] }
 0x18b   : > { %v4947_v39 = vld [vmem:[#allocation8 + $0x440] sm:$0xf]  ;;  %v5825_v40 = vld [vmem:[#allocation8 + $0x44c] sm:$0xf0]  ;;  %v5348_v48 = vor.u32 %v5925_v36, %v5347_v35  ;;  %3083 = vmatpush.bf16.msrb.mxu1 %v5092_v43  ;;  %v4648_v43 = vor.u32 %v5747_v23, %v4645_v7  ;;  %v4885_v58 = vld [vmem:[#allocation8 + $0x3d0] sm:$0xf0] }
 0x18c   : > { %v5075_v41 = vld [vmem:[#allocation8 + $0x540] sm:$0xf]  ;;  %v5857_v45 = vld [vmem:[#allocation8 + $0x54c] sm:$0xf0]  ;;  %v4948_v56 = vor.u32 %v5825_v40, %v4947_v39  ;;  %3096 = vmatpush.bf16.msrb.mxu2 %v5220_v44  ;;  %v4901_v44 = vld [vmem:[#allocation8 + $0x3f0] sm:$0xf0] }
 0x18d   : > { %v5203_v46 = vld [vmem:[#allocation8 + $0x640] sm:$0xf]  ;;  %v5889_v47 = vld [vmem:[#allocation8 + $0x64c] sm:$0xf0]  ;;  %v5076_v59 = vor.u32 %v5857_v45, %v5075_v41  ;;  %3109 = vmatpush.bf16.msrb.mxu3 %v5348_v48  ;;  %v5811_v41 = vld [vmem:[#allocation8 + $0x3e4] sm:$0xf] }
 0x18e   : > { %v5331_v49 = vld [vmem:[#allocation8 + $0x740] sm:$0xf]  ;;  %v5921_v50 = vld [vmem:[#allocation8 + $0x74c] sm:$0xf0]  ;;  %v5204_v60 = vor.u32 %v5889_v47, %v5203_v46  ;;  %3071 = vmatpush.bf16.msrb.mxu0 %v4948_v56  ;;  %v5711_v45 = vld [vmem:[#allocation8 + $0xc4] sm:$0xf]  ;;  %v4776_v47 = vor.u32 %v5779_v24, %v4773_v25 }
 0x18f   : > { %v4931_v53 = vld [vmem:[#allocation8 + $0x420] sm:$0xf]  ;;  %v5821_v54 = vld [vmem:[#allocation8 + $0x42c] sm:$0xf0]  ;;  %v5332_v0 = vor.u32 %v5921_v50, %v5331_v49  ;;  %3084 = vmatpush.bf16.msrb.mxu1 %v5076_v59  ;;  %v4501_v48 = vld [vmem:[#allocation8 + $0xd0] sm:$0xf0] }
 0x190   : > { %v5059_v57 = vld [vmem:[#allocation8 + $0x520] sm:$0xf]  ;;  %v5853_v61 = vld [vmem:[#allocation8 + $0x52c] sm:$0xf0]  ;;  %v4932_v11 = vor.u32 %v5821_v54, %v4931_v53  ;;  %3097 = vmatpush.bf16.msrb.mxu2 %v5204_v60  ;;  %v5743_v49 = vld [vmem:[#allocation8 + $0x1c4] sm:$0xf]  ;;  %v4904_v54 = vor.u32 %v5811_v41, %v4901_v44  ;;  %v4504_v55 = vor.u32 %v5711_v45, %v4501_v48 }
 0x191   : > { %v5187_v62 = vld [vmem:[#allocation8 + $0x620] sm:$0xf]  ;;  %v5885_v63 = vld [vmem:[#allocation8 + $0x62c] sm:$0xf0]  ;;  %v5060_v19 = vor.u32 %v5853_v61, %v5059_v57  ;;  %3110 = vmatpush.bf16.msrb.mxu3 %v5332_v0  ;;  %v4629_v50 = vld [vmem:[#allocation8 + $0x1d0] sm:$0xf0] }
 0x192   : > { %v5315_v1 = vld [vmem:[#allocation8 + $0x720] sm:$0xf]  ;;  %v5917_v2 = vld [vmem:[#allocation8 + $0x72c] sm:$0xf0]  ;;  %v5188_v20 = vor.u32 %v5885_v63, %v5187_v62  ;;  %3072 = vmatpush.bf16.msrb.mxu0 %v4932_v11  ;;  %v4757_v53 = vld [vmem:[#allocation8 + $0x2d0] sm:$0xf0]  ;;  %v4632_v56 = vor.u32 %v5743_v49, %v4629_v50 }
 0x193   : > { %v4915_v3 = vld [vmem:[#allocation8 + $0x400] sm:$0xf]  ;;  %v5817_v4 = vld [vmem:[#allocation8 + $0x40c] sm:$0xf0]  ;;  %v5316_v14 = vor.u32 %v5917_v2, %v5315_v1  ;;  %3085 = vmatpush.bf16.msrb.mxu1 %v5060_v19  ;;  %v5807_v57 = vld [vmem:[#allocation8 + $0x3c4] sm:$0xf]  ;;  %v4760_v60 = vor.u32 %v5775_v52, %v4757_v53 }
 0x194   : > { %v5043_v8 = vld [vmem:[#allocation8 + $0x500] sm:$0xf]  ;;  %v5849_v9 = vld [vmem:[#allocation8 + $0x50c] sm:$0xf0]  ;;  %v4916_v16 = vor.u32 %v5817_v4, %v4915_v3  ;;  %3098 = vmatpush.bf16.msrb.mxu2 %v5188_v20  ;;  %v5707_v59 = vld [vmem:[#allocation8 + $0xa4] sm:$0xf]  ;;  %v4888_v2 = vor.u32 %v5807_v57, %v4885_v58 }
 0x195   : > { %v5171_v12 = vld [vmem:[#allocation8 + $0x600] sm:$0xf]  ;;  %v5881_v13 = vld [vmem:[#allocation8 + $0x60c] sm:$0xf0]  ;;  %v5044_v34 = vor.u32 %v5849_v9, %v5043_v8  ;;  %3111 = vmatpush.bf16.msrb.mxu3 %v5316_v14  ;;  %v4485_v61 = vld [vmem:[#allocation8 + $0xb0] sm:$0xf0] }
 0x196   : > { %v1410_v15 = vld [vmem:[#allocation2 + $0x8] sm:$0xff]  ;;  %v1444_v28 = vld.sshfl [vmem:[#allocation1] sm:$0xff pattern:$0x73625140]  ;;  %v5172_v38 = vor.u32 %v5881_v13, %v5171_v12  ;;  %3073 = vmatpush.bf16.msrb.mxu0 %v4916_v16  ;;  %v4488_v3 = vor.u32 %v5707_v59, %v4485_v61 }
 0x197   : > { %v1446_v27 = vld.sshfl [vmem:[#allocation1 + $0x10] sm:$0xff pattern:$0x73625140]  ;;  %v6833_v31 = vpack.c.bf16 %v1444_v28, %v1444_v28  ;;  %v1447_v32 = vld.sshfl [vmem:[#allocation1 + $0x18] sm:$0xff pattern:$0x73625140]  ;;  %v1436_v35 = vadd.f32 %v1432_v29, %v1410_v15  ;;  %3086 = vmatpush.bf16.msrb.mxu1 %v5044_v34 }
 0x198   : > { %v6831_v30 = vpack.c.bf16 %v1446_v27, %v1446_v27  ;;  %v1445_v33 = vld.sshfl [vmem:[#allocation1 + $0x8] sm:$0xff pattern:$0x73625140]  ;;  %v6835_v36 = vpack.c.bf16 %v1447_v32, %v1447_v32  ;;  %v5299_v39 = vld [vmem:[#allocation8 + $0x700] sm:$0xf]  ;;  %3099 = vmatpush.bf16.msrb.mxu2 %v5172_v38 }
 0x199   : > { %v6837_v37 = vpack.c.bf16 %v1445_v33, %v1445_v33  ;;  %v5913_v40 = vld [vmem:[#allocation8 + $0x70c] sm:$0xf0]  ;;  %3022 = vmatmul.bf16.vlgmr.msra.gmra.mxu0 %v6833_v31  ;;  %v1438_v46 = vmax.f32 %v1436_v35, 0.0  ;;  %v5739_v62 = vld [vmem:[#allocation8 + $0x1a4] sm:$0xf] }
 0x19a   : > { %3048 = vmatmul.bf16.vlgmr.msra.gmra.mxu2 %v6831_v30  ;;  %3061 = vmatmul.bf16.vlgmr.msra.gmra.mxu3 %v6835_v36  ;;  %v5300_v51 = vor.u32 %v5913_v40, %v5299_v39  ;;  %v4613_v63 = vld [vmem:[#allocation8 + $0x1b0] sm:$0xf0]  ;;  %v5771_v0 = vld [vmem:[#allocation8 + $0x2a4] sm:$0xf] }
 0x19b   : > { %3035 = vmatmul.bf16.vlgmr.msra.gmra.mxu1 %v6837_v37  ;;  %1443 = vst [vmem:[#allocation1 + $0x20] ss:$4 sm:$0xff] %v1438_v46  ;;  %3118 = vmatpush.bf16.msra.mxu0 %v4520_v42  ;;  %v4741_v1 = vld [vmem:[#allocation8 + $0x2b0] sm:$0xf0]  ;;  %v4616_v4 = vor.u32 %v5739_v62, %v4613_v63  ;;  %v5803_v5 = vld [vmem:[#allocation8 + $0x3a4] sm:$0xf] }
 0x19c   : > { %3131 = vmatpush.bf16.msra.mxu1 %v4648_v43  ;;  %3144 = vmatpush.bf16.msra.mxu2 %v4776_v47  ;;  %v4869_v6 = vld [vmem:[#allocation8 + $0x3b0] sm:$0xf0]  ;;  %v4744_v9 = vor.u32 %v5771_v0, %v4741_v1  ;;  %v5703_v11 = vld [vmem:[#allocation8 + $0x84] sm:$0xf] }
 0x19d   : > { %3112 = vmatpush.bf16.msrb.mxu3 %v5300_v51  ;;  %v4469_v12 = vld [vmem:[#allocation8 + $0x90] sm:$0xf0]  ;;  %v4872_v17 = vor.u32 %v5803_v5, %v4869_v6  ;;  %v5735_v18 = vld [vmem:[#allocation8 + $0x184] sm:$0xf] }
 0x19e   : > { %v4597_v19 = vld [vmem:[#allocation8 + $0x190] sm:$0xf0]  ;;  %v5767_v20 = vld [vmem:[#allocation8 + $0x284] sm:$0xf]  ;;  %v4472_v27 = vor.u32 %v5703_v11, %v4469_v12 }
 0x19f   : > { %3119 = vmatpush.bf16.msra.mxu0 %v4504_v55  ;;  %v4725_v23 = vld [vmem:[#allocation8 + $0x290] sm:$0xf0]  ;;  %v5799_v7 = vld [vmem:[#allocation8 + $0x384] sm:$0xf]  ;;  %v4600_v28 = vor.u32 %v5735_v18, %v4597_v19 }
 0x1a0   : > { %3132 = vmatpush.bf16.msra.mxu1 %v4632_v56  ;;  %3145 = vmatpush.bf16.msra.mxu2 %v4760_v60  ;;  %v4853_v24 = vld [vmem:[#allocation8 + $0x390] sm:$0xf0]  ;;  %v5699_v14 = vld [vmem:[#allocation8 + $0x64] sm:$0xf]  ;;  %v4728_v29 = vor.u32 %v5767_v20, %v4725_v23 }
 0x1a1   : > { %3157 = vmatpush.bf16.msra.mxu3 %v4904_v54  ;;  %v4453_v16 = vld [vmem:[#allocation8 + $0x70] sm:$0xf0]  ;;  %v4856_v32 = vor.u32 %v5799_v7, %v4853_v24  ;;  %v5731_v33 = vld [vmem:[#allocation8 + $0x164] sm:$0xf] }
 0x1a2   : > { %v1450_v8 = vld.sshfl [vmem:[#allocation1 + $0x30] sm:$0xff pattern:$0x73625140]  ;;  %v1448_v10 = vld.sshfl [vmem:[#allocation1 + $0x20] sm:$0xff pattern:$0x73625140]  ;;  %v4456_v41 = vor.u32 %v5699_v14, %v4453_v16 }
 0x1a3   : > { %v1451_v13 = vld.sshfl [vmem:[#allocation1 + $0x38] sm:$0xff pattern:$0x73625140]  ;;  %v1449_v15 = vld.sshfl [vmem:[#allocation1 + $0x28] sm:$0xff pattern:$0x73625140]  ;;  %v6843_v21 = vpack.c.bf16 %v1450_v8, %v1450_v8  ;;  %3120 = vmatpush.bf16.msra.mxu0 %v4488_v3  ;;  %v6845_v22 = vpack.c.bf16 %v1448_v10, %v1448_v10 }
 0x1a4   : > { %3133 = vmatpush.bf16.msra.mxu1 %v4616_v4  ;;  %3146 = vmatpush.bf16.msra.mxu2 %v4744_v9  ;;  %v6847_v25 = vpack.c.bf16 %v1451_v13, %v1451_v13  ;;  %v6849_v26 = vpack.c.bf16 %v1449_v15, %v1449_v15  ;;  %v4581_v34 = vld [vmem:[#allocation8 + $0x170] sm:$0xf0]  ;;  %v5763_v35 = vld [vmem:[#allocation8 + $0x264] sm:$0xf] }
 0x1a5   : > { %3158 = vmatpush.bf16.msra.mxu3 %v4888_v2  ;;  %v4709_v38 = vld [vmem:[#allocation8 + $0x270] sm:$0xf0]  ;;  %v5795_v39 = vld [vmem:[#allocation8 + $0x364] sm:$0xf]  ;;  %v4584_v42 = vor.u32 %v5731_v33, %v4581_v34 }
 0x1a6   : > { %v4837_v40 = vld [vmem:[#allocation8 + $0x370] sm:$0xf0]  ;;  %v5695_v43 = vld [vmem:[#allocation8 + $0x44] sm:$0xf]  ;;  %v4712_v45 = vor.u32 %v5763_v35, %v4709_v38 }
 0x1a7   : > { %3121 = vmatpush.bf16.msra.mxu0 %v4472_v27  ;;  %v4437_v44 = vld [vmem:[#allocation8 + $0x50] sm:$0xf0]  ;;  %v4840_v46 = vor.u32 %v5795_v39, %v4837_v40  ;;  %v5727_v47 = vld [vmem:[#allocation8 + $0x144] sm:$0xf] }
 0x1a8   : > { %3134 = vmatpush.bf16.msra.mxu1 %v4600_v28  ;;  %3147 = vmatpush.bf16.msra.mxu2 %v4728_v29  ;;  %v4565_v48 = vld [vmem:[#allocation8 + $0x150] sm:$0xf0]  ;;  %v5759_v49 = vld [vmem:[#allocation8 + $0x244] sm:$0xf]  ;;  %v4440_v53 = vor.u32 %v5695_v43, %v4437_v44 }
 0x1a9   : > { %3159 = vmatpush.bf16.msra.mxu3 %v4872_v17  ;;  %3074 = vmatmul.bf16.vlgmr.msrb.gmra.mxu0 %v6845_v22  ;;  %v4693_v50 = vld [vmem:[#allocation8 + $0x250] sm:$0xf0]  ;;  %v5791_v51 = vld [vmem:[#allocation8 + $0x344] sm:$0xf]  ;;  %v4568_v54 = vor.u32 %v5727_v47, %v4565_v48 }
 0x1aa   : > { %3100 = vmatmul.bf16.vlgmr.msrb.gmra.mxu2 %v6843_v21  ;;  %3113 = vmatmul.bf16.vlgmr.msrb.gmra.mxu3 %v6847_v25  ;;  %v4821_v52 = vld [vmem:[#allocation8 + $0x350] sm:$0xf0]  ;;  %v5691_v55 = vld [vmem:[#allocation8 + $0x24] sm:$0xf]  ;;  %v4696_v57 = vor.u32 %v5759_v49, %v4693_v50 }
 0x1ab   : > { %3087 = vmatmul.bf16.vlgmr.msrb.gmra.mxu1 %v6849_v26  ;;  %3122 = vmatpush.bf16.msra.mxu0 %v4456_v41  ;;  %v4421_v56 = vld [vmem:[#allocation8 + $0x30] sm:$0xf0]  ;;  %v4824_v58 = vor.u32 %v5791_v51, %v4821_v52  ;;  %v5723_v59 = vld [vmem:[#allocation8 + $0x124] sm:$0xf] }
 0x1ac   : > { %3135 = vmatpush.bf16.msra.mxu1 %v4584_v42  ;;  %3148 = vmatpush.bf16.msra.mxu2 %v4712_v45  ;;  %v4549_v60 = vld [vmem:[#allocation8 + $0x130] sm:$0xf0]  ;;  %v5755_v61 = vld [vmem:[#allocation8 + $0x224] sm:$0xf]  ;;  %v4424_v2 = vor.u32 %v5691_v55, %v4421_v56 }
 0x1ad   : > { %3160 = vmatpush.bf16.msra.mxu3 %v4856_v32  ;;  %v4677_v62 = vld [vmem:[#allocation8 + $0x230] sm:$0xf0]  ;;  %v5787_v63 = vld [vmem:[#allocation8 + $0x324] sm:$0xf]  ;;  %v4552_v3 = vor.u32 %v5723_v59, %v4549_v60 }
 0x1ae   : > { %v4805_v0 = vld [vmem:[#allocation8 + $0x330] sm:$0xf0]  ;;  %v5687_v1 = vld [vmem:[#allocation8 + $0x4] sm:$0xf]  ;;  %v4680_v8 = vor.u32 %v5755_v61, %v4677_v62 }
 0x1af   : > { %3123 = vmatpush.bf16.msra.mxu0 %v4440_v53  ;;  %v4405_v4 = vld [vmem:[#allocation8 + $0x10] sm:$0xf0]  ;;  %v5719_v5 = vld [vmem:[#allocation8 + $0x104] sm:$0xf]  ;;  %v4808_v9 = vor.u32 %v5787_v63, %v4805_v0 }
 0x1b0   : > { %3136 = vmatpush.bf16.msra.mxu1 %v4568_v54  ;;  %v4533_v6 = vld [vmem:[#allocation8 + $0x110] sm:$0xf0]  ;;  %3149 = vmatpush.bf16.msra.mxu2 %v4696_v57  ;;  %v5751_v10 = vld [vmem:[#allocation8 + $0x204] sm:$0xf]  ;;  %v4408_v23 = vor.u32 %v5687_v1, %v4405_v4 }
 0x1b1   : > { %3161 = vmatpush.bf16.msra.mxu3 %v4840_v46  ;;  %v4661_v11 = vld [vmem:[#allocation8 + $0x210] sm:$0xf0]  ;;  %v5783_v12 = vld [vmem:[#allocation8 + $0x304] sm:$0xf]  ;;  %v4536_v7 = vor.u32 %v5719_v5, %v4533_v6 }
 0x1b2   : > { %v4789_v13 = vld [vmem:[#allocation8 + $0x310] sm:$0xf0]  ;;  %v5843_v15 = vld [vmem:[#allocation8 + $0x4e4] sm:$0xf]  ;;  %v4664_v14 = vor.u32 %v5751_v10, %v4661_v11 }
 0x1b3   : > { %v5029_v17 = vld [vmem:[#allocation8 + $0x4f0] sm:$0xf0]  ;;  %v5875_v18 = vld [vmem:[#allocation8 + $0x5e4] sm:$0xf]  ;;  %3124 = vmatpush.bf16.msra.mxu0 %v4424_v2  ;;  %v4792_v16 = vor.u32 %v5783_v12, %v4789_v13 }
 0x1b4   : > { %v5157_v19 = vld [vmem:[#allocation8 + $0x5f0] sm:$0xf0]  ;;  %v5907_v20 = vld [vmem:[#allocation8 + $0x6e4] sm:$0xf]  ;;  %3137 = vmatpush.bf16.msra.mxu1 %v4552_v3  ;;  %3150 = vmatpush.bf16.msra.mxu2 %v4680_v8  ;;  %v5032_v29 = vor.u32 %v5843_v15, %v5029_v17 }
 0x1b5   : > { %3162 = vmatpush.bf16.msra.mxu3 %v4824_v58  ;;  %v5285_v24 = vld [vmem:[#allocation8 + $0x6f0] sm:$0xf0]  ;;  %v5939_v27 = vld [vmem:[#allocation8 + $0x7e4] sm:$0xf]  ;;  %v5160_v32 = vor.u32 %v5875_v18, %v5157_v19 }
 0x1b6   : > { %v5413_v28 = vld [vmem:[#allocation8 + $0x7f0] sm:$0xf0]  ;;  %v5839_v33 = vld [vmem:[#allocation8 + $0x4c4] sm:$0xf]  ;;  %v5288_v35 = vor.u32 %v5907_v20, %v5285_v24 }
 0x1b7   : > { %v5013_v34 = vld [vmem:[#allocation8 + $0x4d0] sm:$0xf0]  ;;  %v5416_v38 = vor.u32 %v5939_v27, %v5413_v28  ;;  %v5871_v39 = vld [vmem:[#allocation8 + $0x5c4] sm:$0xf]  ;;  %3125 = vmatpush.bf16.msra.mxu0 %v4408_v23 }
 0x1b8   : > { %v5141_v40 = vld [vmem:[#allocation8 + $0x5d0] sm:$0xf0]  ;;  %v5903_v41 = vld [vmem:[#allocation8 + $0x6c4] sm:$0xf]  ;;  %3138 = vmatpush.bf16.msra.mxu1 %v4536_v7  ;;  %3151 = vmatpush.bf16.msra.mxu2 %v4664_v14  ;;  %v5016_v45 = vor.u32 %v5839_v33, %v5013_v34 }
 0x1b9   : > { %3163 = vmatpush.bf16.msra.mxu3 %v4808_v9  ;;  %v5269_v42 = vld [vmem:[#allocation8 + $0x6d0] sm:$0xf0]  ;;  %v5935_v43 = vld [vmem:[#allocation8 + $0x7c4] sm:$0xf]  ;;  %v5144_v46 = vor.u32 %v5871_v39, %v5141_v40 }
 0x1ba   : > { %v5397_v44 = vld [vmem:[#allocation8 + $0x7d0] sm:$0xf0]  ;;  %v5835_v47 = vld [vmem:[#allocation8 + $0x4a4] sm:$0xf]  ;;  %v5272_v49 = vor.u32 %v5903_v41, %v5269_v42  ;;  %3126 = vmatmul.bf16.vlgmr.msra.gmra.mxu0 %v6833_v31 }
 0x1bb   : > { %3170 = vmatpush.bf16.msrb.mxu0 %v5032_v29  ;;  %v4997_v48 = vld [vmem:[#allocation8 + $0x4b0] sm:$0xf0]  ;;  %v5400_v50 = vor.u32 %v5935_v43, %v5397_v44  ;;  %v5867_v51 = vld [vmem:[#allocation8 + $0x5a4] sm:$0xf]  ;;  %3152 = vmatmul.bf16.vlgmr.msra.gmra.mxu2 %v6831_v30 }
 0x1bc   : > { %3183 = vmatpush.bf16.msrb.mxu1 %v5160_v32  ;;  %3196 = vmatpush.bf16.msrb.mxu2 %v5288_v35  ;;  %v5125_v52 = vld [vmem:[#allocation8 + $0x5b0] sm:$0xf0]  ;;  %v5899_v53 = vld [vmem:[#allocation8 + $0x6a4] sm:$0xf]  ;;  %v5000_v57 = vor.u32 %v5835_v47, %v4997_v48 }
 0x1bd   : > { %3164 = vmatpush.bf16.msra.mxu3 %v4792_v16  ;;  %v5253_v54 = vld [vmem:[#allocation8 + $0x6b0] sm:$0xf0]  ;;  %v5931_v55 = vld [vmem:[#allocation8 + $0x7a4] sm:$0xf]  ;;  %3139 = vmatmul.bf16.vlgmr.msra.gmra.mxu1 %v6837_v37  ;;  %v5128_v58 = vor.u32 %v5867_v51, %v5125_v52 }
 0x1be   : > { %v5381_v56 = vld [vmem:[#allocation8 + $0x7b0] sm:$0xf0]  ;;  %v5831_v59 = vld [vmem:[#allocation8 + $0x484] sm:$0xf]  ;;  %v5256_v61 = vor.u32 %v5899_v53, %v5253_v54 }
 0x1bf   : > { %3171 = vmatpush.bf16.msrb.mxu0 %v5016_v45  ;;  %v4981_v60 = vld [vmem:[#allocation8 + $0x490] sm:$0xf0]  ;;  %v5384_v62 = vor.u32 %v5931_v55, %v5381_v56  ;;  %v5863_v63 = vld [vmem:[#allocation8 + $0x584] sm:$0xf] }
 0x1c0   : > { %3165 = vmatmul.bf16.vlgmr.msra.gmra.mxu3 %v6835_v36  ;;  %3184 = vmatpush.bf16.msrb.mxu1 %v5144_v46  ;;  %v5109_v0 = vld [vmem:[#allocation8 + $0x590] sm:$0xf0]  ;;  %v5895_v1 = vld [vmem:[#allocation8 + $0x684] sm:$0xf]  ;;  %v4984_v5 = vor.u32 %v5831_v59, %v4981_v60 }
 0x1c1   : > { %3209 = vmatpush.bf16.msrb.mxu3 %v5416_v38  ;;  %3197 = vmatpush.bf16.msrb.mxu2 %v5272_v49  ;;  %v5237_v2 = vld [vmem:[#allocation8 + $0x690] sm:$0xf0]  ;;  %v5927_v3 = vld [vmem:[#allocation8 + $0x784] sm:$0xf]  ;;  %v5112_v6 = vor.u32 %v5863_v63, %v5109_v0  ;;  %v4651_v63 = vld [vmem:[#allocation8 + $0x1e8] sm:$0xf] }
 0x1c2   : > { %v5365_v4 = vld [vmem:[#allocation8 + $0x790] sm:$0xf0]  ;;  %v5827_v8 = vld [vmem:[#allocation8 + $0x464] sm:$0xf]  ;;  %v5240_v10 = vor.u32 %v5895_v1, %v5237_v2  ;;  %v5750_v0 = vld [vmem:[#allocation8 + $0x1f4] sm:$0xf0] }
 0x1c3   : > { %3172 = vmatpush.bf16.msrb.mxu0 %v5000_v57  ;;  %v4965_v9 = vld [vmem:[#allocation8 + $0x470] sm:$0xf0]  ;;  %v5368_v11 = vor.u32 %v5927_v3, %v5365_v4  ;;  %v5859_v12 = vld [vmem:[#allocation8 + $0x564] sm:$0xf]  ;;  %v4779_v1 = vld [vmem:[#allocation8 + $0x2e8] sm:$0xf] }
 0x1c4   : > { %3185 = vmatpush.bf16.msrb.mxu1 %v5128_v58  ;;  %v5093_v13 = vld [vmem:[#allocation8 + $0x570] sm:$0xf0]  ;;  %v5891_v15 = vld [vmem:[#allocation8 + $0x664] sm:$0xf]  ;;  %v4968_v20 = vor.u32 %v5827_v8, %v4965_v9  ;;  %v5782_v4 = vld [vmem:[#allocation8 + $0x2f4] sm:$0xf0] }
 0x1c5   : > { %3210 = vmatpush.bf16.msrb.mxu3 %v5400_v50  ;;  %3198 = vmatpush.bf16.msrb.mxu2 %v5256_v61  ;;  %v5221_v17 = vld [vmem:[#allocation8 + $0x670] sm:$0xf0]  ;;  %v5923_v18 = vld [vmem:[#allocation8 + $0x764] sm:$0xf]  ;;  %v5096_v23 = vor.u32 %v5859_v12, %v5093_v13  ;;  %v4523_v61 = vld [vmem:[#allocation8 + $0xe8] sm:$0xf] }
 0x1c6   : > { %v5349_v19 = vld [vmem:[#allocation8 + $0x770] sm:$0xf0]  ;;  %v5823_v7 = vld [vmem:[#allocation8 + $0x444] sm:$0xf]  ;;  %v5224_v27 = vor.u32 %v5891_v15, %v5221_v17  ;;  %v4507_v12 = vld [vmem:[#allocation8 + $0xc8] sm:$0xf]  ;;  %v4780_v15 = vor.u32 %v5782_v4, %v4779_v1 }
 0x1c7   : > { %3173 = vmatpush.bf16.msrb.mxu0 %v4984_v5  ;;  %v4949_v24 = vld [vmem:[#allocation8 + $0x450] sm:$0xf0]  ;;  %v5352_v28 = vor.u32 %v5923_v18, %v5349_v19  ;;  %v5855_v14 = vld [vmem:[#allocation8 + $0x544] sm:$0xf]  ;;  %v4907_v5 = vld [vmem:[#allocation8 + $0x3e8] sm:$0xf] }
 0x1c8   : > { %3186 = vmatpush.bf16.msrb.mxu1 %v5112_v6  ;;  %v5077_v16 = vld [vmem:[#allocation8 + $0x550] sm:$0xf0]  ;;  %v5887_v29 = vld [vmem:[#allocation8 + $0x644] sm:$0xf]  ;;  %v4952_v35 = vor.u32 %v5823_v7, %v4949_v24  ;;  %v5814_v6 = vld [vmem:[#allocation8 + $0x3f4] sm:$0xf0] }
 0x1c9   : > { %3211 = vmatpush.bf16.msrb.mxu3 %v5384_v62  ;;  %3199 = vmatpush.bf16.msrb.mxu2 %v5240_v10  ;;  %v5205_v32 = vld [vmem:[#allocation8 + $0x650] sm:$0xf0]  ;;  %v5919_v33 = vld [vmem:[#allocation8 + $0x744] sm:$0xf]  ;;  %v5080_v38 = vor.u32 %v5855_v14, %v5077_v16  ;;  %v5718_v62 = vld [vmem:[#allocation8 + $0xf4] sm:$0xf0]  ;;  %v4908_v17 = vor.u32 %v5814_v6, %v4907_v5 }
 0x1ca   : > { %v5333_v34 = vld [vmem:[#allocation8 + $0x750] sm:$0xf0]  ;;  %v5819_v39 = vld [vmem:[#allocation8 + $0x424] sm:$0xf]  ;;  %v5208_v41 = vor.u32 %v5887_v29, %v5205_v32  ;;  %v4524_v10 = vor.u32 %v5718_v62, %v4523_v61  ;;  %v5714_v13 = vld [vmem:[#allocation8 + $0xd4] sm:$0xf0] }
 0x1cb   : > { %3174 = vmatpush.bf16.msrb.mxu0 %v4968_v20  ;;  %v4933_v40 = vld [vmem:[#allocation8 + $0x430] sm:$0xf0]  ;;  %v5336_v42 = vor.u32 %v5919_v33, %v5333_v34  ;;  %v5851_v43 = vld [vmem:[#allocation8 + $0x524] sm:$0xf]  ;;  %v4635_v18 = vld [vmem:[#allocation8 + $0x1c8] sm:$0xf] }
 0x1cc   : > { %3187 = vmatpush.bf16.msrb.mxu1 %v5096_v23  ;;  %v5061_v44 = vld [vmem:[#allocation8 + $0x530] sm:$0xf0]  ;;  %v5883_v45 = vld [vmem:[#allocation8 + $0x624] sm:$0xf]  ;;  %v4936_v50 = vor.u32 %v5819_v39, %v4933_v40  ;;  %v5746_v19 = vld [vmem:[#allocation8 + $0x1d4] sm:$0xf0] }
 0x1cd   : > { %3212 = vmatpush.bf16.msrb.mxu3 %v5368_v11  ;;  %3200 = vmatpush.bf16.msrb.mxu2 %v5224_v27  ;;  %v5189_v46 = vld [vmem:[#allocation8 + $0x630] sm:$0xf0]  ;;  %v5915_v47 = vld [vmem:[#allocation8 + $0x724] sm:$0xf]  ;;  %v5064_v51 = vor.u32 %v5851_v43, %v5061_v44  ;;  %v4652_v11 = vor.u32 %v5750_v0, %v4651_v63  ;;  %v4763_v20 = vld [vmem:[#allocation8 + $0x2c8] sm:$0xf]  ;;  %v4508_v27 = vor.u32 %v5714_v13, %v4507_v12 }
 0x1ce   : > { %v5317_v48 = vld [vmem:[#allocation8 + $0x730] sm:$0xf0]  ;;  %v5815_v49 = vld [vmem:[#allocation8 + $0x404] sm:$0xf]  ;;  %v5192_v55 = vor.u32 %v5883_v45, %v5189_v46  ;;  %v5778_v23 = vld [vmem:[#allocation8 + $0x2d4] sm:$0xf0] }
 0x1cf   : > { %3175 = vmatpush.bf16.msrb.mxu0 %v4952_v35  ;;  %v4917_v52 = vld [vmem:[#allocation8 + $0x410] sm:$0xf0]  ;;  %v5847_v53 = vld [vmem:[#allocation8 + $0x504] sm:$0xf]  ;;  %v5320_v56 = vor.u32 %v5915_v47, %v5317_v48  ;;  %v4891_v7 = vld [vmem:[#allocation8 + $0x3c8] sm:$0xf]  ;;  %v4764_v29 = vor.u32 %v5778_v23, %v4763_v20 }
 0x1d0   : > { %3188 = vmatpush.bf16.msrb.mxu1 %v5080_v38  ;;  %v5045_v54 = vld [vmem:[#allocation8 + $0x510] sm:$0xf0]  ;;  %v5879_v57 = vld [vmem:[#allocation8 + $0x604] sm:$0xf]  ;;  %v4920_v2 = vor.u32 %v5815_v49, %v4917_v52  ;;  %v5810_v24 = vld [vmem:[#allocation8 + $0x3d4] sm:$0xf0] }
 0x1d1   : > { %3213 = vmatpush.bf16.msrb.mxu3 %v5352_v28  ;;  %3201 = vmatpush.bf16.msrb.mxu2 %v5208_v41  ;;  %v5173_v58 = vld [vmem:[#allocation8 + $0x610] sm:$0xf0]  ;;  %v5911_v59 = vld [vmem:[#allocation8 + $0x704] sm:$0xf]  ;;  %v5048_v3 = vor.u32 %v5847_v53, %v5045_v54  ;;  %v4636_v28 = vor.u32 %v5746_v19, %v4635_v18  ;;  %v4491_v14 = vld [vmem:[#allocation8 + $0xa8] sm:$0xf]  ;;  %v4892_v32 = vor.u32 %v5810_v24, %v4891_v7 }
 0x1d2   : > { %v5301_v60 = vld [vmem:[#allocation8 + $0x710] sm:$0xf0]  ;;  %v5176_v8 = vor.u32 %v5879_v57, %v5173_v58  ;;  %v5710_v16 = vld [vmem:[#allocation8 + $0xb4] sm:$0xf0]  ;;  %v4619_v33 = vld [vmem:[#allocation8 + $0x1a8] sm:$0xf] }
 0x1d3   : > { %3176 = vmatpush.bf16.msrb.mxu0 %v4936_v50  ;;  %v5304_v9 = vor.u32 %v5911_v59, %v5301_v60  ;;  %v5742_v34 = vld [vmem:[#allocation8 + $0x1b4] sm:$0xf0]  ;;  %v4747_v35 = vld [vmem:[#allocation8 + $0x2a8] sm:$0xf]  ;;  %v4492_v41 = vor.u32 %v5710_v16, %v4491_v14 }
 0x1d4   : > { %3189 = vmatpush.bf16.msrb.mxu1 %v5064_v51  ;;  %v5774_v38 = vld [vmem:[#allocation8 + $0x2b4] sm:$0xf0]  ;;  %v4875_v39 = vld [vmem:[#allocation8 + $0x3a8] sm:$0xf] }
 0x1d5   : > { %3214 = vmatpush.bf16.msrb.mxu3 %v5336_v42  ;;  %3202 = vmatpush.bf16.msrb.mxu2 %v5192_v55  ;;  %v5806_v40 = vld [vmem:[#allocation8 + $0x3b4] sm:$0xf0]  ;;  %v4620_v42 = vor.u32 %v5742_v34, %v4619_v33  ;;  %v4475_v43 = vld [vmem:[#allocation8 + $0x88] sm:$0xf]  ;;  %v4748_v45 = vor.u32 %v5774_v38, %v4747_v35 }
 0x1d6   : > { %v5706_v44 = vld [vmem:[#allocation8 + $0x94] sm:$0xf0]  ;;  %v4876_v46 = vor.u32 %v5806_v40, %v4875_v39  ;;  %v4603_v47 = vld [vmem:[#allocation8 + $0x188] sm:$0xf] }
 0x1d7   : > { %3177 = vmatpush.bf16.msrb.mxu0 %v4920_v2  ;;  %v5738_v48 = vld [vmem:[#allocation8 + $0x194] sm:$0xf0]  ;;  %v4731_v49 = vld [vmem:[#allocation8 + $0x288] sm:$0xf]  ;;  %v4476_v53 = vor.u32 %v5706_v44, %v4475_v43 }
 0x1d8   : > { %3190 = vmatpush.bf16.msrb.mxu1 %v5048_v3  ;;  %v5770_v50 = vld [vmem:[#allocation8 + $0x294] sm:$0xf0]  ;;  %v4859_v51 = vld [vmem:[#allocation8 + $0x388] sm:$0xf]  ;;  %v4604_v54 = vor.u32 %v5738_v48, %v4603_v47 }
 0x1d9   : > { %3215 = vmatpush.bf16.msrb.mxu3 %v5320_v56  ;;  %3203 = vmatpush.bf16.msrb.mxu2 %v5176_v8  ;;  %v5802_v52 = vld [vmem:[#allocation8 + $0x394] sm:$0xf0]  ;;  %v4459_v55 = vld [vmem:[#allocation8 + $0x68] sm:$0xf]  ;;  %v4732_v57 = vor.u32 %v5770_v50, %v4731_v49 }
 0x1da   : > { %3178 = vmatmul.bf16.vlgmr.msrb.gmra.mxu0 %v6845_v22  ;;  %v5702_v56 = vld [vmem:[#allocation8 + $0x74] sm:$0xf0]  ;;  %v4860_v58 = vor.u32 %v5802_v52, %v4859_v51  ;;  %v4587_v59 = vld [vmem:[#allocation8 + $0x168] sm:$0xf] }
 0x1db   : > { %3222 = vmatpush.bf16.msra.mxu0 %v4524_v10  ;;  %3191 = vmatmul.bf16.vlgmr.msrb.gmra.mxu1 %v6849_v26  ;;  %v5734_v60 = vld [vmem:[#allocation8 + $0x174] sm:$0xf0]  ;;  %v4715_v61 = vld [vmem:[#allocation8 + $0x268] sm:$0xf]  ;;  %v4460_v1 = vor.u32 %v5702_v56, %v4459_v55 }
 0x1dc   : > { %3235 = vmatpush.bf16.msra.mxu1 %v4652_v11  ;;  %3204 = vmatmul.bf16.vlgmr.msrb.gmra.mxu2 %v6843_v21  ;;  %v5766_v62 = vld [vmem:[#allocation8 + $0x274] sm:$0xf0]  ;;  %v4843_v63 = vld [vmem:[#allocation8 + $0x368] sm:$0xf]  ;;  %v4588_v2 = vor.u32 %v5734_v60, %v4587_v59 }
 0x1dd   : > { %3216 = vmatpush.bf16.msrb.mxu3 %v5304_v9  ;;  %3248 = vmatpush.bf16.msra.mxu2 %v4780_v15  ;;  %v5798_v0 = vld [vmem:[#allocation8 + $0x374] sm:$0xf0]  ;;  %v4443_v3 = vld [vmem:[#allocation8 + $0x48] sm:$0xf]  ;;  %v4716_v5 = vor.u32 %v5766_v62, %v4715_v61 }
 0x1de   : > { %v5698_v4 = vld [vmem:[#allocation8 + $0x54] sm:$0xf0]  ;;  %v4844_v6 = vor.u32 %v5798_v0, %v4843_v63  ;;  %v4571_v8 = vld [vmem:[#allocation8 + $0x148] sm:$0xf] }
 0x1df   : > { %3223 = vmatpush.bf16.msra.mxu0 %v4508_v27  ;;  %v5730_v9 = vld [vmem:[#allocation8 + $0x154] sm:$0xf0]  ;;  %v4699_v10 = vld [vmem:[#allocation8 + $0x248] sm:$0xf]  ;;  %v4444_v15 = vor.u32 %v5698_v4, %v4443_v3 }
 0x1e0   : > { %3217 = vmatmul.bf16.vlgmr.msrb.gmra.mxu3 %v6847_v25  ;;  %3236 = vmatpush.bf16.msra.mxu1 %v4636_v28  ;;  %v5762_v11 = vld [vmem:[#allocation8 + $0x254] sm:$0xf0]  ;;  %v4827_v12 = vld [vmem:[#allocation8 + $0x348] sm:$0xf] }
 0x1e1   : > { %3261 = vmatpush.bf16.msra.mxu3 %v4908_v17  ;;  %3249 = vmatpush.bf16.msra.mxu2 %v4764_v29  ;;  %v5794_v13 = vld [vmem:[#allocation8 + $0x354] sm:$0xf0]  ;;  %v4572_v17 = vor.u32 %v5730_v9, %v4571_v8  ;;  %v4427_v18 = vld [vmem:[#allocation8 + $0x28] sm:$0xf]  ;;  %v4700_v20 = vor.u32 %v5762_v11, %v4699_v10 }
 0x1e2   : > { %v5694_v19 = vld [vmem:[#allocation8 + $0x34] sm:$0xf0]  ;;  %v4828_v23 = vor.u32 %v5794_v13, %v4827_v12  ;;  %v4555_v7 = vld [vmem:[#allocation8 + $0x128] sm:$0xf] }
 0x1e3   : > { %3224 = vmatpush.bf16.msra.mxu0 %v4492_v41  ;;  %v5726_v24 = vld [vmem:[#allocation8 + $0x134] sm:$0xf0]  ;;  %v4683_v27 = vld [vmem:[#allocation8 + $0x228] sm:$0xf] }
 0x1e4   : > { %3237 = vmatpush.bf16.msra.mxu1 %v4620_v42  ;;  %v5758_v28 = vld [vmem:[#allocation8 + $0x234] sm:$0xf0]  ;;  %v4811_v14 = vld [vmem:[#allocation8 + $0x328] sm:$0xf]  ;;  %v4556_v33 = vor.u32 %v5726_v24, %v4555_v7 }
 0x1e5   : > { %3262 = vmatpush.bf16.msra.mxu3 %v4892_v32  ;;  %3250 = vmatpush.bf16.msra.mxu2 %v4748_v45  ;;  %v5790_v16 = vld [vmem:[#allocation8 + $0x334] sm:$0xf0]  ;;  %v4411_v29 = vld [vmem:[#allocation8 + $0x8] sm:$0xf]  ;;  %v4428_v32 = vor.u32 %v5694_v19, %v4427_v18  ;;  %v4684_v39 = vor.u32 %v5758_v28, %v4683_v27 }
 0x1e6   : > { %v5690_v34 = vld [vmem:[#allocation8 + $0x14] sm:$0xf0]  ;;  %v4539_v35 = vld [vmem:[#allocation8 + $0x108] sm:$0xf]  ;;  %v4812_v40 = vor.u32 %v5790_v16, %v4811_v14 }
 0x1e7   : > { %3225 = vmatpush.bf16.msra.mxu0 %v4476_v53  ;;  %v5722_v38 = vld [vmem:[#allocation8 + $0x114] sm:$0xf0]  ;;  %v4667_v41 = vld [vmem:[#allocation8 + $0x208] sm:$0xf]  ;;  %v4412_v50 = vor.u32 %v5690_v34, %v4411_v29 }
 0x1e8   : > { %3238 = vmatpush.bf16.msra.mxu1 %v4604_v54  ;;  %v5754_v42 = vld [vmem:[#allocation8 + $0x214] sm:$0xf0]  ;;  %v4795_v43 = vld [vmem:[#allocation8 + $0x308] sm:$0xf]  ;;  %v4540_v51 = vor.u32 %v5722_v38, %v4539_v35 }
 0x1e9   : > { %3263 = vmatpush.bf16.msra.mxu3 %v4876_v46  ;;  %3251 = vmatpush.bf16.msra.mxu2 %v4732_v57  ;;  %v5786_v44 = vld [vmem:[#allocation8 + $0x314] sm:$0xf0]  ;;  %v5035_v45 = vld [vmem:[#allocation8 + $0x4e8] sm:$0xf]  ;;  %v4668_v55 = vor.u32 %v5754_v42, %v4667_v41 }
 0x1ea   : > { %v5846_v46 = vld [vmem:[#allocation8 + $0x4f4] sm:$0xf0]  ;;  %v5163_v47 = vld [vmem:[#allocation8 + $0x5e8] sm:$0xf]  ;;  %v4796_v56 = vor.u32 %v5786_v44, %v4795_v43 }
 0x1eb   : > { %3226 = vmatpush.bf16.msra.mxu0 %v4460_v1  ;;  %v5878_v48 = vld [vmem:[#allocation8 + $0x5f4] sm:$0xf0]  ;;  %v5291_v49 = vld [vmem:[#allocation8 + $0x6e8] sm:$0xf]  ;;  %v5036_v57 = vor.u32 %v5846_v46, %v5035_v45 }
 0x1ec   : > { %3239 = vmatpush.bf16.msra.mxu1 %v4588_v2  ;;  %v5910_v52 = vld [vmem:[#allocation8 + $0x6f4] sm:$0xf0]  ;;  %v5419_v53 = vld [vmem:[#allocation8 + $0x7e8] sm:$0xf] }
 0x1ed   : > { %3264 = vmatpush.bf16.msra.mxu3 %v4860_v58  ;;  %3252 = vmatpush.bf16.msra.mxu2 %v4716_v5  ;;  %v5942_v54 = vld [vmem:[#allocation8 + $0x7f4] sm:$0xf0]  ;;  %v5164_v58 = vor.u32 %v5878_v48, %v5163_v47  ;;  %v5019_v59 = vld [vmem:[#allocation8 + $0x4c8] sm:$0xf]  ;;  %v5292_v61 = vor.u32 %v5910_v52, %v5291_v49 }
 0x1ee   : > { %v5842_v60 = vld [vmem:[#allocation8 + $0x4d4] sm:$0xf0]  ;;  %v5420_v62 = vor.u32 %v5942_v54, %v5419_v53  ;;  %v5147_v63 = vld [vmem:[#allocation8 + $0x5c8] sm:$0xf] }
 0x1ef   : > { %3227 = vmatpush.bf16.msra.mxu0 %v4444_v15  ;;  %v5874_v0 = vld [vmem:[#allocation8 + $0x5d4] sm:$0xf0]  ;;  %v5275_v1 = vld [vmem:[#allocation8 + $0x6c8] sm:$0xf]  ;;  %v5020_v5 = vor.u32 %v5842_v60, %v5019_v59 }
 0x1f0   : > { %3240 = vmatpush.bf16.msra.mxu1 %v4572_v17  ;;  %v5906_v2 = vld [vmem:[#allocation8 + $0x6d4] sm:$0xf0]  ;;  %v5403_v3 = vld [vmem:[#allocation8 + $0x7c8] sm:$0xf] }
 0x1f1   : > { %3265 = vmatpush.bf16.msra.mxu3 %v4844_v6  ;;  %3253 = vmatpush.bf16.msra.mxu2 %v4700_v20  ;;  %v5938_v4 = vld [vmem:[#allocation8 + $0x7d4] sm:$0xf0]  ;;  %v5148_v6 = vor.u32 %v5874_v0, %v5147_v63  ;;  %v5003_v8 = vld [vmem:[#allocation8 + $0x4a8] sm:$0xf]  ;;  %v5276_v10 = vor.u32 %v5906_v2, %v5275_v1 }
 0x1f2   : > { %v5838_v9 = vld [vmem:[#allocation8 + $0x4b4] sm:$0xf0]  ;;  %v5404_v11 = vor.u32 %v5938_v4, %v5403_v3  ;;  %v5131_v12 = vld [vmem:[#allocation8 + $0x5a8] sm:$0xf] }
 0x1f3   : > { %3228 = vmatpush.bf16.msra.mxu0 %v4428_v32  ;;  %v5870_v13 = vld [vmem:[#allocation8 + $0x5b4] sm:$0xf0]  ;;  %v5259_v15 = vld [vmem:[#allocation8 + $0x6a8] sm:$0xf]  ;;  %v5004_v20 = vor.u32 %v5838_v9, %v5003_v8 }
 0x1f4   : > { %3241 = vmatpush.bf16.msra.mxu1 %v4556_v33  ;;  %v5902_v17 = vld [vmem:[#allocation8 + $0x6b4] sm:$0xf0]  ;;  %v5387_v18 = vld [vmem:[#allocation8 + $0x7a8] sm:$0xf] }
 0x1f5   : > { %3266 = vmatpush.bf16.msra.mxu3 %v4828_v23  ;;  %3254 = vmatpush.bf16.msra.mxu2 %v4684_v39  ;;  %v5934_v19 = vld [vmem:[#allocation8 + $0x7b4] sm:$0xf0]  ;;  %v5132_v23 = vor.u32 %v5870_v13, %v5131_v12  ;;  %v4987_v7 = vld [vmem:[#allocation8 + $0x488] sm:$0xf]  ;;  %v5260_v27 = vor.u32 %v5902_v17, %v5259_v15 }
 0x1f6   : > { %v5834_v24 = vld [vmem:[#allocation8 + $0x494] sm:$0xf0]  ;;  %v5388_v28 = vor.u32 %v5934_v19, %v5387_v18  ;;  %v5115_v14 = vld [vmem:[#allocation8 + $0x588] sm:$0xf] }
 0x1f7   : > { %3229 = vmatpush.bf16.msra.mxu0 %v4412_v50  ;;  %v5866_v16 = vld [vmem:[#allocation8 + $0x594] sm:$0xf0]  ;;  %v5243_v29 = vld [vmem:[#allocation8 + $0x688] sm:$0xf]  ;;  %v4988_v35 = vor.u32 %v5834_v24, %v4987_v7 }
 0x1f8   : > { %3242 = vmatpush.bf16.msra.mxu1 %v4540_v51  ;;  %v5898_v32 = vld [vmem:[#allocation8 + $0x694] sm:$0xf0]  ;;  %v5371_v33 = vld [vmem:[#allocation8 + $0x788] sm:$0xf]  ;;  %v5116_v38 = vor.u32 %v5866_v16, %v5115_v14  ;;  %v5748_v14 = vld [vmem:[#allocation8 + $0x1ec] sm:$0xf] }
 0x1f9   : > { %3267 = vmatpush.bf16.msra.mxu3 %v4812_v40  ;;  %3255 = vmatpush.bf16.msra.mxu2 %v4668_v55  ;;  %v5930_v34 = vld [vmem:[#allocation8 + $0x794] sm:$0xf0]  ;;  %v4971_v39 = vld [vmem:[#allocation8 + $0x468] sm:$0xf]  ;;  %v5244_v41 = vor.u32 %v5898_v32, %v5243_v29  ;;  %v4653_v16 = vld [vmem:[#allocation8 + $0x1f8] sm:$0xf0] }
 0x1fa   : > { %3230 = vmatmul.bf16.vlgmr.msra.gmra.mxu0 %v6833_v31  ;;  %v5830_v40 = vld [vmem:[#allocation8 + $0x474] sm:$0xf0]  ;;  %v5372_v42 = vor.u32 %v5930_v34, %v5371_v33  ;;  %v5099_v43 = vld [vmem:[#allocation8 + $0x568] sm:$0xf]  ;;  %v5780_v29 = vld [vmem:[#allocation8 + $0x2ec] sm:$0xf] }
 0x1fb   : > { %3274 = vmatpush.bf16.msrb.mxu0 %v5036_v57  ;;  %3243 = vmatmul.bf16.vlgmr.msra.gmra.mxu1 %v6837_v37  ;;  %v5862_v44 = vld [vmem:[#allocation8 + $0x574] sm:$0xf0]  ;;  %v5227_v45 = vld [vmem:[#allocation8 + $0x668] sm:$0xf]  ;;  %v4972_v49 = vor.u32 %v5830_v40, %v4971_v39  ;;  %v6867_v32 = vld [vmem:[#allocation9] sm:$0xf] }
 0x1fc   : > { %3287 = vmatpush.bf16.msrb.mxu1 %v5164_v58  ;;  %3256 = vmatmul.bf16.vlgmr.msra.gmra.mxu2 %v6831_v30  ;;  %v5894_v46 = vld [vmem:[#allocation8 + $0x674] sm:$0xf0]  ;;  %v5355_v47 = vld [vmem:[#allocation8 + $0x768] sm:$0xf]  ;;  %v5100_v50 = vor.u32 %v5862_v44, %v5099_v43  ;;  %v4909_v39 = vld [vmem:[#allocation8 + $0x3f8] sm:$0xf0]  ;;  %v4656_v43 = vor.u32 %v5748_v14, %v4653_v16 }
 0x1fd   : > { %3268 = vmatpush.bf16.msra.mxu3 %v4796_v56  ;;  %3300 = vmatpush.bf16.msrb.mxu2 %v5292_v61  ;;  %v5926_v48 = vld [vmem:[#allocation8 + $0x774] sm:$0xf0]  ;;  %v4955_v51 = vld [vmem:[#allocation8 + $0x448] sm:$0xf]  ;;  %v5228_v53 = vor.u32 %v5894_v46, %v5227_v45  ;;  %v1726_v44 = vperm.slane %v6867_v32, 0 }
 0x1fe   : > { %v5826_v52 = vld [vmem:[#allocation8 + $0x454] sm:$0xf0]  ;;  %v5356_v54 = vor.u32 %v5926_v48, %v5355_v47  ;;  %v5083_v55 = vld [vmem:[#allocation8 + $0x548] sm:$0xf]  ;;  %v5712_v45 = vld [vmem:[#allocation8 + $0xcc] sm:$0xf] }
 0x1ff   : > { %3275 = vmatpush.bf16.msrb.mxu0 %v5020_v5  ;;  %v5858_v56 = vld [vmem:[#allocation8 + $0x554] sm:$0xf0]  ;;  %v5211_v57 = vld [vmem:[#allocation8 + $0x648] sm:$0xf]  ;;  %v4956_v61 = vor.u32 %v5826_v52, %v4955_v51  ;;  %v4509_v46 = vld [vmem:[#allocation8 + $0xd8] sm:$0xf0] }
 0x200   : > { %3269 = vmatmul.bf16.vlgmr.msra.gmra.mxu3 %v6835_v36  ;;  %3288 = vmatpush.bf16.msrb.mxu1 %v5148_v6  ;;  %v5890_v58 = vld [vmem:[#allocation8 + $0x654] sm:$0xf0]  ;;  %v5339_v59 = vld [vmem:[#allocation8 + $0x748] sm:$0xf]  ;;  %v5776_v51 = vld [vmem:[#allocation8 + $0x2cc] sm:$0xf] }
 0x201   : > { %3313 = vmatpush.bf16.msrb.mxu3 %v5420_v62  ;;  %3301 = vmatpush.bf16.msrb.mxu2 %v5276_v10  ;;  %v5922_v60 = vld [vmem:[#allocation8 + $0x754] sm:$0xf0]  ;;  %v5084_v62 = vor.u32 %v5858_v56, %v5083_v55  ;;  %v4939_v63 = vld [vmem:[#allocation8 + $0x428] sm:$0xf]  ;;  %v5212_v1 = vor.u32 %v5890_v58, %v5211_v57  ;;  %v4765_v52 = vld [vmem:[#allocation8 + $0x2d8] sm:$0xf0]  ;;  %v4512_v57 = vor.u32 %v5712_v45, %v4509_v46 }
 0x202   : > { %v5822_v0 = vld [vmem:[#allocation8 + $0x434] sm:$0xf0]  ;;  %v5340_v2 = vor.u32 %v5922_v60, %v5339_v59  ;;  %v5067_v3 = vld [vmem:[#allocation8 + $0x528] sm:$0xf]  ;;  %v5708_v60 = vld [vmem:[#allocation8 + $0xac] sm:$0xf] }
 0x203   : > { %3276 = vmatpush.bf16.msrb.mxu0 %v5004_v20  ;;  %v5854_v4 = vld [vmem:[#allocation8 + $0x534] sm:$0xf0]  ;;  %v5195_v5 = vld [vmem:[#allocation8 + $0x628] sm:$0xf]  ;;  %v4940_v12 = vor.u32 %v5822_v0, %v4939_v63  ;;  %v5740_v0 = vld [vmem:[#allocation8 + $0x1ac] sm:$0xf] }
 0x204   : > { %3289 = vmatpush.bf16.msrb.mxu1 %v5132_v23  ;;  %v5886_v6 = vld [vmem:[#allocation8 + $0x634] sm:$0xf0]  ;;  %v5323_v8 = vld [vmem:[#allocation8 + $0x728] sm:$0xf]  ;;  %v5068_v13 = vor.u32 %v5854_v4, %v5067_v3  ;;  %v4749_v4 = vld [vmem:[#allocation8 + $0x2b8] sm:$0xf0] }
 0x205   : > { %3314 = vmatpush.bf16.msrb.mxu3 %v5404_v11  ;;  %3302 = vmatpush.bf16.msrb.mxu2 %v5260_v27  ;;  %v5918_v9 = vld [vmem:[#allocation8 + $0x734] sm:$0xf0]  ;;  %v4923_v10 = vld [vmem:[#allocation8 + $0x408] sm:$0xf]  ;;  %v5196_v19 = vor.u32 %v5886_v6, %v5195_v5  ;;  %v5716_v27 = vld [vmem:[#allocation8 + $0xec] sm:$0xf] }
 0x206   : > { %v5818_v11 = vld [vmem:[#allocation8 + $0x414] sm:$0xf0]  ;;  %v5051_v15 = vld [vmem:[#allocation8 + $0x508] sm:$0xf]  ;;  %v5324_v20 = vor.u32 %v5918_v9, %v5323_v8  ;;  %v5804_v5 = vld [vmem:[#allocation8 + $0x3ac] sm:$0xf] }
 0x207   : > { %3277 = vmatpush.bf16.msrb.mxu0 %v4988_v35  ;;  %v5850_v17 = vld [vmem:[#allocation8 + $0x514] sm:$0xf0]  ;;  %v5179_v18 = vld [vmem:[#allocation8 + $0x608] sm:$0xf]  ;;  %v4924_v33 = vor.u32 %v5818_v11, %v4923_v10  ;;  %v4781_v35 = vld [vmem:[#allocation8 + $0x2f8] sm:$0xf0] }
 0x208   : > { %3290 = vmatpush.bf16.msrb.mxu1 %v5116_v38  ;;  %v5882_v23 = vld [vmem:[#allocation8 + $0x614] sm:$0xf0]  ;;  %v5307_v7 = vld [vmem:[#allocation8 + $0x708] sm:$0xf]  ;;  %v5052_v34 = vor.u32 %v5850_v17, %v5051_v15  ;;  %v5812_v38 = vld [vmem:[#allocation8 + $0x3ec] sm:$0xf]  ;;  %v4784_v47 = vor.u32 %v5780_v29, %v4781_v35 }
 0x209   : > { %3315 = vmatpush.bf16.msrb.mxu3 %v5388_v28  ;;  %3303 = vmatpush.bf16.msrb.mxu2 %v5244_v41  ;;  %v5914_v24 = vld [vmem:[#allocation8 + $0x714] sm:$0xf0]  ;;  %v4525_v28 = vld [vmem:[#allocation8 + $0xf8] sm:$0xf0]  ;;  %v5180_v40 = vor.u32 %v5882_v23, %v5179_v18  ;;  %v4912_v48 = vor.u32 %v5812_v38, %v4909_v39  ;;  %v5704_v10 = vld [vmem:[#allocation8 + $0x8c] sm:$0xf] }
 0x20a   : > { %v5308_v41 = vor.u32 %v5914_v24, %v5307_v7  ;;  %v4877_v6 = vld [vmem:[#allocation8 + $0x3b8] sm:$0xf0]  ;;  %v5736_v17 = vld [vmem:[#allocation8 + $0x18c] sm:$0xf] }
 0x20b   : > { %3278 = vmatpush.bf16.msrb.mxu0 %v4972_v49  ;;  %v5744_v49 = vld [vmem:[#allocation8 + $0x1cc] sm:$0xf]  ;;  %v4477_v11 = vld [vmem:[#allocation8 + $0x98] sm:$0xf0]  ;;  %v4880_v15 = vor.u32 %v5804_v5, %v4877_v6 }
 0x20c   : > { %3291 = vmatpush.bf16.msrb.mxu1 %v5100_v50  ;;  %v4637_v50 = vld [vmem:[#allocation8 + $0x1d8] sm:$0xf0]  ;;  %v5800_v24 = vld [vmem:[#allocation8 + $0x38c] sm:$0xf]  ;;  %v4480_v16 = vor.u32 %v5704_v10, %v4477_v11 }
 0x20d   : > { %3316 = vmatpush.bf16.msrb.mxu3 %v5372_v42  ;;  %3304 = vmatpush.bf16.msrb.mxu2 %v5228_v53  ;;  %v4528_v42 = vor.u32 %v5716_v27, %v4525_v28  ;;  %v5808_v53 = vld [vmem:[#allocation8 + $0x3cc] sm:$0xf]  ;;  %v4640_v58 = vor.u32 %v5744_v49, %v4637_v50  ;;  %v4605_v18 = vld [vmem:[#allocation8 + $0x198] sm:$0xf0] }
 0x20e   : > { %v4733_v7 = vld [vmem:[#allocation8 + $0x298] sm:$0xf0]  ;;  %v4608_v29 = vor.u32 %v5736_v17, %v4605_v18  ;;  %v5724_v5 = vld [vmem:[#allocation8 + $0x12c] sm:$0xf] }
 0x20f   : > { %3279 = vmatpush.bf16.msrb.mxu0 %v4956_v61  ;;  %v4493_v61 = vld [vmem:[#allocation8 + $0xb8] sm:$0xf0]  ;;  %v5788_v11 = vld [vmem:[#allocation8 + $0x32c] sm:$0xf] }
 0x210   : > { %3292 = vmatpush.bf16.msrb.mxu1 %v5084_v62  ;;  %v4768_v62 = vor.u32 %v5776_v51, %v4765_v52  ;;  %v4496_v8 = vor.u32 %v5708_v60, %v4493_v61  ;;  %v4861_v27 = vld [vmem:[#allocation8 + $0x398] sm:$0xf0] }
 0x211   : > { %3317 = vmatpush.bf16.msrb.mxu3 %v5356_v54  ;;  %3305 = vmatpush.bf16.msrb.mxu2 %v5212_v1  ;;  %v4893_v54 = vld [vmem:[#allocation8 + $0x3d8] sm:$0xf0]  ;;  %v4864_v39 = vor.u32 %v5800_v24, %v4861_v27  ;;  %v5752_v27 = vld [vmem:[#allocation8 + $0x20c] sm:$0xf] }
 0x212   : > { %v4896_v63 = vor.u32 %v5808_v53, %v4893_v54  ;;  %v4621_v1 = vld [vmem:[#allocation8 + $0x1b8] sm:$0xf0]  ;;  %v5728_v53 = vld [vmem:[#allocation8 + $0x14c] sm:$0xf] }
 0x213   : > { %3280 = vmatpush.bf16.msrb.mxu0 %v4940_v12  ;;  %v4624_v9 = vor.u32 %v5740_v0, %v4621_v1  ;;  %v4461_v35 = vld [vmem:[#allocation8 + $0x78] sm:$0xf0]  ;;  %v5692_v1 = vld [vmem:[#allocation8 + $0x2c] sm:$0xf] }
 0x214   : > { %3293 = vmatpush.bf16.msrb.mxu1 %v5068_v13  ;;  %v4845_v45 = vld [vmem:[#allocation8 + $0x378] sm:$0xf0] }
 0x215   : > { %3318 = vmatpush.bf16.msrb.mxu3 %v5340_v2  ;;  %3306 = vmatpush.bf16.msrb.mxu2 %v5196_v19  ;;  %v5772_v2 = vld [vmem:[#allocation8 + $0x2ac] sm:$0xf]  ;;  %v4445_v49 = vld [vmem:[#allocation8 + $0x58] sm:$0xf0] }
 0x216   : > { %v3023_v55 = vpop.f32.mrf.mxu0  ;;  %v4752_v13 = vor.u32 %v5772_v2, %v4749_v4  ;;  %v5768_v19 = vld [vmem:[#allocation8 + $0x28c] sm:$0xf]  ;;  %v4573_v54 = vld [vmem:[#allocation8 + $0x158] sm:$0xf0] }
 0x217   : > { %3281 = vmatpush.bf16.msrb.mxu0 %v4924_v33  ;;  %v3024_v56 = vadd.f32 %v3023_v55, %v1726_v44  ;;  %v4736_v38 = vor.u32 %v5768_v19, %v4733_v7  ;;  %v5796_v44 = vld [vmem:[#allocation8 + $0x36c] sm:$0xf]  ;;  %v4429_v2 = vld [vmem:[#allocation8 + $0x38] sm:$0xf0] }
 0x218   : > { %3294 = vmatpush.bf16.msrb.mxu1 %v5052_v34  ;;  %v3036_v59 = vpop.f32.mrf.mxu1  ;;  %v5700_v34 = vld [vmem:[#allocation8 + $0x6c] sm:$0xf]  ;;  %v4848_v52 = vor.u32 %v5796_v44, %v4845_v45  ;;  %v4557_v6 = vld [vmem:[#allocation8 + $0x138] sm:$0xf0] }
 0x219   : > { %3319 = vmatpush.bf16.msrb.mxu3 %v5324_v20  ;;  %3307 = vmatpush.bf16.msrb.mxu2 %v5180_v40  ;;  %v3037_v3 = vadd.f32 %v3036_v59, %v3024_v56  ;;  %v5732_v40 = vld [vmem:[#allocation8 + $0x16c] sm:$0xf]  ;;  %v4464_v46 = vor.u32 %v5700_v34, %v4461_v35  ;;  %v4829_v59 = vld [vmem:[#allocation8 + $0x358] sm:$0xf0]  ;;  %v4560_v17 = vor.u32 %v5724_v5, %v4557_v6 }
 0x21a   : > { %3282 = vmatmul.bf16.vlgmr.msrb.gmra.mxu0 %v6845_v22  ;;  %v5760_v55 = vld [vmem:[#allocation8 + $0x24c] sm:$0xf]  ;;  %v4685_v10 = vld [vmem:[#allocation8 + $0x238] sm:$0xf0] }
 0x21b   : > { %3326 = vmatpush.bf16.msra.mxu0 %v4528_v42  ;;  %3295 = vmatmul.bf16.vlgmr.msrb.gmra.mxu1 %v6849_v26  ;;  %v5764_v42 = vld [vmem:[#allocation8 + $0x26c] sm:$0xf]  ;;  %v4413_v18 = vld [vmem:[#allocation8 + $0x18] sm:$0xf0] }
 0x21c   : > { %3339 = vmatpush.bf16.msra.mxu1 %v4656_v43  ;;  %3308 = vmatmul.bf16.vlgmr.msrb.gmra.mxu2 %v6843_v21  ;;  %v4717_v43 = vld [vmem:[#allocation8 + $0x278] sm:$0xf0]  ;;  %v5720_v19 = vld [vmem:[#allocation8 + $0x10c] sm:$0xf] }
 0x21d   : > { %3320 = vmatpush.bf16.msrb.mxu3 %v5308_v41  ;;  %3352 = vmatpush.bf16.msra.mxu2 %v4784_v47  ;;  %v3049_v12 = vpop.f32.mrf.mxu2  ;;  %v3062_v23 = vpop.f32.mrf.mxu3  ;;  %v4589_v41 = vld [vmem:[#allocation8 + $0x178] sm:$0xf0]  ;;  %v4720_v51 = vor.u32 %v5764_v42, %v4717_v43  ;;  %v5876_v35 = vld [vmem:[#allocation8 + $0x5ec] sm:$0xf] }
 0x21e   : > { %v3050_v20 = vadd.f32 %v3049_v12, %v3037_v3  ;;  %v3025_v28 = vpop.f32.mrf.mxu0  ;;  %v4592_v47 = vor.u32 %v5732_v40, %v4589_v41  ;;  %v4813_v12 = vld [vmem:[#allocation8 + $0x338] sm:$0xf0]  ;;  %v5940_v44 = vld [vmem:[#allocation8 + $0x7ec] sm:$0xf] }
 0x21f   : > { %3327 = vmatpush.bf16.msra.mxu0 %v4512_v57  ;;  %v4701_v57 = vld [vmem:[#allocation8 + $0x258] sm:$0xf0]  ;;  %v4816_v24 = vor.u32 %v5788_v11, %v4813_v12  ;;  %v5868_v5 = vld [vmem:[#allocation8 + $0x5ac] sm:$0xf] }
 0x220   : > { %3321 = vmatmul.bf16.vlgmr.msrb.gmra.mxu3 %v6847_v25  ;;  %3340 = vmatpush.bf16.msra.mxu1 %v4640_v58  ;;  %v3063_v14 = vadd.f32 %v3062_v23, %v3050_v20  ;;  %v3038_v33 = vpop.f32.mrf.mxu1  ;;  %v5792_v58 = vld [vmem:[#allocation8 + $0x34c] sm:$0xf]  ;;  %v4704_v3 = vor.u32 %v5760_v55, %v4701_v57  ;;  %v4541_v20 = vld [vmem:[#allocation8 + $0x118] sm:$0xf0] }
 0x221   : > { %3365 = vmatpush.bf16.msra.mxu3 %v4912_v48  ;;  %3353 = vmatpush.bf16.msra.mxu2 %v4768_v62  ;;  %v5696_v48 = vld [vmem:[#allocation8 + $0x4c] sm:$0xf]  ;;  %v4832_v4 = vor.u32 %v5792_v58, %v4829_v59  ;;  %v4669_v28 = vld [vmem:[#allocation8 + $0x218] sm:$0xf0]  ;;  %v4544_v42 = vor.u32 %v5720_v19, %v4541_v20 }
 0x222   : > { %v4448_v62 = vor.u32 %v5696_v48, %v4445_v49  ;;  %v5844_v33 = vld [vmem:[#allocation8 + $0x4ec] sm:$0xf]  ;;  %v5037_v34 = vld [vmem:[#allocation8 + $0x4f8] sm:$0xf0] }
 0x223   : > { %3328 = vmatpush.bf16.msra.mxu0 %v4496_v8  ;;  %v5756_v8 = vld [vmem:[#allocation8 + $0x22c] sm:$0xf]  ;;  %v5293_v43 = vld [vmem:[#allocation8 + $0x6f8] sm:$0xf0]  ;;  %v5040_v49 = vor.u32 %v5844_v33, %v5037_v34 }
 0x224   : > { %3341 = vmatpush.bf16.msra.mxu1 %v4624_v9  ;;  %v4688_v7 = vor.u32 %v5756_v8, %v4685_v10  ;;  %v5421_v45 = vld [vmem:[#allocation8 + $0x7f8] sm:$0xf0]  ;;  %v5872_v55 = vld [vmem:[#allocation8 + $0x5cc] sm:$0xf] }
 0x225   : > { %3366 = vmatpush.bf16.msra.mxu3 %v4896_v63  ;;  %3354 = vmatpush.bf16.msra.mxu2 %v4752_v13  ;;  %v3051_v50 = vpop.f32.mrf.mxu2  ;;  %v3064_v56 = vpop.f32.mrf.mxu3  ;;  %v4576_v63 = vor.u32 %v5728_v53, %v4573_v54  ;;  %v5688_v13 = vld [vmem:[#allocation8 + $0xc] sm:$0xf]  ;;  %v5424_v54 = vor.u32 %v5940_v44, %v5421_v45  ;;  %v5277_v58 = vld [vmem:[#allocation8 + $0x6d8] sm:$0xf0] }
 0x226   : > { %v3075_v60 = vpop.f32.mrf.mxu0  ;;  %v4416_v41 = vor.u32 %v5688_v13, %v4413_v18  ;;  %v5149_v56 = vld [vmem:[#allocation8 + $0x5d8] sm:$0xf0]  ;;  %v5904_v57 = vld [vmem:[#allocation8 + $0x6cc] sm:$0xf] }
 0x227   : > { %3329 = vmatpush.bf16.msra.mxu0 %v4480_v16  ;;  %v3076_v61 = vadd.f32 %v3075_v60, %v3063_v14  ;;  %v5784_v14 = vld [vmem:[#allocation8 + $0x30c] sm:$0xf]  ;;  %v5405_v60 = vld [vmem:[#allocation8 + $0x7d8] sm:$0xf0] }
 0x228   : > { %3342 = vmatpush.bf16.msra.mxu1 %v4608_v29  ;;  %v3088_v0 = vpop.f32.mrf.mxu1  ;;  %v4797_v29 = vld [vmem:[#allocation8 + $0x318] sm:$0xf0]  ;;  %v5936_v59 = vld [vmem:[#allocation8 + $0x7cc] sm:$0xf] }
 0x229   : > { %3367 = vmatpush.bf16.msra.mxu3 %v4880_v15  ;;  %3355 = vmatpush.bf16.msra.mxu2 %v4736_v38  ;;  %v6874_v9 = vadd.f32 %v3088_v0, %v3076_v61  ;;  %v4432_v15 = vor.u32 %v5692_v1, %v4429_v2  ;;  %v5165_v38 = vld [vmem:[#allocation8 + $0x5f8] sm:$0xf0]  ;;  %v4800_v48 = vor.u32 %v5784_v14, %v4797_v29  ;;  %v5836_v0 = vld [vmem:[#allocation8 + $0x4ac] sm:$0xf] }
 0x22a   : > { %v5168_v50 = vor.u32 %v5876_v35, %v5165_v38  ;;  %v5005_v1 = vld [vmem:[#allocation8 + $0x4b8] sm:$0xf0]  ;;  %v5900_v8 = vld [vmem:[#allocation8 + $0x6ac] sm:$0xf] }
 0x22b   : > { %3330 = vmatpush.bf16.msra.mxu0 %v4464_v46  ;;  %v5133_v6 = vld [vmem:[#allocation8 + $0x5b8] sm:$0xf0]  ;;  %v5932_v11 = vld [vmem:[#allocation8 + $0x7ac] sm:$0xf]  ;;  %v5008_v13 = vor.u32 %v5836_v0, %v5005_v1 }
 0x22c   : > { %3343 = vmatpush.bf16.msra.mxu1 %v4592_v47  ;;  %v4672_v47 = vor.u32 %v5752_v27, %v4669_v28  ;;  %v5261_v10 = vld [vmem:[#allocation8 + $0x6b8] sm:$0xf0]  ;;  %v5928_v28 = vld [vmem:[#allocation8 + $0x78c] sm:$0xf] }
 0x22d   : > { %3368 = vmatpush.bf16.msra.mxu3 %v4864_v39  ;;  %3356 = vmatpush.bf16.msra.mxu2 %v4720_v51  ;;  %v6876_v23 = vpop.f32.mrf.mxu2  ;;  %v6878_v16 = vpop.f32.mrf.mxu3  ;;  %v5908_v39 = vld [vmem:[#allocation8 + $0x6ec] sm:$0xf]  ;;  %v5389_v12 = vld [vmem:[#allocation8 + $0x7b8] sm:$0xf0]  ;;  %v5264_v19 = vor.u32 %v5900_v8, %v5261_v10 }
 0x22e   : > { %v3077_v40 = vpop.f32.mrf.mxu0  ;;  %v5840_v51 = vld [vmem:[#allocation8 + $0x4cc] sm:$0xf]  ;;  %v5296_v53 = vor.u32 %v5908_v39, %v5293_v43  ;;  %v4989_v18 = vld [vmem:[#allocation8 + $0x498] sm:$0xf0]  ;;  %v5392_v20 = vor.u32 %v5932_v11, %v5389_v12  ;;  %v1727_v11 = vperm.slane %v6867_v32, 1 }
 0x22f   : > { %3331 = vmatpush.bf16.msra.mxu0 %v4448_v62  ;;  %v5245_v27 = vld [vmem:[#allocation8 + $0x698] sm:$0xf0]  ;;  %v5828_v29 = vld [vmem:[#allocation8 + $0x46c] sm:$0xf] }
 0x230   : > { %3344 = vmatpush.bf16.msra.mxu1 %v4576_v63  ;;  %v3090_v46 = vpop.f32.mrf.mxu1  ;;  %v5152_v63 = vor.u32 %v5872_v55, %v5149_v56  ;;  %v4973_v33 = vld [vmem:[#allocation8 + $0x478] sm:$0xf0]  ;;  %v5860_v39 = vld [vmem:[#allocation8 + $0x56c] sm:$0xf] }
 0x231   : > { %3369 = vmatpush.bf16.msra.mxu3 %v4848_v52  ;;  %3357 = vmatpush.bf16.msra.mxu2 %v4704_v3  ;;  %v5021_v52 = vld [vmem:[#allocation8 + $0x4d8] sm:$0xf0]  ;;  %v5280_v3 = vor.u32 %v5904_v57, %v5277_v58  ;;  %v5924_v43 = vld [vmem:[#allocation8 + $0x76c] sm:$0xf]  ;;  %v4976_v45 = vor.u32 %v5828_v29, %v4973_v33 }
 0x232   : > { %v5024_v62 = vor.u32 %v5840_v51, %v5021_v52  ;;  %v5101_v40 = vld [vmem:[#allocation8 + $0x578] sm:$0xf0]  ;;  %v5856_v51 = vld [vmem:[#allocation8 + $0x54c] sm:$0xf] }
 0x233   : > { %3332 = vmatpush.bf16.msra.mxu0 %v4432_v15  ;;  %v5136_v15 = vor.u32 %v5868_v5, %v5133_v6  ;;  %v5357_v44 = vld [vmem:[#allocation8 + $0x778] sm:$0xf0]  ;;  %v5104_v46 = vor.u32 %v5860_v39, %v5101_v40  ;;  %v5920_v56 = vld [vmem:[#allocation8 + $0x74c] sm:$0xf] }
 0x234   : > { %3345 = vmatpush.bf16.msra.mxu1 %v4560_v17  ;;  %v5832_v17 = vld [vmem:[#allocation8 + $0x48c] sm:$0xf]  ;;  %v5085_v52 = vld [vmem:[#allocation8 + $0x558] sm:$0xf0] }
 0x235   : > { %3370 = vmatpush.bf16.msra.mxu3 %v4832_v4  ;;  %3358 = vmatpush.bf16.msra.mxu2 %v4688_v7  ;;  %v3103_v61 = vpop.f32.mrf.mxu2  ;;  %v3116_v2 = vpop.f32.mrf.mxu3  ;;  %v5408_v4 = vor.u32 %v5936_v59, %v5405_v60  ;;  %v5117_v7 = vld [vmem:[#allocation8 + $0x598] sm:$0xf0]  ;;  %v5852_v0 = vld [vmem:[#allocation8 + $0x52c] sm:$0xf] }
 0x236   : > { %v5213_v55 = vld [vmem:[#allocation8 + $0x658] sm:$0xf0]  ;;  %v5088_v61 = vor.u32 %v5856_v51, %v5085_v52  ;;  %v5884_v5 = vld [vmem:[#allocation8 + $0x62c] sm:$0xf]  ;;  %v5965_v51 = vld [vmem:[#allocation11 + $0xb0] sm:$0xff] }
 0x237   : > { %3333 = vmatpush.bf16.msra.mxu0 %v4416_v41  ;;  %v6884_v14 = vpop.f32.mrf.mxu0  ;;  %v5892_v41 = vld [vmem:[#allocation8 + $0x66c] sm:$0xf]  ;;  %v5341_v57 = vld [vmem:[#allocation8 + $0x758] sm:$0xf0] }
 0x238   : > { %3346 = vmatpush.bf16.msra.mxu1 %v4544_v42  ;;  %v5229_v42 = vld [vmem:[#allocation8 + $0x678] sm:$0xf0]  ;;  %v5916_v8 = vld [vmem:[#allocation8 + $0x72c] sm:$0xf] }
 0x239   : > { %3371 = vmatpush.bf16.msra.mxu3 %v4816_v24  ;;  %3359 = vmatpush.bf16.msra.mxu2 %v4672_v47  ;;  %v5896_v24 = vld [vmem:[#allocation8 + $0x68c] sm:$0xf]  ;;  %v5197_v6 = vld [vmem:[#allocation8 + $0x638] sm:$0xf0] }
 0x23a   : > { %3334 = vmatmul.bf16.vlgmr.msra.gmra.mxu0 %v6833_v31  ;;  %v5373_v31 = vld [vmem:[#allocation8 + $0x798] sm:$0xf0]  ;;  %v6886_v34 = vpop.f32.mrf.mxu1  ;;  %v5248_v35 = vor.u32 %v5896_v24, %v5245_v27  ;;  %v5824_v47 = vld [vmem:[#allocation8 + $0x44c] sm:$0xf] }
 0x23b   : > { %3378 = vmatpush.bf16.msrb.mxu0 %v5040_v49  ;;  %3347 = vmatmul.bf16.vlgmr.msra.gmra.mxu1 %v6837_v37  ;;  %v5376_v38 = vor.u32 %v5928_v28, %v5373_v31  ;;  %v5232_v49 = vor.u32 %v5892_v41, %v5229_v42  ;;  %v5325_v10 = vld [vmem:[#allocation8 + $0x738] sm:$0xf0]  ;;  %v5912_v28 = vld [vmem:[#allocation8 + $0x70c] sm:$0xf] }
 0x23c   : > { %3391 = vmatpush.bf16.msrb.mxu1 %v5168_v50  ;;  %3360 = vmatmul.bf16.vlgmr.msra.gmra.mxu2 %v6831_v30  ;;  %v5864_v30 = vld [vmem:[#allocation8 + $0x58c] sm:$0xf]  ;;  %v5360_v50 = vor.u32 %v5924_v43, %v5357_v44  ;;  %v5181_v27 = vld [vmem:[#allocation8 + $0x618] sm:$0xf0]  ;;  %v5957_v43 = vld [vmem:[#allocation11 + $0x70] sm:$0xff] }
 0x23d   : > { %3372 = vmatpush.bf16.msra.mxu3 %v4800_v48  ;;  %3404 = vmatpush.bf16.msrb.mxu2 %v5296_v53  ;;  %v5120_v37 = vor.u32 %v5864_v30, %v5117_v7  ;;  %v4957_v48 = vld [vmem:[#allocation8 + $0x458] sm:$0xf0]  ;;  %v5888_v53 = vld [vmem:[#allocation8 + $0x64c] sm:$0xf] }
 0x23e   : > { %v4960_v60 = vor.u32 %v5824_v47, %v4957_v48  ;;  %v5216_v2 = vor.u32 %v5888_v53, %v5213_v55  ;;  %v5053_v30 = vld [vmem:[#allocation8 + $0x518] sm:$0xf0]  ;;  %v5880_v7 = vld [vmem:[#allocation8 + $0x60c] sm:$0xf]  ;;  %v5947_v48 = vld [vmem:[#allocation11 + $0x20] sm:$0xff] }
 0x23f   : > { %3379 = vmatpush.bf16.msrb.mxu0 %v5024_v62  ;;  %v3129_v59 = vpop.f32.mrf.mxu0  ;;  %v5820_v62 = vld [vmem:[#allocation8 + $0x42c] sm:$0xf]  ;;  %v5309_v31 = vld [vmem:[#allocation8 + $0x718] sm:$0xf0] }
 0x240   : > { %3373 = vmatmul.bf16.vlgmr.msra.gmra.mxu3 %v6835_v36  ;;  %3392 = vmatpush.bf16.msrb.mxu1 %v5152_v63  ;;  %v4992_v36 = vor.u32 %v5832_v17, %v4989_v18  ;;  %v4941_v63 = vld [vmem:[#allocation8 + $0x438] sm:$0xf0]  ;;  %v5200_v18 = vor.u32 %v5884_v5, %v5197_v6  ;;  %v5943_v6 = vld [vmem:[#allocation11] sm:$0xff] }
 0x241   : > { %3417 = vmatpush.bf16.msrb.mxu3 %v5424_v54  ;;  %3405 = vmatpush.bf16.msrb.mxu2 %v5280_v3  ;;  %v6888_v54 = vpop.f32.mrf.mxu2  ;;  %v5344_v3 = vor.u32 %v5920_v56, %v5341_v57  ;;  %v4944_v12 = vor.u32 %v5820_v62, %v4941_v63  ;;  %v4925_v17 = vld [vmem:[#allocation8 + $0x418] sm:$0xf0]  ;;  %v5945_v57 = vld [vmem:[#allocation11 + $0x10] sm:$0xff]  ;;  %v5944_v63 = vld [vmem:[#allocation11 + $0x8] sm:$0xff] }
 0x242   : > { %v3142_v1 = vpop.f32.mrf.mxu1  ;;  %v5950_v39 = vld [vmem:[#allocation11 + $0x38] sm:$0xff] }
 0x243   : > { %3380 = vmatpush.bf16.msrb.mxu0 %v5008_v13  ;;  %v6890_v58 = vpop.f32.mrf.mxu3  ;;  %v5958_v40 = vld [vmem:[#allocation11 + $0x78] sm:$0xff] }
 0x244   : > { %3393 = vmatpush.bf16.msrb.mxu1 %v5136_v15  ;;  %v5816_v15 = vld [vmem:[#allocation8 + $0x40c] sm:$0xf]  ;;  %v5966_v42 = vld [vmem:[#allocation11 + $0xb8] sm:$0xff] }
 0x245   : > { %3418 = vmatpush.bf16.msrb.mxu3 %v5408_v4  ;;  %3406 = vmatpush.bf16.msrb.mxu2 %v5264_v19  ;;  %v5069_v4 = vld [vmem:[#allocation8 + $0x538] sm:$0xf0]  ;;  %v5328_v19 = vor.u32 %v5916_v8, %v5325_v10  ;;  %v4928_v29 = vor.u32 %v5816_v15, %v4925_v17  ;;  %v5951_v8 = vld [vmem:[#allocation11 + $0x40] sm:$0xff]  ;;  %v5960_v15 = vld [vmem:[#allocation11 + $0x88] sm:$0xff] }
 0x246   : > { %v5072_v13 = vor.u32 %v5852_v0, %v5069_v4  ;;  %v5952_v0 = vld [vmem:[#allocation11 + $0x48] sm:$0xff] }
 0x247   : > { %3381 = vmatpush.bf16.msrb.mxu0 %v4992_v36  ;;  %v3128_v36 = vadd.f32 %v6884_v14, %v1727_v11  ;;  %v5949_v14 = vld [vmem:[#allocation11 + $0x30] sm:$0xff] }
 0x248   : > { %3394 = vmatpush.bf16.msrb.mxu1 %v5120_v37 }
 0x249   : > { %3419 = vmatpush.bf16.msrb.mxu3 %v5392_v20  ;;  %3407 = vmatpush.bf16.msrb.mxu2 %v5248_v35  ;;  %v5848_v20 = vld [vmem:[#allocation8 + $0x50c] sm:$0xf]  ;;  %v3155_v24 = vpop.f32.mrf.mxu2  ;;  %v5184_v35 = vor.u32 %v5880_v7, %v5181_v27  ;;  %v3141_v41 = vadd.f32 %v6886_v34, %v3128_v36 }
 0x24a   : > { %v5056_v33 = vor.u32 %v5848_v20, %v5053_v30  ;;  %v5959_v20 = vld [vmem:[#allocation11 + $0x80] sm:$0xff]  ;;  %v1728_v30 = vperm.slane %v6867_v32, 2 }
 0x24b   : > { %3382 = vmatpush.bf16.msrb.mxu0 %v4976_v45  ;;  %v3168_v37 = vpop.f32.mrf.mxu3  ;;  %v3154_v44 = vadd.f32 %v6888_v54, %v3141_v41  ;;  %v5948_v45 = vld [vmem:[#allocation11 + $0x28] sm:$0xff]  ;;  %v5974_v41 = vld [vmem:[#allocation11 + $0xf8] sm:$0xff] }
 0x24c   : > { %3395 = vmatpush.bf16.msrb.mxu1 %v5104_v46  ;;  %v5956_v46 = vld [vmem:[#allocation11 + $0x68] sm:$0xff] }
 0x24d   : > { %3420 = vmatpush.bf16.msrb.mxu3 %v5376_v38  ;;  %3408 = vmatpush.bf16.msrb.mxu2 %v5232_v49  ;;  %v5312_v38 = vor.u32 %v5912_v28, %v5309_v31  ;;  %v3167_v34 = vadd.f32 %v6890_v58, %v3154_v44  ;;  %v5955_v49 = vld [vmem:[#allocation11 + $0x60] sm:$0xff]  ;;  %v5964_v54 = vld [vmem:[#allocation11 + $0xa8] sm:$0xff]  ;;  %v5953_v58 = vld [vmem:[#allocation11 + $0x50] sm:$0xff] }
 0x24e   : > { %v5973_v44 = vld [vmem:[#allocation11 + $0xf0] sm:$0xff] }
 0x24f   : > { %3383 = vmatpush.bf16.msrb.mxu0 %v4960_v60  ;;  %v3102_v60 = vadd.f32 %v6876_v23, %v6874_v9 }
 0x250   : > { %3396 = vmatpush.bf16.msrb.mxu1 %v5088_v61  ;;  %v5963_v61 = vld [vmem:[#allocation11 + $0xa0] sm:$0xff] }
 0x251   : > { %3421 = vmatpush.bf16.msrb.mxu3 %v5360_v50  ;;  %3409 = vmatpush.bf16.msrb.mxu2 %v5216_v2  ;;  %v3115_v1 = vadd.f32 %v6878_v16, %v3102_v60  ;;  %v5961_v16 = vld [vmem:[#allocation11 + $0x90] sm:$0xff] }
 0x253   : > { %3384 = vmatpush.bf16.msrb.mxu0 %v4944_v12  ;;  %v3430_v10 = vmax.f32 %v3115_v1, 0.0 }
 0x254   : > { %3397 = vmatpush.bf16.msrb.mxu1 %v5072_v13 }
 0x255   : > { %3422 = vmatpush.bf16.msrb.mxu3 %v5344_v3  ;;  %3410 = vmatpush.bf16.msrb.mxu2 %v5200_v18  ;;  %v5962_v3 = vld [vmem:[#allocation11 + $0x98] sm:$0xff]  ;;  %v3434_v23 = vpack.c.bf16 %v3430_v10, %v3430_v10 }
 0x257   : > { %3385 = vmatpush.bf16.msrb.mxu0 %v4928_v29  ;;  %v3179_v47 = vpop.f32.mrf.mxu0 }
 0x258   : > { %3398 = vmatpush.bf16.msrb.mxu1 %v5056_v33  ;;  %v3180_v50 = vadd.f32 %v3179_v47, %v3167_v34 }
 0x259   : > { %3423 = vmatpush.bf16.msrb.mxu3 %v5328_v19  ;;  %3411 = vmatpush.bf16.msrb.mxu2 %v5184_v35 }
 0x25a   : > { %3386 = vmatmul.bf16.vlgmr.msrb.gmra.mxu0 %v6845_v22  ;;  %v3192_v22 = vpop.f32.mrf.mxu1 }
 0x25b   : > { %3698 = vmatpush.bf16.msra.mxu0 %v5950_v39  ;;  %3399 = vmatmul.bf16.vlgmr.msrb.gmra.mxu1 %v6849_v26  ;;  %v3193_v26 = vadd.f32 %v3192_v22, %v3180_v50  ;;  %v5970_v50 = vld [vmem:[#allocation11 + $0xd8] sm:$0xff] }
 0x25c   : > { %3711 = vmatpush.bf16.msra.mxu1 %v5958_v40  ;;  %3412 = vmatmul.bf16.vlgmr.msrb.gmra.mxu2 %v6843_v21  ;;  %v5946_v21 = vld [vmem:[#allocation11 + $0x18] sm:$0xff] }
 0x25d   : > { %3424 = vmatpush.bf16.msrb.mxu3 %v5312_v38  ;;  %3724 = vmatpush.bf16.msra.mxu2 %v5966_v42 }
 0x25f   : > { %3699 = vmatpush.bf16.msra.mxu0 %v5949_v14  ;;  %v3205_v52 = vpop.f32.mrf.mxu2  ;;  %v3181_v56 = vpop.f32.mrf.mxu0 }
 0x260   : > { %3425 = vmatmul.bf16.vlgmr.msrb.gmra.mxu3 %v6847_v25  ;;  %3712 = vmatpush.bf16.msra.mxu1 %v5957_v43  ;;  %v5954_v25 = vld [vmem:[#allocation11 + $0x58] sm:$0xff]  ;;  %v3206_v55 = vadd.f32 %v3205_v52, %v3193_v26  ;;  %v1729_v56 = vperm.slane %v6867_v32, 3 }
 0x261   : > { %3725 = vmatpush.bf16.msra.mxu2 %v5965_v51  ;;  %3737 = vmatpush.bf16.msra.mxu3 %v5974_v41  ;;  %v5969_v51 = vld [vmem:[#allocation11 + $0xd0] sm:$0xff] }
 0x262   : > { %v3194_v59 = vpop.f32.mrf.mxu1 }
 0x263   : > { %3700 = vmatpush.bf16.msra.mxu0 %v5948_v45  ;;  %v3218_v53 = vpop.f32.mrf.mxu3 }
 0x264   : > { %3713 = vmatpush.bf16.msra.mxu1 %v5956_v46  ;;  %v3219_v62 = vadd.f32 %v3218_v53, %v3206_v55  ;;  %v5972_v46 = vld [vmem:[#allocation11 + $0xe8] sm:$0xff] }
 0x265   : > { %3726 = vmatpush.bf16.msra.mxu2 %v5964_v54  ;;  %3738 = vmatpush.bf16.msra.mxu3 %v5973_v44  ;;  %v5967_v54 = vld [vmem:[#allocation11 + $0xc0] sm:$0xff] }
 0x266   : > { %v3431_v5 = vmax.f32 %v3219_v62, 0.0 }
 0x267   : > { %3701 = vmatpush.bf16.msra.mxu0 %v5947_v48  ;;  %v3207_v2 = vpop.f32.mrf.mxu2 }
 0x268   : > { %3714 = vmatpush.bf16.msra.mxu1 %v5955_v49  ;;  %v3435_v9 = vpack.c.bf16 %v3431_v5, %v3431_v5  ;;  %v5971_v49 = vld [vmem:[#allocation11 + $0xe0] sm:$0xff] }
 0x269   : > { %3727 = vmatpush.bf16.msra.mxu2 %v5963_v61  ;;  %3739 = vmatpush.bf16.msra.mxu3 %v5972_v46 }
 0x26b   : > { %3702 = vmatpush.bf16.msra.mxu0 %v5946_v21  ;;  %v3220_v4 = vpop.f32.mrf.mxu3  ;;  %v5968_v21 = vld [vmem:[#allocation11 + $0xc8] sm:$0xff] }
 0x26c   : > { %3715 = vmatpush.bf16.msra.mxu1 %v5954_v25 }
 0x26d   : > { %3728 = vmatpush.bf16.msra.mxu2 %v5962_v3  ;;  %3740 = vmatpush.bf16.msra.mxu3 %v5971_v49 }
 0x26f   : > { %3703 = vmatpush.bf16.msra.mxu0 %v5945_v57 }
 0x270   : > { %3716 = vmatpush.bf16.msra.mxu1 %v5953_v58 }
 0x271   : > { %3729 = vmatpush.bf16.msra.mxu2 %v5961_v16  ;;  %3741 = vmatpush.bf16.msra.mxu3 %v5970_v50 }
 0x273   : > { %3704 = vmatpush.bf16.msra.mxu0 %v5944_v63 }
 0x274   : > { %3717 = vmatpush.bf16.msra.mxu1 %v5952_v0 }
 0x275   : > { %3730 = vmatpush.bf16.msra.mxu2 %v5960_v15  ;;  %3742 = vmatpush.bf16.msra.mxu3 %v5969_v51 }
 0x277   : > { %3705 = vmatpush.bf16.msra.mxu0 %v5943_v6  ;;  %v3231_v11 = vpop.f32.mrf.mxu0 }
 0x278   : > { %3718 = vmatpush.bf16.msra.mxu1 %v5951_v8  ;;  %v3244_v12 = vpop.f32.mrf.mxu1  ;;  %v3232_v24 = vadd.f32 %v3231_v11, %v1728_v30 }
 0x279   : > { %3731 = vmatpush.bf16.msra.mxu2 %v5959_v20  ;;  %3743 = vmatpush.bf16.msra.mxu3 %v5968_v21 }
 0x27a   : > { %3706 = vmatmul.bf16.vlgmr.msra.gmra.mxu0 %v3434_v23  ;;  %v3245_v28 = vadd.f32 %v3244_v12, %v3232_v24  ;;  %v6079_v12 = vld [vmem:[#allocation12] ss:$0 sm:$0xff] }
 0x27b   : > { %3719 = vmatmul.bf16.vlgmr.msra.gmra.mxu1 %v3435_v9 }
 0x27d   : > { %3744 = vmatpush.bf16.msra.mxu3 %v5967_v54 }
 0x27f   : > { %v3257_v13 = vpop.f32.mrf.mxu2  ;;  %v3233_v18 = vpop.f32.mrf.mxu0 }
 0x280   : > { %v3246_v19 = vpop.f32.mrf.mxu1  ;;  %v3258_v31 = vadd.f32 %v3257_v13, %v3245_v28 }
 0x283   : > { %v3270_v17 = vpop.f32.mrf.mxu3 }
 0x284   : > { %v3271_v36 = vadd.f32 %v3270_v17, %v3258_v31 }
 0x287   : > { %v3259_v7 = vpop.f32.mrf.mxu2 }
 0x28b   : > { %v3272_v27 = vpop.f32.mrf.mxu3 }
 0x297   : > { %v3283_v37 = vpop.f32.mrf.mxu0 }
 0x298   : > { %v3284_v29 = vadd.f32 %v3283_v37, %v3271_v36  ;;  %v3296_v33 = vpop.f32.mrf.mxu1 }
 0x29a   : > { %v3297_v35 = vadd.f32 %v3296_v33, %v3284_v29 }
 0x29f   : > { %v3309_v38 = vpop.f32.mrf.mxu2  ;;  %v3285_v42 = vpop.f32.mrf.mxu0 }
 0x2a0   : > { %v3310_v39 = vadd.f32 %v3309_v38, %v3297_v35  ;;  %v3298_v43 = vpop.f32.mrf.mxu1 }
 0x2a3   : > { %v3322_v40 = vpop.f32.mrf.mxu3 }
 0x2a4   : > { %v3323_v14 = vadd.f32 %v3322_v40, %v3310_v39 }
 0x2a6   : > { %v3432_v34 = vmax.f32 %v3323_v14, 0.0 }
 0x2a7   : > { %v3311_v47 = vpop.f32.mrf.mxu2 }
 0x2a8   : > { %v3436_v45 = vpack.c.bf16 %v3432_v34, %v3432_v34 }
 0x2aa   : > { %3732 = vmatmul.bf16.vlgmr.msra.gmra.mxu2 %v3436_v45 }
 0x2ab   : > { %v3324_v48 = vpop.f32.mrf.mxu3 }
 0x2b7   : > { %v3335_v22 = vpop.f32.mrf.mxu0 }
 0x2b8   : > { %v3348_v26 = vpop.f32.mrf.mxu1  ;;  %v3336_v59 = vadd.f32 %v3335_v22, %v1729_v56 }
 0x2ba   : > { %v3349_v60 = vadd.f32 %v3348_v26, %v3336_v59 }
 0x2bf   : > { %v3361_v25 = vpop.f32.mrf.mxu2  ;;  %v3337_v53 = vpop.f32.mrf.mxu0 }
 0x2c0   : > { %v3350_v55 = vpop.f32.mrf.mxu1  ;;  %v3362_v61 = vadd.f32 %v3361_v25, %v3349_v60 }
 0x2c3   : > { %v3374_v52 = vpop.f32.mrf.mxu3 }
 0x2c4   : > { %v3375_v62 = vadd.f32 %v3374_v52, %v3362_v61 }
 0x2c7   : > { %v3363_v57 = vpop.f32.mrf.mxu2 }
 0x2cb   : > { %v3376_v58 = vpop.f32.mrf.mxu3 }
 0x2d7   : > { %v3387_v63 = vpop.f32.mrf.mxu0 }
 0x2d8   : > { %v3400_v0 = vpop.f32.mrf.mxu1  ;;  %v3388_v1 = vadd.f32 %v3387_v63, %v3375_v62 }
 0x2da   : > { %v3401_v2 = vadd.f32 %v3400_v0, %v3388_v1 }
 0x2df   : > { %v3413_v3 = vpop.f32.mrf.mxu2  ;;  %v3389_v6 = vpop.f32.mrf.mxu0 }
 0x2e0   : > { %v3414_v5 = vadd.f32 %v3413_v3, %v3401_v2  ;;  %v3402_v8 = vpop.f32.mrf.mxu1 }
 0x2e3   : > { %v3426_v4 = vpop.f32.mrf.mxu3 }
 0x2e4   : > { %v3427_v10 = vadd.f32 %v3426_v4, %v3414_v5 }
 0x2e6   : > { %v3433_v9 = vmax.f32 %v3427_v10, 0.0 }
 0x2e7   : > { %v3415_v11 = vpop.f32.mrf.mxu2 }
 0x2e8   : > { %v3437_v23 = vpack.c.bf16 %v3433_v9, %v3433_v9 }
 0x2ea   : > { %3745 = vmatmul.bf16.vlgmr.msra.gmra.mxu3 %v3437_v23 }
 0x2eb   : > { %v3428_v32 = vpop.f32.mrf.mxu3 }
 0x2f7   : > { %v3707_v16 = vpop.f32.mrf.mxu0 }
 0x2f8   : > { %v3720_v13 = vpop.f32.mrf.mxu1  ;;  %v3708_v15 = vadd.f32 %v6079_v12, %v3707_v16 }
 0x2fa   : > { %v3721_v17 = vadd.f32 %v3720_v13, %v3708_v15 }
 0x2ff   : > { %v3709_v18 = vpop.f32.mrf.mxu0 }
 0x300   : > { %v3722_v19 = vpop.f32.mrf.mxu1 }
 0x32d   : > { %v3733_v20 = vpop.f32.mrf.mxu2 }
 0x32e   : > { %v3734_v7 = vadd.f32 %v3733_v20, %v3721_v17 }
 0x335   : > { %v3735_v30 = vpop.f32.mrf.mxu2 }
 0x36d   : > { %v3746_v24 = vpop.f32.mrf.mxu3 }
 0x36e   : > { %v3747_v27 = vadd.f32 %v3746_v24, %v3734_v7 }
 0x370   : > { %3750 = vst [vmem:[#allocation14] sm:$0x3] %v3747_v27 }
 0x375   : > { %v3748_v28 = vpop.f32.mrf.mxu3 }
 0x376 PF: > { %p6032_p3 = scmp.eq.s32.totalorder %s6417_s8, 7  ;;  %s6352_s19 = smov [#allocation14]  }
 0x377   : > { %s3757_s20 = sshll.u32 %s6352_s19, 4  ;;  %s3759_s10 = sshll.u32 %s6930_s7, 4  ;;  %s3758_s20 = int_to_ptr.vmem [resolvable:$true] %s3757_s20  ;;  %s3760_s10 = int_to_ptr.hbm [resolvable:$true] %s3759_s10 }
 0x378   : > { %5998 = dma.vmem_to_hbm [thread:$0]  (%p6032_p3), %s3758_s20, 32, %s3760_s10, [#allocation5]  }
 0x379   : > { %6321 = dma.done.wait (%p6032_p3), [#allocation5], 32  }
 0x37a   : > { %6323 = vsyncadd (%p6032_p3), [#allocation5], 4294967264 }
 0x37b PF: > { %p21_p12 = scmp.ge.s32.totalorder %s6458_s21, 10   ;;  %s6935_s24 = smov %s6330_s25 }
 0x37c   : > { %s6936_s25 = smov %s6334_s26  ;;  %s6937_s26 = smov %s6469_s28 }
 0x37d   : > { %s6938_s27 = smov %s6458_s21  ;;  %23 = sbr.rel (!%p21_p12) target bundleno = 7 (0x7), region = 117 }
 0x382   :  { %3773 = vsyncpa [#allocation4], 1 }
 0x383   :  { %3775 = vsyncpa [#allocation4 + $0x1], 1 }
 0x384   :  { %3776 = vsyncpa [#allocation7], 1 }
 0x385   :  { %3777 = vsyncpa [#allocation10], 1 }
 0x386   :  { %3778 = vsyncpa [#allocation13], 1 }
 0x387   :  { %3779 = vsyncpa [#allocation5], 1 }
 0x388   :  { %3781 = vsyncpa [#allocation5 + $0x1], 1 }

</bundles_post_ra>
